<compile_context>
chip_gen: v7x
topology: tpu7x:2x2x1
jax: 0.10.0
libtpu: 0.0.40
codegen_flags: <defaults>
</compile_context>

<pallas_src>
import functools
import math

import jax
import jax.numpy as jnp
from jax import lax
from jax.experimental import pallas as pl
from jax.experimental.pallas import tpu as pltpu


# ----------------------------------------------------------------------------
# Kernels
# ----------------------------------------------------------------------------
def _cbr_big_kernel(pln_ref, w_ref, b_ref, o_ref, acc_ref, *,
                    offs, chunk, n_chunks, inv_m):
    """Fused Conv(4x4, s2, p1) + InstanceNorm2d + ReLU for ONE image.

    pln_ref: (8*L, Cin)     bf16  8 shifted phase planes, flattened (L rows each)
    w_ref  : (16, Cin, Cout) bf16 one (Cin, Cout) matrix per conv tap
    b_ref  : (1, Cout)      f32
    o_ref  : (M, Cout)      bf16  conv output rows, M = Ho*Wo (row = i*Wo + j)
    acc_ref: (M, Cout)      f32   VMEM scratch holding the biased conv result
    offs   : 16 static row offsets; tap t for output row r reads plane row
             offs[t] + r, i.e. a contiguous aligned slab per M-chunk.
    """
    cout = o_ref.shape[1]
    bias = b_ref[...]

    # Pass 1: chunked tap accumulation on the MXU + one-pass IN statistics.
    def conv_chunk(ci, carry):
        s1, s2 = carry
        c0 = pl.multiple_of(ci * chunk, chunk)
        acc = jnp.zeros((chunk, cout), jnp.float32)
        for t, off in enumerate(offs):            # uninterrupted 16-tap chain
            tap = pln_ref[pl.ds(off + c0, chunk), :]
            acc = acc + jnp.dot(tap, w_ref[t],
                                preferred_element_type=jnp.float32)
        acc = acc + bias
        acc_ref[pl.ds(c0, chunk), :] = acc        # single scratch write / chunk
        return (s1 + jnp.sum(acc, axis=0, keepdims=True),
                s2 + jnp.sum(acc * acc, axis=0, keepdims=True))

    zeros = jnp.zeros((1, cout), jnp.float32)
    s1, s2 = lax.fori_loop(0, n_chunks, conv_chunk, (zeros, zeros))

    # Pass 2: InstanceNorm2d (biased variance, eps=1e-5, no affine) + ReLU.
    mean = s1 * inv_m
    var = s2 * inv_m - mean * mean
    scale = lax.rsqrt(var + 1e-5)

    def norm_chunk(ci, carry):
        c0 = pl.multiple_of(ci * chunk, chunk)
        xc = acc_ref[pl.ds(c0, chunk), :]
        o_ref[pl.ds(c0, chunk), :] = jnp.maximum(
            (xc - mean) * scale, 0.0).astype(o_ref.dtype)
        return carry

    lax.fori_loop(0, n_chunks, norm_chunk, 0)


def _cbr_small_kernel(col_ref, w_ref, b_ref, o_ref, *, n_img, m):
    """Batch-folded Conv(4x4, s2, p1) + InstanceNorm2d + ReLU (small layers).

    col_ref: (16, N*M, Cin) bf16  per-tap im2col planes, image-major rows
    o_ref  : (N, M, Cout)   bf16
    """
    cout = o_ref.shape[2]
    acc = jnp.zeros((n_img * m, cout), jnp.float32)
    for t in range(16):                           # one GEMM chain, M = N*M rows
        acc = acc + jnp.dot(col_ref[t], w_ref[t],
                            preferred_element_type=jnp.float32)
    acc = (acc + b_ref[...]).reshape(n_img, m, cout)
    inv_m = 1.0 / m
    mean = jnp.sum(acc, axis=1, keepdims=True) * inv_m
    var = jnp.sum(acc * acc, axis=1, keepdims=True) * inv_m - mean * mean
    y = (acc - mean) * lax.rsqrt(var + 1e-5)
    o_ref[...] = jnp.maximum(y, 0.0).astype(o_ref.dtype)


def _tail_kernel(xf_ref, w_ref, b_ref, lw_ref, lb_ref, o_ref):
    """Fused: valid Conv4x4 (1x1 output) + InstanceNorm + ReLU + Linear(base, 1).

    xf_ref: (N, 16*Cin) bf16  full 4x4xCin receptive field per image
    w_ref : (16*Cin, Cout) bf16
    """
    conv = jnp.dot(xf_ref[...], w_ref[...],
                   preferred_element_type=jnp.float32) + b_ref[...]
    # InstanceNorm2d over a single 1x1 spatial position is degenerate: mean == x,
    # var == 0, so the normalized map is exactly 0.  Kept literal so NaNs
    # propagate exactly like the per-op PyTorch semantics.
    mean = conv
    var = conv * conv - mean * mean
    feat = jnp.maximum((conv - mean) * lax.rsqrt(var + 1e-5), 0.0)
    o_ref[...] = jnp.sum(feat * lw_ref[...], axis=-1, keepdims=True) + lb_ref[...]


# ----------------------------------------------------------------------------
# Pallas wrappers
# ----------------------------------------------------------------------------
def _pick_chunk(m, cout):
    limit = 128 if cout <= 128 else 64            # per-chunk f32 acc stays in vregs
    c = min(limit, m)
    while c > 8 and m % c:
        c //= 2
    return c if m % c == 0 else m


def _cbr_big_pallas(planes, w_taps, bias, ho, wo):
    n, rows, cin = planes.shape
    cout = w_taps.shape[-1]
    m = ho * wo
    big_l = (ho + 1) * wo
    assert rows == 8 * big_l
    chunk = _pick_chunk(m, cout)
    # Tap (kh, kw) = (2a+r, 2b+s) lives in plane p = 4b + 2r + s at row offset a*wo.
    offs = tuple((4 * (kw // 2) + 2 * (kh % 2) + (kw % 2)) * big_l + (kh // 2) * wo
                 for kh in range(4) for kw in range(4))
    # No overshoot: every tap slab stays inside its own plane (no guard rows).
    assert all((o % big_l) + m <= big_l for o in offs)
    cost = pl.CostEstimate(
        flops=int(2 * 16 * n * m * cin * cout),
        transcendentals=int(n * cout),
        bytes_accessed=int(planes.size * 2 + n * (w_taps.size * 2 + bias.size * 4)
                           + n * m * cout * 2))
    kern = functools.partial(_cbr_big_kernel, offs=offs, chunk=chunk,
                             n_chunks=m // chunk, inv_m=1.0 / m)
    return pl.pallas_call(
        kern,
        out_shape=jax.ShapeDtypeStruct((n, m, cout), jnp.bfloat16),
        grid=(n,),
        in_specs=[pl.BlockSpec((None, rows, cin), lambda i: (i, 0, 0)),
                  pl.BlockSpec((16, cin, cout), lambda i: (0, 0, 0)),
                  pl.BlockSpec((1, cout), lambda i: (0, 0))],
        out_specs=pl.BlockSpec((None, m, cout), lambda i: (i, 0, 0)),
        scratch_shapes=[pltpu.VMEM((m, cout), jnp.float32)],
        compiler_params=pltpu.CompilerParams(dimension_semantics=("parallel",)),
        cost_estimate=cost,
    )(planes, w_taps, bias)


def _cbr_small_pallas(cols, w_taps, bias, n_img, m):
    _, nm, cin = cols.shape
    cout = w_taps.shape[-1]
    kern = functools.partial(_cbr_small_kernel, n_img=n_img, m=m)
    return pl.pallas_call(
        kern,
        out_shape=jax.ShapeDtypeStruct((n_img, m, cout), jnp.bfloat16),
        grid=(1,),
        in_specs=[pl.BlockSpec((16, nm, cin), lambda i: (0, 0, 0)),
                  pl.BlockSpec((16, cin, cout), lambda i: (0, 0, 0)),
                  pl.BlockSpec((1, cout), lambda i: (0, 0))],
        out_specs=pl.BlockSpec((n_img, m, cout), lambda i: (0, 0, 0)),
    )(cols, w_taps, bias)


def _tail_pallas(xf, w4, b4, lin_w, lin_b):
    n, kc = xf.shape
    cout = w4.shape[-1]
    return pl.pallas_call(
        _tail_kernel,
        out_shape=jax.ShapeDtypeStruct((n, 1), jnp.float32),
        grid=(1,),
        in_specs=[pl.BlockSpec((n, kc), lambda i: (0, 0)),
                  pl.BlockSpec((kc, cout), lambda i: (0, 0)),
                  pl.BlockSpec((1, cout), lambda i: (0, 0)),
                  pl.BlockSpec((1, cout), lambda i: (0, 0)),
                  pl.BlockSpec((1, 1), lambda i: (0, 0))],
        out_specs=pl.BlockSpec((n, 1), lambda i: (0, 0)),
    )(xf, w4, b4, lin_w, lin_b)


# ----------------------------------------------------------------------------
# XLA-side layout prep (input-sized copies only; no K*K blow-up for layer 1)
# ----------------------------------------------------------------------------
def _phase_planes_s2(x_nhwc):
    """8 shifted & trimmed stride-2 phase planes, flattened and concatenated.

    Plane p = 4b + 2r + s holds plane[i*Wo + j, :] = x_pad[2i+r, 2(j+b)+s, :]
    for i in [0, Ho], j in [0, Wo); it has L = (Ho+1)*Wo rows, so conv tap
    (kh, kw) = (2a+r, 2b+s) for output row i*Wo + j reads exactly plane row
    (i*Wo + j) + a*Wo: a contiguous, aligned slab -- no mask, no guard rows.
    """
    n, h, w, c = x_nhwc.shape
    ho, wo = h // 2, w // 2
    xp = jnp.pad(x_nhwc.astype(jnp.bfloat16), ((0, 0), (1, 1), (1, 1), (0, 0)))
    planes = [xp[:, r::2, s::2, :][:, :, b:b + wo, :]        # (n, ho+1, wo, c)
              for b in (0, 1) for r in (0, 1) for s in (0, 1)]
    fl = jnp.stack(planes, axis=1).reshape(n, 8 * (ho + 1) * wo, c)
    return fl, ho, wo


def _im2col_s2(y_nhwc):
    """Per-tap im2col planes for a SMALL Conv(4x4, s2, p1) layer, batch-folded:
    cols[kh*4 + kw, img*M + i*Wo + j, :] = y_pad[img, 2i+kh, 2j+kw, :]."""
    n, h, w, c = y_nhwc.shape
    ho, wo = h // 2, w // 2
    yp = jnp.pad(y_nhwc.astype(jnp.bfloat16), ((0, 0), (1, 1), (1, 1), (0, 0)))
    cols = [yp[:, kh:kh + 2 * ho:2, kw:kw + 2 * wo:2, :]     # (n, ho, wo, c)
            for kh in range(4) for kw in range(4)]
    return jnp.stack(cols, axis=0).reshape(16, n * ho * wo, c), ho, wo


# ----------------------------------------------------------------------------
# Parameter init (xavier_uniform gain('linear')=1 on conv weights, torch defaults
# for conv / linear biases and the linear weight)
# ----------------------------------------------------------------------------
def _pack_conv_taps(w):
    """(Cout, Cin, 4, 4) torch conv weight -> (16, Cin, Cout) bf16, (kh,kw) order."""
    return jnp.stack([w[:, :, kh, kw].T for kh in range(4) for kw in range(4)]
                     ).astype(jnp.bfloat16)


def init_content_discriminator(key, base=256):
    def conv_init(kw_key, kb_key, cin, cout, k):
        fan_in, fan_out = cin * k * k, cout * k * k
        a = math.sqrt(6.0 / (fan_in + fan_out))   # xavier_uniform, gain('linear')=1
        w = jax.random.uniform(kw_key, (cout, cin, k, k), jnp.float32, -a, a)
        bb = 1.0 / math.sqrt(fan_in)              # default nn.Conv2d bias init
        b = jax.random.uniform(kb_key, (1, cout), jnp.float32, -bb, bb)
        return w, b

    keys = jax.random.split(key, 10)
    convs = []
    for i in range(3):                            # three stride-2 CBR blocks
        w, b = conv_init(keys[2 * i], keys[2 * i + 1], base, base, 4)
        convs.append((_pack_conv_taps(w), b))
    w4, b4 = conv_init(keys[6], keys[7], base, base, 4)
    # Valid 4x4 conv on a 4x4 map == one GEMM over the flattened receptive field.
    last_w = jnp.transpose(w4, (2, 3, 1, 0)).reshape(16 * base, base).astype(jnp.bfloat16)
    lb = 1.0 / math.sqrt(base)                    # default nn.Linear init
    lin_w = jax.random.uniform(keys[8], (1, base), jnp.float32, -lb, lb)
    lin_b = jax.random.uniform(keys[9], (1, 1), jnp.float32, -lb, lb)
    return {"conv": convs, "last_w": last_w, "last_b": b4,
            "lin_w": lin_w, "lin_b": lin_b}


# ----------------------------------------------------------------------------
# Forward pass
# ----------------------------------------------------------------------------
def content_discriminator_forward(x_nchw, params):
    """ContentDiscriminator forward.  x: (N, base, H, W) NCHW, returns (N, 1)."""
    n = x_nchw.shape[0]
    y = jnp.transpose(x_nchw, (0, 2, 3, 1))       # NCHW -> NHWC once; stay NHWC.

    # ---- CBR 1 (the only large layer): per-image grid, M-chunked fused kernel.
    w1, b1 = params["conv"][0]
    planes, ho, wo = _phase_planes_s2(y)
    y = _cbr_big_pallas(planes, w1, b1, ho, wo).reshape(n, ho, wo, -1)

    # ---- CBR 2-3: tiny layers, batch folded into a single grid step each.
    # TODO(synk): emit the next layer's phase/im2col layout directly from the
    # kernel epilogue (or fuse CBR 2-4 + head into one call with intermediates
    # held in VMEM) to drop the remaining XLA glue between these tiny kernels.
    for li in (1, 2):
        wl, bl = params["conv"][li]
        cols, ho, wo = _im2col_s2(y)
        y = _cbr_small_pallas(cols, wl, bl, n, ho * wo).reshape(n, ho, wo, -1)

    # ---- CBR 4 (valid 4x4 conv -> 1x1) + InstanceNorm + ReLU + Linear, fused.
    # NOTE: for the module's shapes to compose (h.view(N, -1) must yield exactly
    # `base` features for nn.Linear(base, 1)) the last CBR sees a 4x4 map and
    # emits a 1x1 map; InstanceNorm over a single spatial element is degenerate
    # ((x - x) * rsqrt(0 + eps) == 0), so the discriminator output equals the
    # linear bias.  We keep the literal per-op semantics (PyTorch's
    # nn.InstanceNorm2d would raise on a 1x1 map in training mode).
    assert y.shape[1] == 4 and y.shape[2] == 4, "module shapes require a 4x4 map"
    xf = y.reshape(n, -1)                         # (N, 16*base) bf16
    return _tail_pallas(xf, params["last_w"], params["last_b"],
                        params["lin_w"], params["lin_b"])


if __name__ == "__main__":
    key = jax.random.PRNGKey(0)
    k_param, k_x = jax.random.split(key)

    base = 128   # module default is 256; 128 keeps the demo small yet lane-dense
    params = init_content_discriminator(k_param, base=base)

    # 32x32 is the spatial size the module's shapes require:
    # 32 -> 16 -> 8 -> 4 (three stride-2 CBRs), then the 4x4 valid conv -> 1x1,
    # so the flatten has exactly `base` features for nn.Linear(base, 1).
    x = jax.random.normal(k_x, (2, base, 32, 32), jnp.float32)   # NCHW like torch

    fwd = jax.jit(content_discriminator_forward)
    out = jax.block_until_ready(fwd(x, params))

    assert out.shape == (2, 1), out.shape
    assert bool(jnp.all(jnp.isfinite(out)))
    print("KERNEL_OK")
</pallas_src>

<mosaic_0001>
module attributes {stable_mosaic.version = 11 : i64} {
  func.func @_cbr_big_kernel(%arg0: i32, %arg1: memref<1x2176x128xbf16, #tpu.memory_space<vmem>>, %arg2: memref<16x128x128xbf16, #tpu.memory_space<vmem>>, %arg3: memref<1x128xf32, #tpu.memory_space<vmem>>, %arg4: memref<1x256x128xbf16, #tpu.memory_space<vmem>>, %arg5: memref<256x128xf32, #tpu.memory_space<vmem>>) attributes {dimension_semantics = [#tpu.dimension_semantics<parallel>], iteration_bounds = array<i64: 2>, scalar_prefetch = 0 : i64, scratch_operands = 1 : i64, tpu.core_type = #tpu.core_type<tc>, window_params = [{transform_indices = @transform_0, window_bounds = array<i64: 1, 2176, 128>}, {pipeline_mode = #tpu.pipeline_mode<synchronous>, transform_indices = @transform_1, window_bounds = array<i64: 16, 128, 128>}, {pipeline_mode = #tpu.pipeline_mode<synchronous>, transform_indices = @transform_2, window_bounds = array<i64: 1, 128>}, {transform_indices = @transform_3, window_bounds = array<i64: 1, 256, 128>}]} {
    %c0 = arith.constant 0 : index
    %c0_0 = arith.constant 0 : index
    %0 = vector.load %arg3[%c0, %c0_0] : memref<1x128xf32, #tpu.memory_space<vmem>>, vector<1x128xf32>
    %cst = arith.constant 0.000000e+00 : f32
    %1 = vector.broadcast %cst : f32 to vector<1x128xf32>
    %c0_i32 = arith.constant 0 : i32
    %c2_i32 = arith.constant 2 : i32
    %2 = arith.addi %c0_i32, %c2_i32 : i32
    %c1_i32 = arith.constant 1 : i32
    %3:2 = scf.for %arg6 = %c0_i32 to %2 step %c1_i32 iter_args(%arg7 = %1, %arg8 = %1) -> (vector<1x128xf32>, vector<1x128xf32>)  : i32 {
      %c128_i32 = arith.constant 128 : i32
      %14 = arith.muli %arg6, %c128_i32 : i32
      %15 = tpu.assume_multiple %14, 128 : i32
      %cst_9 = arith.constant 0.000000e+00 : f32
      %16 = vector.broadcast %cst_9 : f32 to vector<128x128xf32>
      %c0_i32_10 = arith.constant 0 : i32
      %17 = arith.addi %c0_i32_10, %15 : i32
      %c0_11 = arith.constant 0 : index
      %18 = arith.index_cast %17 : i32 to index
      %c0_12 = arith.constant 0 : index
      %19 = vector.load %arg1[%c0_11, %18, %c0_12] : memref<1x2176x128xbf16, #tpu.memory_space<vmem>>, vector<1x128x128xbf16>
      %20 = vector.shape_cast %19 : vector<1x128x128xbf16> to vector<128x128xbf16>
      %c0_13 = arith.constant 0 : index
      %c0_14 = arith.constant 0 : index
      %c0_15 = arith.constant 0 : index
      %21 = vector.load %arg2[%c0_13, %c0_14, %c0_15] : memref<16x128x128xbf16, #tpu.memory_space<vmem>>, vector<1x128x128xbf16>
      %22 = vector.shape_cast %21 : vector<1x128x128xbf16> to vector<128x128xbf16>
      %cst_16 = arith.constant dense<0.000000e+00> : vector<128x128xf32>
      %23 = tpu.matmul %20, %22, %cst_16 {dimension_numbers = #tpu.dot_dimension_numbers<[1], [0], [0], [1], [0, 0, 1, 1], [], []>} : vector<128x128xbf16>, vector<128x128xbf16>, vector<128x128xf32> -> vector<128x128xf32>
      %24 = arith.addf %16, %23 : vector<128x128xf32>
      %c272_i32 = arith.constant 272 : i32
      %25 = arith.addi %c272_i32, %15 : i32
      %c0_17 = arith.constant 0 : index
      %26 = arith.index_cast %25 : i32 to index
      %c0_18 = arith.constant 0 : index
      %27 = vector.load %arg1[%c0_17, %26, %c0_18] : memref<1x2176x128xbf16, #tpu.memory_space<vmem>>, vector<1x128x128xbf16>
      %28 = vector.shape_cast %27 : vector<1x128x128xbf16> to vector<128x128xbf16>
      %c1 = arith.constant 1 : index
      %c0_19 = arith.constant 0 : index
      %c0_20 = arith.constant 0 : index
      %29 = vector.load %arg2[%c1, %c0_19, %c0_20] : memref<16x128x128xbf16, #tpu.memory_space<vmem>>, vector<1x128x128xbf16>
      %30 = vector.shape_cast %29 : vector<1x128x128xbf16> to vector<128x128xbf16>
      %cst_21 = arith.constant dense<0.000000e+00> : vector<128x128xf32>
      %31 = tpu.matmul %28, %30, %cst_21 {dimension_numbers = #tpu.dot_dimension_numbers<[1], [0], [0], [1], [0, 0, 1, 1], [], []>} : vector<128x128xbf16>, vector<128x128xbf16>, vector<128x128xf32> -> vector<128x128xf32>
      %32 = arith.addf %24, %31 : vector<128x128xf32>
      %c1088_i32 = arith.constant 1088 : i32
      %33 = arith.addi %c1088_i32, %15 : i32
      %c0_22 = arith.constant 0 : index
      %34 = arith.index_cast %33 : i32 to index
      %c0_23 = arith.constant 0 : index
      %35 = vector.load %arg1[%c0_22, %34, %c0_23] : memref<1x2176x128xbf16, #tpu.memory_space<vmem>>, vector<1x128x128xbf16>
      %36 = vector.shape_cast %35 : vector<1x128x128xbf16> to vector<128x128xbf16>
      %c2 = arith.constant 2 : index
      %c0_24 = arith.constant 0 : index
      %c0_25 = arith.constant 0 : index
      %37 = vector.load %arg2[%c2, %c0_24, %c0_25] : memref<16x128x128xbf16, #tpu.memory_space<vmem>>, vector<1x128x128xbf16>
      %38 = vector.shape_cast %37 : vector<1x128x128xbf16> to vector<128x128xbf16>
      %cst_26 = arith.constant dense<0.000000e+00> : vector<128x128xf32>
      %39 = tpu.matmul %36, %38, %cst_26 {dimension_numbers = #tpu.dot_dimension_numbers<[1], [0], [0], [1], [0, 0, 1, 1], [], []>} : vector<128x128xbf16>, vector<128x128xbf16>, vector<128x128xf32> -> vector<128x128xf32>
      %40 = arith.addf %32, %39 : vector<128x128xf32>
      %c1360_i32 = arith.constant 1360 : i32
      %41 = arith.addi %c1360_i32, %15 : i32
      %c0_27 = arith.constant 0 : index
      %42 = arith.index_cast %41 : i32 to index
      %c0_28 = arith.constant 0 : index
      %43 = vector.load %arg1[%c0_27, %42, %c0_28] : memref<1x2176x128xbf16, #tpu.memory_space<vmem>>, vector<1x128x128xbf16>
      %44 = vector.shape_cast %43 : vector<1x128x128xbf16> to vector<128x128xbf16>
      %c3 = arith.constant 3 : index
      %c0_29 = arith.constant 0 : index
      %c0_30 = arith.constant 0 : index
      %45 = vector.load %arg2[%c3, %c0_29, %c0_30] : memref<16x128x128xbf16, #tpu.memory_space<vmem>>, vector<1x128x128xbf16>
      %46 = vector.shape_cast %45 : vector<1x128x128xbf16> to vector<128x128xbf16>
      %cst_31 = arith.constant dense<0.000000e+00> : vector<128x128xf32>
      %47 = tpu.matmul %44, %46, %cst_31 {dimension_numbers = #tpu.dot_dimension_numbers<[1], [0], [0], [1], [0, 0, 1, 1], [], []>} : vector<128x128xbf16>, vector<128x128xbf16>, vector<128x128xf32> -> vector<128x128xf32>
      %48 = arith.addf %40, %47 : vector<128x128xf32>
      %c544_i32 = arith.constant 544 : i32
      %49 = arith.addi %c544_i32, %15 : i32
      %c0_32 = arith.constant 0 : index
      %50 = arith.index_cast %49 : i32 to index
      %c0_33 = arith.constant 0 : index
      %51 = vector.load %arg1[%c0_32, %50, %c0_33] : memref<1x2176x128xbf16, #tpu.memory_space<vmem>>, vector<1x128x128xbf16>
      %52 = vector.shape_cast %51 : vector<1x128x128xbf16> to vector<128x128xbf16>
      %c4 = arith.constant 4 : index
      %c0_34 = arith.constant 0 : index
      %c0_35 = arith.constant 0 : index
      %53 = vector.load %arg2[%c4, %c0_34, %c0_35] : memref<16x128x128xbf16, #tpu.memory_space<vmem>>, vector<1x128x128xbf16>
      %54 = vector.shape_cast %53 : vector<1x128x128xbf16> to vector<128x128xbf16>
      %cst_36 = arith.constant dense<0.000000e+00> : vector<128x128xf32>
      %55 = tpu.matmul %52, %54, %cst_36 {dimension_numbers = #tpu.dot_dimension_numbers<[1], [0], [0], [1], [0, 0, 1, 1], [], []>} : vector<128x128xbf16>, vector<128x128xbf16>, vector<128x128xf32> -> vector<128x128xf32>
      %56 = arith.addf %48, %55 : vector<128x128xf32>
      %c816_i32 = arith.constant 816 : i32
      %57 = arith.addi %c816_i32, %15 : i32
      %c0_37 = arith.constant 0 : index
      %58 = arith.index_cast %57 : i32 to index
      %c0_38 = arith.constant 0 : index
      %59 = vector.load %arg1[%c0_37, %58, %c0_38] : memref<1x2176x128xbf16, #tpu.memory_space<vmem>>, vector<1x128x128xbf16>
      %60 = vector.shape_cast %59 : vector<1x128x128xbf16> to vector<128x128xbf16>
      %c5 = arith.constant 5 : index
      %c0_39 = arith.constant 0 : index
      %c0_40 = arith.constant 0 : index
      %61 = vector.load %arg2[%c5, %c0_39, %c0_40] : memref<16x128x128xbf16, #tpu.memory_space<vmem>>, vector<1x128x128xbf16>
      %62 = vector.shape_cast %61 : vector<1x128x128xbf16> to vector<128x128xbf16>
      %cst_41 = arith.constant dense<0.000000e+00> : vector<128x128xf32>
      %63 = tpu.matmul %60, %62, %cst_41 {dimension_numbers = #tpu.dot_dimension_numbers<[1], [0], [0], [1], [0, 0, 1, 1], [], []>} : vector<128x128xbf16>, vector<128x128xbf16>, vector<128x128xf32> -> vector<128x128xf32>
      %64 = arith.addf %56, %63 : vector<128x128xf32>
      %c1632_i32 = arith.constant 1632 : i32
      %65 = arith.addi %c1632_i32, %15 : i32
      %c0_42 = arith.constant 0 : index
      %66 = arith.index_cast %65 : i32 to index
      %c0_43 = arith.constant 0 : index
      %67 = vector.load %arg1[%c0_42, %66, %c0_43] : memref<1x2176x128xbf16, #tpu.memory_space<vmem>>, vector<1x128x128xbf16>
      %68 = vector.shape_cast %67 : vector<1x128x128xbf16> to vector<128x128xbf16>
      %c6 = arith.constant 6 : index
      %c0_44 = arith.constant 0 : index
      %c0_45 = arith.constant 0 : index
      %69 = vector.load %arg2[%c6, %c0_44, %c0_45] : memref<16x128x128xbf16, #tpu.memory_space<vmem>>, vector<1x128x128xbf16>
      %70 = vector.shape_cast %69 : vector<1x128x128xbf16> to vector<128x128xbf16>
      %cst_46 = arith.constant dense<0.000000e+00> : vector<128x128xf32>
      %71 = tpu.matmul %68, %70, %cst_46 {dimension_numbers = #tpu.dot_dimension_numbers<[1], [0], [0], [1], [0, 0, 1, 1], [], []>} : vector<128x128xbf16>, vector<128x128xbf16>, vector<128x128xf32> -> vector<128x128xf32>
      %72 = arith.addf %64, %71 : vector<128x128xf32>
      %c1904_i32 = arith.constant 1904 : i32
      %73 = arith.addi %c1904_i32, %15 : i32
      %c0_47 = arith.constant 0 : index
      %74 = arith.index_cast %73 : i32 to index
      %c0_48 = arith.constant 0 : index
      %75 = vector.load %arg1[%c0_47, %74, %c0_48] : memref<1x2176x128xbf16, #tpu.memory_space<vmem>>, vector<1x128x128xbf16>
      %76 = vector.shape_cast %75 : vector<1x128x128xbf16> to vector<128x128xbf16>
      %c7 = arith.constant 7 : index
      %c0_49 = arith.constant 0 : index
      %c0_50 = arith.constant 0 : index
      %77 = vector.load %arg2[%c7, %c0_49, %c0_50] : memref<16x128x128xbf16, #tpu.memory_space<vmem>>, vector<1x128x128xbf16>
      %78 = vector.shape_cast %77 : vector<1x128x128xbf16> to vector<128x128xbf16>
      %cst_51 = arith.constant dense<0.000000e+00> : vector<128x128xf32>
      %79 = tpu.matmul %76, %78, %cst_51 {dimension_numbers = #tpu.dot_dimension_numbers<[1], [0], [0], [1], [0, 0, 1, 1], [], []>} : vector<128x128xbf16>, vector<128x128xbf16>, vector<128x128xf32> -> vector<128x128xf32>
      %80 = arith.addf %72, %79 : vector<128x128xf32>
      %c16_i32 = arith.constant 16 : i32
      %81 = arith.addi %c16_i32, %15 : i32
      %c0_52 = arith.constant 0 : index
      %82 = arith.index_cast %81 : i32 to index
      %c0_53 = arith.constant 0 : index
      %83 = vector.load %arg1[%c0_52, %82, %c0_53] : memref<1x2176x128xbf16, #tpu.memory_space<vmem>>, vector<1x128x128xbf16>
      %84 = vector.shape_cast %83 : vector<1x128x128xbf16> to vector<128x128xbf16>
      %c8 = arith.constant 8 : index
      %c0_54 = arith.constant 0 : index
      %c0_55 = arith.constant 0 : index
      %85 = vector.load %arg2[%c8, %c0_54, %c0_55] : memref<16x128x128xbf16, #tpu.memory_space<vmem>>, vector<1x128x128xbf16>
      %86 = vector.shape_cast %85 : vector<1x128x128xbf16> to vector<128x128xbf16>
      %cst_56 = arith.constant dense<0.000000e+00> : vector<128x128xf32>
      %87 = tpu.matmul %84, %86, %cst_56 {dimension_numbers = #tpu.dot_dimension_numbers<[1], [0], [0], [1], [0, 0, 1, 1], [], []>} : vector<128x128xbf16>, vector<128x128xbf16>, vector<128x128xf32> -> vector<128x128xf32>
      %88 = arith.addf %80, %87 : vector<128x128xf32>
      %c288_i32 = arith.constant 288 : i32
      %89 = arith.addi %c288_i32, %15 : i32
      %c0_57 = arith.constant 0 : index
      %90 = arith.index_cast %89 : i32 to index
      %c0_58 = arith.constant 0 : index
      %91 = vector.load %arg1[%c0_57, %90, %c0_58] : memref<1x2176x128xbf16, #tpu.memory_space<vmem>>, vector<1x128x128xbf16>
      %92 = vector.shape_cast %91 : vector<1x128x128xbf16> to vector<128x128xbf16>
      %c9 = arith.constant 9 : index
      %c0_59 = arith.constant 0 : index
      %c0_60 = arith.constant 0 : index
      %93 = vector.load %arg2[%c9, %c0_59, %c0_60] : memref<16x128x128xbf16, #tpu.memory_space<vmem>>, vector<1x128x128xbf16>
      %94 = vector.shape_cast %93 : vector<1x128x128xbf16> to vector<128x128xbf16>
      %cst_61 = arith.constant dense<0.000000e+00> : vector<128x128xf32>
      %95 = tpu.matmul %92, %94, %cst_61 {dimension_numbers = #tpu.dot_dimension_numbers<[1], [0], [0], [1], [0, 0, 1, 1], [], []>} : vector<128x128xbf16>, vector<128x128xbf16>, vector<128x128xf32> -> vector<128x128xf32>
      %96 = arith.addf %88, %95 : vector<128x128xf32>
      %c1104_i32 = arith.constant 1104 : i32
      %97 = arith.addi %c1104_i32, %15 : i32
      %c0_62 = arith.constant 0 : index
      %98 = arith.index_cast %97 : i32 to index
      %c0_63 = arith.constant 0 : index
      %99 = vector.load %arg1[%c0_62, %98, %c0_63] : memref<1x2176x128xbf16, #tpu.memory_space<vmem>>, vector<1x128x128xbf16>
      %100 = vector.shape_cast %99 : vector<1x128x128xbf16> to vector<128x128xbf16>
      %c10 = arith.constant 10 : index
      %c0_64 = arith.constant 0 : index
      %c0_65 = arith.constant 0 : index
      %101 = vector.load %arg2[%c10, %c0_64, %c0_65] : memref<16x128x128xbf16, #tpu.memory_space<vmem>>, vector<1x128x128xbf16>
      %102 = vector.shape_cast %101 : vector<1x128x128xbf16> to vector<128x128xbf16>
      %cst_66 = arith.constant dense<0.000000e+00> : vector<128x128xf32>
      %103 = tpu.matmul %100, %102, %cst_66 {dimension_numbers = #tpu.dot_dimension_numbers<[1], [0], [0], [1], [0, 0, 1, 1], [], []>} : vector<128x128xbf16>, vector<128x128xbf16>, vector<128x128xf32> -> vector<128x128xf32>
      %104 = arith.addf %96, %103 : vector<128x128xf32>
      %c1376_i32 = arith.constant 1376 : i32
      %105 = arith.addi %c1376_i32, %15 : i32
      %c0_67 = arith.constant 0 : index
      %106 = arith.index_cast %105 : i32 to index
      %c0_68 = arith.constant 0 : index
      %107 = vector.load %arg1[%c0_67, %106, %c0_68] : memref<1x2176x128xbf16, #tpu.memory_space<vmem>>, vector<1x128x128xbf16>
      %108 = vector.shape_cast %107 : vector<1x128x128xbf16> to vector<128x128xbf16>
      %c11 = arith.constant 11 : index
      %c0_69 = arith.constant 0 : index
      %c0_70 = arith.constant 0 : index
      %109 = vector.load %arg2[%c11, %c0_69, %c0_70] : memref<16x128x128xbf16, #tpu.memory_space<vmem>>, vector<1x128x128xbf16>
      %110 = vector.shape_cast %109 : vector<1x128x128xbf16> to vector<128x128xbf16>
      %cst_71 = arith.constant dense<0.000000e+00> : vector<128x128xf32>
      %111 = tpu.matmul %108, %110, %cst_71 {dimension_numbers = #tpu.dot_dimension_numbers<[1], [0], [0], [1], [0, 0, 1, 1], [], []>} : vector<128x128xbf16>, vector<128x128xbf16>, vector<128x128xf32> -> vector<128x128xf32>
      %112 = arith.addf %104, %111 : vector<128x128xf32>
      %c560_i32 = arith.constant 560 : i32
      %113 = arith.addi %c560_i32, %15 : i32
      %c0_72 = arith.constant 0 : index
      %114 = arith.index_cast %113 : i32 to index
      %c0_73 = arith.constant 0 : index
      %115 = vector.load %arg1[%c0_72, %114, %c0_73] : memref<1x2176x128xbf16, #tpu.memory_space<vmem>>, vector<1x128x128xbf16>
      %116 = vector.shape_cast %115 : vector<1x128x128xbf16> to vector<128x128xbf16>
      %c12 = arith.constant 12 : index
      %c0_74 = arith.constant 0 : index
      %c0_75 = arith.constant 0 : index
      %117 = vector.load %arg2[%c12, %c0_74, %c0_75] : memref<16x128x128xbf16, #tpu.memory_space<vmem>>, vector<1x128x128xbf16>
      %118 = vector.shape_cast %117 : vector<1x128x128xbf16> to vector<128x128xbf16>
      %cst_76 = arith.constant dense<0.000000e+00> : vector<128x128xf32>
      %119 = tpu.matmul %116, %118, %cst_76 {dimension_numbers = #tpu.dot_dimension_numbers<[1], [0], [0], [1], [0, 0, 1, 1], [], []>} : vector<128x128xbf16>, vector<128x128xbf16>, vector<128x128xf32> -> vector<128x128xf32>
      %120 = arith.addf %112, %119 : vector<128x128xf32>
      %c832_i32 = arith.constant 832 : i32
      %121 = arith.addi %c832_i32, %15 : i32
      %c0_77 = arith.constant 0 : index
      %122 = arith.index_cast %121 : i32 to index
      %c0_78 = arith.constant 0 : index
      %123 = vector.load %arg1[%c0_77, %122, %c0_78] : memref<1x2176x128xbf16, #tpu.memory_space<vmem>>, vector<1x128x128xbf16>
      %124 = vector.shape_cast %123 : vector<1x128x128xbf16> to vector<128x128xbf16>
      %c13 = arith.constant 13 : index
      %c0_79 = arith.constant 0 : index
      %c0_80 = arith.constant 0 : index
      %125 = vector.load %arg2[%c13, %c0_79, %c0_80] : memref<16x128x128xbf16, #tpu.memory_space<vmem>>, vector<1x128x128xbf16>
      %126 = vector.shape_cast %125 : vector<1x128x128xbf16> to vector<128x128xbf16>
      %cst_81 = arith.constant dense<0.000000e+00> : vector<128x128xf32>
      %127 = tpu.matmul %124, %126, %cst_81 {dimension_numbers = #tpu.dot_dimension_numbers<[1], [0], [0], [1], [0, 0, 1, 1], [], []>} : vector<128x128xbf16>, vector<128x128xbf16>, vector<128x128xf32> -> vector<128x128xf32>
      %128 = arith.addf %120, %127 : vector<128x128xf32>
      %c1648_i32 = arith.constant 1648 : i32
      %129 = arith.addi %c1648_i32, %15 : i32
      %c0_82 = arith.constant 0 : index
      %130 = arith.index_cast %129 : i32 to index
      %c0_83 = arith.constant 0 : index
      %131 = vector.load %arg1[%c0_82, %130, %c0_83] : memref<1x2176x128xbf16, #tpu.memory_space<vmem>>, vector<1x128x128xbf16>
      %132 = vector.shape_cast %131 : vector<1x128x128xbf16> to vector<128x128xbf16>
      %c14 = arith.constant 14 : index
      %c0_84 = arith.constant 0 : index
      %c0_85 = arith.constant 0 : index
      %133 = vector.load %arg2[%c14, %c0_84, %c0_85] : memref<16x128x128xbf16, #tpu.memory_space<vmem>>, vector<1x128x128xbf16>
      %134 = vector.shape_cast %133 : vector<1x128x128xbf16> to vector<128x128xbf16>
      %cst_86 = arith.constant dense<0.000000e+00> : vector<128x128xf32>
      %135 = tpu.matmul %132, %134, %cst_86 {dimension_numbers = #tpu.dot_dimension_numbers<[1], [0], [0], [1], [0, 0, 1, 1], [], []>} : vector<128x128xbf16>, vector<128x128xbf16>, vector<128x128xf32> -> vector<128x128xf32>
      %136 = arith.addf %128, %135 : vector<128x128xf32>
      %c1920_i32 = arith.constant 1920 : i32
      %137 = arith.addi %c1920_i32, %15 : i32
      %c0_87 = arith.constant 0 : index
      %138 = arith.index_cast %137 : i32 to index
      %c0_88 = arith.constant 0 : index
      %139 = vector.load %arg1[%c0_87, %138, %c0_88] : memref<1x2176x128xbf16, #tpu.memory_space<vmem>>, vector<1x128x128xbf16>
      %140 = vector.shape_cast %139 : vector<1x128x128xbf16> to vector<128x128xbf16>
      %c15 = arith.constant 15 : index
      %c0_89 = arith.constant 0 : index
      %c0_90 = arith.constant 0 : index
      %141 = vector.load %arg2[%c15, %c0_89, %c0_90] : memref<16x128x128xbf16, #tpu.memory_space<vmem>>, vector<1x128x128xbf16>
      %142 = vector.shape_cast %141 : vector<1x128x128xbf16> to vector<128x128xbf16>
      %cst_91 = arith.constant dense<0.000000e+00> : vector<128x128xf32>
      %143 = tpu.matmul %140, %142, %cst_91 {dimension_numbers = #tpu.dot_dimension_numbers<[1], [0], [0], [1], [0, 0, 1, 1], [], []>} : vector<128x128xbf16>, vector<128x128xbf16>, vector<128x128xf32> -> vector<128x128xf32>
      %144 = arith.addf %136, %143 : vector<128x128xf32>
      %145 = vector.broadcast %0 : vector<1x128xf32> to vector<128x128xf32>
      %146 = arith.addf %144, %145 : vector<128x128xf32>
      %147 = arith.index_cast %15 : i32 to index
      %c0_92 = arith.constant 0 : index
      %148 = vector.load %arg5[%147, %c0_92] : memref<256x128xf32, #tpu.memory_space<vmem>>, vector<128x128xf32>
      tpu.vector_store %arg5[%147, %c0_92], %146 {strides = array<i32>} : memref<256x128xf32, #tpu.memory_space<vmem>>, vector<128x128xf32>,
      %cst_93 = arith.constant dense<0.000000e+00> : vector<128xf32>
      %149 = vector.multi_reduction <add>, %146, %cst_93 [0] : vector<128x128xf32> to vector<128xf32>
      %150 = vector.shape_cast %149 : vector<128xf32> to vector<1x128xf32>
      %151 = arith.addf %arg7, %150 : vector<1x128xf32>
      %152 = arith.mulf %146, %146 : vector<128x128xf32>
      %cst_94 = arith.constant dense<0.000000e+00> : vector<128xf32>
      %153 = vector.multi_reduction <add>, %152, %cst_94 [0] : vector<128x128xf32> to vector<128xf32>
      %154 = vector.shape_cast %153 : vector<128xf32> to vector<1x128xf32>
      %155 = arith.addf %arg8, %154 : vector<1x128xf32>
      scf.yield %151, %155 : vector<1x128xf32>, vector<1x128xf32>
    }
    %c2_i32_1 = arith.constant 2 : i32
    %cst_2 = arith.constant 3.906250e-03 : f32
    %4 = vector.broadcast %cst_2 : f32 to vector<1x128xf32>
    %5 = arith.mulf %3#0, %4 : vector<1x128xf32>
    %cst_3 = arith.constant 3.906250e-03 : f32
    %6 = vector.broadcast %cst_3 : f32 to vector<1x128xf32>
    %7 = arith.mulf %3#1, %6 : vector<1x128xf32>
    %8 = arith.mulf %5, %5 : vector<1x128xf32>
    %9 = arith.subf %7, %8 : vector<1x128xf32>
    %cst_4 = arith.constant 9.99999974E-6 : f32
    %10 = vector.broadcast %cst_4 : f32 to vector<1x128xf32>
    %11 = arith.addf %9, %10 : vector<1x128xf32>
    %12 = math.rsqrt %11 : vector<1x128xf32>
    %c0_i32_5 = arith.constant 0 : i32
    %c2_i32_6 = arith.constant 2 : i32
    %13 = arith.addi %c0_i32_5, %c2_i32_6 : i32
    %c1_i32_7 = arith.constant 1 : i32
    scf.for %arg6 = %c0_i32_5 to %13 step %c1_i32_7  : i32 {
      %c128_i32 = arith.constant 128 : i32
      %14 = arith.muli %arg6, %c128_i32 : i32
      %15 = tpu.assume_multiple %14, 128 : i32
      %16 = arith.index_cast %15 : i32 to index
      %c0_9 = arith.constant 0 : index
      %17 = vector.load %arg5[%16, %c0_9] : memref<256x128xf32, #tpu.memory_space<vmem>>, vector<128x128xf32>
      %18 = vector.broadcast %5 : vector<1x128xf32> to vector<128x128xf32>
      %19 = arith.subf %17, %18 : vector<128x128xf32>
      %20 = vector.broadcast %12 : vector<1x128xf32> to vector<128x128xf32>
      %21 = arith.mulf %19, %20 : vector<128x128xf32>
      %cst_10 = arith.constant 0.000000e+00 : f32
      %22 = vector.broadcast %cst_10 : f32 to vector<128x128xf32>
      %23 = arith.maximumf %21, %22 : vector<128x128xf32>
      %24 = arith.truncf %23 : vector<128x128xf32> to vector<128x128xbf16>
      %c0_11 = arith.constant 0 : index
      %25 = arith.index_cast %15 : i32 to index
      %c0_12 = arith.constant 0 : index
      %26 = vector.load %arg4[%c0_11, %25, %c0_12] : memref<1x256x128xbf16, #tpu.memory_space<vmem>>, vector<1x128x128xbf16>
      %27 = vector.shape_cast %26 : vector<1x128x128xbf16> to vector<128x128xbf16>
      %28 = vector.shape_cast %24 : vector<128x128xbf16> to vector<1x128x128xbf16>
      tpu.vector_store %arg4[%c0_11, %25, %c0_12], %28 {strides = array<i32>} : memref<1x256x128xbf16, #tpu.memory_space<vmem>>, vector<1x128x128xbf16>,
    }
    %c2_i32_8 = arith.constant 2 : i32
    return
  }
  func.func @transform_0(%arg0: i32) -> (i32, i32, i32) {
    %c0_i32 = arith.constant 0 : i32
    %c0_i32_0 = arith.constant 0 : i32
    %c0_i32_1 = arith.constant 0 : i32
    return %arg0, %c0_i32, %c0_i32_0 : i32, i32, i32
  }
  func.func @transform_1(%arg0: i32) -> (i32, i32, i32) {
    %c0_i32 = arith.constant 0 : i32
    %c0_i32_0 = arith.constant 0 : i32
    %c0_i32_1 = arith.constant 0 : i32
    %c0_i32_2 = arith.constant 0 : i32
    return %c0_i32, %c0_i32_0, %c0_i32_1 : i32, i32, i32
  }
  func.func @transform_2(%arg0: i32) -> (i32, i32) {
    %c0_i32 = arith.constant 0 : i32
    %c0_i32_0 = arith.constant 0 : i32
    %c0_i32_1 = arith.constant 0 : i32
    return %c0_i32, %c0_i32_0 : i32, i32
  }
  func.func @transform_3(%arg0: i32) -> (i32, i32, i32) {
    %c0_i32 = arith.constant 0 : i32
    %c0_i32_0 = arith.constant 0 : i32
    %c0_i32_1 = arith.constant 0 : i32
    return %arg0, %c0_i32, %c0_i32_0 : i32, i32, i32
  }
}

module attributes {stable_mosaic.version = 11 : i64} {
  func.func @_cbr_small_kernel(%arg0: i32, %arg1: memref<16x128x128xbf16, #tpu.memory_space<vmem>>, %arg2: memref<16x128x128xbf16, #tpu.memory_space<vmem>>, %arg3: memref<1x128xf32, #tpu.memory_space<vmem>>, %arg4: memref<2x64x128xbf16, #tpu.memory_space<vmem>>) attributes {dimension_semantics = [#tpu.dimension_semantics<arbitrary>], iteration_bounds = array<i64: 1>, scalar_prefetch = 0 : i64, scratch_operands = 0 : i64, tpu.core_type = #tpu.core_type<tc>, window_params = [{pipeline_mode = #tpu.pipeline_mode<synchronous>, transform_indices = @transform_0, window_bounds = array<i64: 16, 128, 128>}, {pipeline_mode = #tpu.pipeline_mode<synchronous>, transform_indices = @transform_1, window_bounds = array<i64: 16, 128, 128>}, {pipeline_mode = #tpu.pipeline_mode<synchronous>, transform_indices = @transform_2, window_bounds = array<i64: 1, 128>}, {pipeline_mode = #tpu.pipeline_mode<synchronous>, transform_indices = @transform_3, window_bounds = array<i64: 2, 64, 128>}]} {
    %cst = arith.constant 0.000000e+00 : f32
    %0 = vector.broadcast %cst : f32 to vector<128x128xf32>
    %c0 = arith.constant 0 : index
    %c0_0 = arith.constant 0 : index
    %c0_1 = arith.constant 0 : index
    %1 = vector.load %arg1[%c0, %c0_0, %c0_1] : memref<16x128x128xbf16, #tpu.memory_space<vmem>>, vector<1x128x128xbf16>
    %2 = vector.shape_cast %1 : vector<1x128x128xbf16> to vector<128x128xbf16>
    %c0_2 = arith.constant 0 : index
    %c0_3 = arith.constant 0 : index
    %c0_4 = arith.constant 0 : index
    %3 = vector.load %arg2[%c0_2, %c0_3, %c0_4] : memref<16x128x128xbf16, #tpu.memory_space<vmem>>, vector<1x128x128xbf16>
    %4 = vector.shape_cast %3 : vector<1x128x128xbf16> to vector<128x128xbf16>
    %cst_5 = arith.constant dense<0.000000e+00> : vector<128x128xf32>
    %5 = tpu.matmul %2, %4, %cst_5 {dimension_numbers = #tpu.dot_dimension_numbers<[1], [0], [0], [1], [0, 0, 1, 1], [], []>} : vector<128x128xbf16>, vector<128x128xbf16>, vector<128x128xf32> -> vector<128x128xf32>
    %6 = arith.addf %0, %5 : vector<128x128xf32>
    %c1 = arith.constant 1 : index
    %c0_6 = arith.constant 0 : index
    %c0_7 = arith.constant 0 : index
    %7 = vector.load %arg1[%c1, %c0_6, %c0_7] : memref<16x128x128xbf16, #tpu.memory_space<vmem>>, vector<1x128x128xbf16>
    %8 = vector.shape_cast %7 : vector<1x128x128xbf16> to vector<128x128xbf16>
    %c1_8 = arith.constant 1 : index
    %c0_9 = arith.constant 0 : index
    %c0_10 = arith.constant 0 : index
    %9 = vector.load %arg2[%c1_8, %c0_9, %c0_10] : memref<16x128x128xbf16, #tpu.memory_space<vmem>>, vector<1x128x128xbf16>
    %10 = vector.shape_cast %9 : vector<1x128x128xbf16> to vector<128x128xbf16>
    %cst_11 = arith.constant dense<0.000000e+00> : vector<128x128xf32>
    %11 = tpu.matmul %8, %10, %cst_11 {dimension_numbers = #tpu.dot_dimension_numbers<[1], [0], [0], [1], [0, 0, 1, 1], [], []>} : vector<128x128xbf16>, vector<128x128xbf16>, vector<128x128xf32> -> vector<128x128xf32>
    %12 = arith.addf %6, %11 : vector<128x128xf32>
    %c2 = arith.constant 2 : index
    %c0_12 = arith.constant 0 : index
    %c0_13 = arith.constant 0 : index
    %13 = vector.load %arg1[%c2, %c0_12, %c0_13] : memref<16x128x128xbf16, #tpu.memory_space<vmem>>, vector<1x128x128xbf16>
    %14 = vector.shape_cast %13 : vector<1x128x128xbf16> to vector<128x128xbf16>
    %c2_14 = arith.constant 2 : index
    %c0_15 = arith.constant 0 : index
    %c0_16 = arith.constant 0 : index
    %15 = vector.load %arg2[%c2_14, %c0_15, %c0_16] : memref<16x128x128xbf16, #tpu.memory_space<vmem>>, vector<1x128x128xbf16>
    %16 = vector.shape_cast %15 : vector<1x128x128xbf16> to vector<128x128xbf16>
    %cst_17 = arith.constant dense<0.000000e+00> : vector<128x128xf32>
    %17 = tpu.matmul %14, %16, %cst_17 {dimension_numbers = #tpu.dot_dimension_numbers<[1], [0], [0], [1], [0, 0, 1, 1], [], []>} : vector<128x128xbf16>, vector<128x128xbf16>, vector<128x128xf32> -> vector<128x128xf32>
    %18 = arith.addf %12, %17 : vector<128x128xf32>
    %c3 = arith.constant 3 : index
    %c0_18 = arith.constant 0 : index
    %c0_19 = arith.constant 0 : index
    %19 = vector.load %arg1[%c3, %c0_18, %c0_19] : memref<16x128x128xbf16, #tpu.memory_space<vmem>>, vector<1x128x128xbf16>
    %20 = vector.shape_cast %19 : vector<1x128x128xbf16> to vector<128x128xbf16>
    %c3_20 = arith.constant 3 : index
    %c0_21 = arith.constant 0 : index
    %c0_22 = arith.constant 0 : index
    %21 = vector.load %arg2[%c3_20, %c0_21, %c0_22] : memref<16x128x128xbf16, #tpu.memory_space<vmem>>, vector<1x128x128xbf16>
    %22 = vector.shape_cast %21 : vector<1x128x128xbf16> to vector<128x128xbf16>
    %cst_23 = arith.constant dense<0.000000e+00> : vector<128x128xf32>
    %23 = tpu.matmul %20, %22, %cst_23 {dimension_numbers = #tpu.dot_dimension_numbers<[1], [0], [0], [1], [0, 0, 1, 1], [], []>} : vector<128x128xbf16>, vector<128x128xbf16>, vector<128x128xf32> -> vector<128x128xf32>
    %24 = arith.addf %18, %23 : vector<128x128xf32>
    %c4 = arith.constant 4 : index
    %c0_24 = arith.constant 0 : index
    %c0_25 = arith.constant 0 : index
    %25 = vector.load %arg1[%c4, %c0_24, %c0_25] : memref<16x128x128xbf16, #tpu.memory_space<vmem>>, vector<1x128x128xbf16>
    %26 = vector.shape_cast %25 : vector<1x128x128xbf16> to vector<128x128xbf16>
    %c4_26 = arith.constant 4 : index
    %c0_27 = arith.constant 0 : index
    %c0_28 = arith.constant 0 : index
    %27 = vector.load %arg2[%c4_26, %c0_27, %c0_28] : memref<16x128x128xbf16, #tpu.memory_space<vmem>>, vector<1x128x128xbf16>
    %28 = vector.shape_cast %27 : vector<1x128x128xbf16> to vector<128x128xbf16>
    %cst_29 = arith.constant dense<0.000000e+00> : vector<128x128xf32>
    %29 = tpu.matmul %26, %28, %cst_29 {dimension_numbers = #tpu.dot_dimension_numbers<[1], [0], [0], [1], [0, 0, 1, 1], [], []>} : vector<128x128xbf16>, vector<128x128xbf16>, vector<128x128xf32> -> vector<128x128xf32>
    %30 = arith.addf %24, %29 : vector<128x128xf32>
    %c5 = arith.constant 5 : index
    %c0_30 = arith.constant 0 : index
    %c0_31 = arith.constant 0 : index
    %31 = vector.load %arg1[%c5, %c0_30, %c0_31] : memref<16x128x128xbf16, #tpu.memory_space<vmem>>, vector<1x128x128xbf16>
    %32 = vector.shape_cast %31 : vector<1x128x128xbf16> to vector<128x128xbf16>
    %c5_32 = arith.constant 5 : index
    %c0_33 = arith.constant 0 : index
    %c0_34 = arith.constant 0 : index
    %33 = vector.load %arg2[%c5_32, %c0_33, %c0_34] : memref<16x128x128xbf16, #tpu.memory_space<vmem>>, vector<1x128x128xbf16>
    %34 = vector.shape_cast %33 : vector<1x128x128xbf16> to vector<128x128xbf16>
    %cst_35 = arith.constant dense<0.000000e+00> : vector<128x128xf32>
    %35 = tpu.matmul %32, %34, %cst_35 {dimension_numbers = #tpu.dot_dimension_numbers<[1], [0], [0], [1], [0, 0, 1, 1], [], []>} : vector<128x128xbf16>, vector<128x128xbf16>, vector<128x128xf32> -> vector<128x128xf32>
    %36 = arith.addf %30, %35 : vector<128x128xf32>
    %c6 = arith.constant 6 : index
    %c0_36 = arith.constant 0 : index
    %c0_37 = arith.constant 0 : index
    %37 = vector.load %arg1[%c6, %c0_36, %c0_37] : memref<16x128x128xbf16, #tpu.memory_space<vmem>>, vector<1x128x128xbf16>
    %38 = vector.shape_cast %37 : vector<1x128x128xbf16> to vector<128x128xbf16>
    %c6_38 = arith.constant 6 : index
    %c0_39 = arith.constant 0 : index
    %c0_40 = arith.constant 0 : index
    %39 = vector.load %arg2[%c6_38, %c0_39, %c0_40] : memref<16x128x128xbf16, #tpu.memory_space<vmem>>, vector<1x128x128xbf16>
    %40 = vector.shape_cast %39 : vector<1x128x128xbf16> to vector<128x128xbf16>
    %cst_41 = arith.constant dense<0.000000e+00> : vector<128x128xf32>
    %41 = tpu.matmul %38, %40, %cst_41 {dimension_numbers = #tpu.dot_dimension_numbers<[1], [0], [0], [1], [0, 0, 1, 1], [], []>} : vector<128x128xbf16>, vector<128x128xbf16>, vector<128x128xf32> -> vector<128x128xf32>
    %42 = arith.addf %36, %41 : vector<128x128xf32>
    %c7 = arith.constant 7 : index
    %c0_42 = arith.constant 0 : index
    %c0_43 = arith.constant 0 : index
    %43 = vector.load %arg1[%c7, %c0_42, %c0_43] : memref<16x128x128xbf16, #tpu.memory_space<vmem>>, vector<1x128x128xbf16>
    %44 = vector.shape_cast %43 : vector<1x128x128xbf16> to vector<128x128xbf16>
    %c7_44 = arith.constant 7 : index
    %c0_45 = arith.constant 0 : index
    %c0_46 = arith.constant 0 : index
    %45 = vector.load %arg2[%c7_44, %c0_45, %c0_46] : memref<16x128x128xbf16, #tpu.memory_space<vmem>>, vector<1x128x128xbf16>
    %46 = vector.shape_cast %45 : vector<1x128x128xbf16> to vector<128x128xbf16>
    %cst_47 = arith.constant dense<0.000000e+00> : vector<128x128xf32>
    %47 = tpu.matmul %44, %46, %cst_47 {dimension_numbers = #tpu.dot_dimension_numbers<[1], [0], [0], [1], [0, 0, 1, 1], [], []>} : vector<128x128xbf16>, vector<128x128xbf16>, vector<128x128xf32> -> vector<128x128xf32>
    %48 = arith.addf %42, %47 : vector<128x128xf32>
    %c8 = arith.constant 8 : index
    %c0_48 = arith.constant 0 : index
    %c0_49 = arith.constant 0 : index
    %49 = vector.load %arg1[%c8, %c0_48, %c0_49] : memref<16x128x128xbf16, #tpu.memory_space<vmem>>, vector<1x128x128xbf16>
    %50 = vector.shape_cast %49 : vector<1x128x128xbf16> to vector<128x128xbf16>
    %c8_50 = arith.constant 8 : index
    %c0_51 = arith.constant 0 : index
    %c0_52 = arith.constant 0 : index
    %51 = vector.load %arg2[%c8_50, %c0_51, %c0_52] : memref<16x128x128xbf16, #tpu.memory_space<vmem>>, vector<1x128x128xbf16>
    %52 = vector.shape_cast %51 : vector<1x128x128xbf16> to vector<128x128xbf16>
    %cst_53 = arith.constant dense<0.000000e+00> : vector<128x128xf32>
    %53 = tpu.matmul %50, %52, %cst_53 {dimension_numbers = #tpu.dot_dimension_numbers<[1], [0], [0], [1], [0, 0, 1, 1], [], []>} : vector<128x128xbf16>, vector<128x128xbf16>, vector<128x128xf32> -> vector<128x128xf32>
    %54 = arith.addf %48, %53 : vector<128x128xf32>
    %c9 = arith.constant 9 : index
    %c0_54 = arith.constant 0 : index
    %c0_55 = arith.constant 0 : index
    %55 = vector.load %arg1[%c9, %c0_54, %c0_55] : memref<16x128x128xbf16, #tpu.memory_space<vmem>>, vector<1x128x128xbf16>
    %56 = vector.shape_cast %55 : vector<1x128x128xbf16> to vector<128x128xbf16>
    %c9_56 = arith.constant 9 : index
    %c0_57 = arith.constant 0 : index
    %c0_58 = arith.constant 0 : index
    %57 = vector.load %arg2[%c9_56, %c0_57, %c0_58] : memref<16x128x128xbf16, #tpu.memory_space<vmem>>, vector<1x128x128xbf16>
    %58 = vector.shape_cast %57 : vector<1x128x128xbf16> to vector<128x128xbf16>
    %cst_59 = arith.constant dense<0.000000e+00> : vector<128x128xf32>
    %59 = tpu.matmul %56, %58, %cst_59 {dimension_numbers = #tpu.dot_dimension_numbers<[1], [0], [0], [1], [0, 0, 1, 1], [], []>} : vector<128x128xbf16>, vector<128x128xbf16>, vector<128x128xf32> -> vector<128x128xf32>
    %60 = arith.addf %54, %59 : vector<128x128xf32>
    %c10 = arith.constant 10 : index
    %c0_60 = arith.constant 0 : index
    %c0_61 = arith.constant 0 : index
    %61 = vector.load %arg1[%c10, %c0_60, %c0_61] : memref<16x128x128xbf16, #tpu.memory_space<vmem>>, vector<1x128x128xbf16>
    %62 = vector.shape_cast %61 : vector<1x128x128xbf16> to vector<128x128xbf16>
    %c10_62 = arith.constant 10 : index
    %c0_63 = arith.constant 0 : index
    %c0_64 = arith.constant 0 : index
    %63 = vector.load %arg2[%c10_62, %c0_63, %c0_64] : memref<16x128x128xbf16, #tpu.memory_space<vmem>>, vector<1x128x128xbf16>
    %64 = vector.shape_cast %63 : vector<1x128x128xbf16> to vector<128x128xbf16>
    %cst_65 = arith.constant dense<0.000000e+00> : vector<128x128xf32>
    %65 = tpu.matmul %62, %64, %cst_65 {dimension_numbers = #tpu.dot_dimension_numbers<[1], [0], [0], [1], [0, 0, 1, 1], [], []>} : vector<128x128xbf16>, vector<128x128xbf16>, vector<128x128xf32> -> vector<128x128xf32>
    %66 = arith.addf %60, %65 : vector<128x128xf32>
    %c11 = arith.constant 11 : index
    %c0_66 = arith.constant 0 : index
    %c0_67 = arith.constant 0 : index
    %67 = vector.load %arg1[%c11, %c0_66, %c0_67] : memref<16x128x128xbf16, #tpu.memory_space<vmem>>, vector<1x128x128xbf16>
    %68 = vector.shape_cast %67 : vector<1x128x128xbf16> to vector<128x128xbf16>
    %c11_68 = arith.constant 11 : index
    %c0_69 = arith.constant 0 : index
    %c0_70 = arith.constant 0 : index
    %69 = vector.load %arg2[%c11_68, %c0_69, %c0_70] : memref<16x128x128xbf16, #tpu.memory_space<vmem>>, vector<1x128x128xbf16>
    %70 = vector.shape_cast %69 : vector<1x128x128xbf16> to vector<128x128xbf16>
    %cst_71 = arith.constant dense<0.000000e+00> : vector<128x128xf32>
    %71 = tpu.matmul %68, %70, %cst_71 {dimension_numbers = #tpu.dot_dimension_numbers<[1], [0], [0], [1], [0, 0, 1, 1], [], []>} : vector<128x128xbf16>, vector<128x128xbf16>, vector<128x128xf32> -> vector<128x128xf32>
    %72 = arith.addf %66, %71 : vector<128x128xf32>
    %c12 = arith.constant 12 : index
    %c0_72 = arith.constant 0 : index
    %c0_73 = arith.constant 0 : index
    %73 = vector.load %arg1[%c12, %c0_72, %c0_73] : memref<16x128x128xbf16, #tpu.memory_space<vmem>>, vector<1x128x128xbf16>
    %74 = vector.shape_cast %73 : vector<1x128x128xbf16> to vector<128x128xbf16>
    %c12_74 = arith.constant 12 : index
    %c0_75 = arith.constant 0 : index
    %c0_76 = arith.constant 0 : index
    %75 = vector.load %arg2[%c12_74, %c0_75, %c0_76] : memref<16x128x128xbf16, #tpu.memory_space<vmem>>, vector<1x128x128xbf16>
    %76 = vector.shape_cast %75 : vector<1x128x128xbf16> to vector<128x128xbf16>
    %cst_77 = arith.constant dense<0.000000e+00> : vector<128x128xf32>
    %77 = tpu.matmul %74, %76, %cst_77 {dimension_numbers = #tpu.dot_dimension_numbers<[1], [0], [0], [1], [0, 0, 1, 1], [], []>} : vector<128x128xbf16>, vector<128x128xbf16>, vector<128x128xf32> -> vector<128x128xf32>
    %78 = arith.addf %72, %77 : vector<128x128xf32>
    %c13 = arith.constant 13 : index
    %c0_78 = arith.constant 0 : index
    %c0_79 = arith.constant 0 : index
    %79 = vector.load %arg1[%c13, %c0_78, %c0_79] : memref<16x128x128xbf16, #tpu.memory_space<vmem>>, vector<1x128x128xbf16>
    %80 = vector.shape_cast %79 : vector<1x128x128xbf16> to vector<128x128xbf16>
    %c13_80 = arith.constant 13 : index
    %c0_81 = arith.constant 0 : index
    %c0_82 = arith.constant 0 : index
    %81 = vector.load %arg2[%c13_80, %c0_81, %c0_82] : memref<16x128x128xbf16, #tpu.memory_space<vmem>>, vector<1x128x128xbf16>
    %82 = vector.shape_cast %81 : vector<1x128x128xbf16> to vector<128x128xbf16>
    %cst_83 = arith.constant dense<0.000000e+00> : vector<128x128xf32>
    %83 = tpu.matmul %80, %82, %cst_83 {dimension_numbers = #tpu.dot_dimension_numbers<[1], [0], [0], [1], [0, 0, 1, 1], [], []>} : vector<128x128xbf16>, vector<128x128xbf16>, vector<128x128xf32> -> vector<128x128xf32>
    %84 = arith.addf %78, %83 : vector<128x128xf32>
    %c14 = arith.constant 14 : index
    %c0_84 = arith.constant 0 : index
    %c0_85 = arith.constant 0 : index
    %85 = vector.load %arg1[%c14, %c0_84, %c0_85] : memref<16x128x128xbf16, #tpu.memory_space<vmem>>, vector<1x128x128xbf16>
    %86 = vector.shape_cast %85 : vector<1x128x128xbf16> to vector<128x128xbf16>
    %c14_86 = arith.constant 14 : index
    %c0_87 = arith.constant 0 : index
    %c0_88 = arith.constant 0 : index
    %87 = vector.load %arg2[%c14_86, %c0_87, %c0_88] : memref<16x128x128xbf16, #tpu.memory_space<vmem>>, vector<1x128x128xbf16>
    %88 = vector.shape_cast %87 : vector<1x128x128xbf16> to vector<128x128xbf16>
    %cst_89 = arith.constant dense<0.000000e+00> : vector<128x128xf32>
    %89 = tpu.matmul %86, %88, %cst_89 {dimension_numbers = #tpu.dot_dimension_numbers<[1], [0], [0], [1], [0, 0, 1, 1], [], []>} : vector<128x128xbf16>, vector<128x128xbf16>, vector<128x128xf32> -> vector<128x128xf32>
    %90 = arith.addf %84, %89 : vector<128x128xf32>
    %c15 = arith.constant 15 : index
    %c0_90 = arith.constant 0 : index
    %c0_91 = arith.constant 0 : index
    %91 = vector.load %arg1[%c15, %c0_90, %c0_91] : memref<16x128x128xbf16, #tpu.memory_space<vmem>>, vector<1x128x128xbf16>
    %92 = vector.shape_cast %91 : vector<1x128x128xbf16> to vector<128x128xbf16>
    %c15_92 = arith.constant 15 : index
    %c0_93 = arith.constant 0 : index
    %c0_94 = arith.constant 0 : index
    %93 = vector.load %arg2[%c15_92, %c0_93, %c0_94] : memref<16x128x128xbf16, #tpu.memory_space<vmem>>, vector<1x128x128xbf16>
    %94 = vector.shape_cast %93 : vector<1x128x128xbf16> to vector<128x128xbf16>
    %cst_95 = arith.constant dense<0.000000e+00> : vector<128x128xf32>
    %95 = tpu.matmul %92, %94, %cst_95 {dimension_numbers = #tpu.dot_dimension_numbers<[1], [0], [0], [1], [0, 0, 1, 1], [], []>} : vector<128x128xbf16>, vector<128x128xbf16>, vector<128x128xf32> -> vector<128x128xf32>
    %96 = arith.addf %90, %95 : vector<128x128xf32>
    %c0_96 = arith.constant 0 : index
    %c0_97 = arith.constant 0 : index
    %97 = vector.load %arg3[%c0_96, %c0_97] : memref<1x128xf32, #tpu.memory_space<vmem>>, vector<1x128xf32>
    %98 = vector.broadcast %97 : vector<1x128xf32> to vector<128x128xf32>
    %99 = arith.addf %96, %98 : vector<128x128xf32>
    %100 = vector.shape_cast %99 : vector<128x128xf32> to vector<2x64x128xf32>
    %cst_98 = arith.constant dense<0.000000e+00> : vector<2x128xf32>
    %101 = vector.multi_reduction <add>, %100, %cst_98 [1] : vector<2x64x128xf32> to vector<2x128xf32>
    %102 = vector.shape_cast %101 : vector<2x128xf32> to vector<2x1x128xf32>
    %cst_99 = arith.constant 1.562500e-02 : f32
    %103 = vector.broadcast %cst_99 : f32 to vector<2x1x128xf32>
    %104 = arith.mulf %102, %103 : vector<2x1x128xf32>
    %105 = arith.mulf %100, %100 : vector<2x64x128xf32>
    %cst_100 = arith.constant dense<0.000000e+00> : vector<2x128xf32>
    %106 = vector.multi_reduction <add>, %105, %cst_100 [1] : vector<2x64x128xf32> to vector<2x128xf32>
    %107 = vector.shape_cast %106 : vector<2x128xf32> to vector<2x1x128xf32>
    %cst_101 = arith.constant 1.562500e-02 : f32
    %108 = vector.broadcast %cst_101 : f32 to vector<2x1x128xf32>
    %109 = arith.mulf %107, %108 : vector<2x1x128xf32>
    %110 = arith.mulf %104, %104 : vector<2x1x128xf32>
    %111 = arith.subf %109, %110 : vector<2x1x128xf32>
    %112 = vector.broadcast %104 : vector<2x1x128xf32> to vector<2x64x128xf32>
    %113 = arith.subf %100, %112 : vector<2x64x128xf32>
    %cst_102 = arith.constant 9.99999974E-6 : f32
    %114 = vector.broadcast %cst_102 : f32 to vector<2x1x128xf32>
    %115 = arith.addf %111, %114 : vector<2x1x128xf32>
    %116 = math.rsqrt %115 : vector<2x1x128xf32>
    %117 = vector.broadcast %116 : vector<2x1x128xf32> to vector<2x64x128xf32>
    %118 = arith.mulf %113, %117 : vector<2x64x128xf32>
    %cst_103 = arith.constant 0.000000e+00 : f32
    %119 = vector.broadcast %cst_103 : f32 to vector<2x64x128xf32>
    %120 = arith.maximumf %118, %119 : vector<2x64x128xf32>
    %121 = arith.truncf %120 : vector<2x64x128xf32> to vector<2x64x128xbf16>
    %c0_104 = arith.constant 0 : index
    %c0_105 = arith.constant 0 : index
    %c0_106 = arith.constant 0 : index
    %122 = vector.load %arg4[%c0_104, %c0_105, %c0_106] : memref<2x64x128xbf16, #tpu.memory_space<vmem>>, vector<2x64x128xbf16>
    tpu.vector_store %arg4[%c0_104, %c0_105, %c0_106], %121 {strides = array<i32>} : memref<2x64x128xbf16, #tpu.memory_space<vmem>>, vector<2x64x128xbf16>,
    return
  }
  func.func @transform_0(%arg0: i32) -> (i32, i32, i32) {
    %c0_i32 = arith.constant 0 : i32
    %c0_i32_0 = arith.constant 0 : i32
    %c0_i32_1 = arith.constant 0 : i32
    %c0_i32_2 = arith.constant 0 : i32
    return %c0_i32, %c0_i32_0, %c0_i32_1 : i32, i32, i32
  }
  func.func @transform_1(%arg0: i32) -> (i32, i32, i32) {
    %c0_i32 = arith.constant 0 : i32
    %c0_i32_0 = arith.constant 0 : i32
    %c0_i32_1 = arith.constant 0 : i32
    %c0_i32_2 = arith.constant 0 : i32
    return %c0_i32, %c0_i32_0, %c0_i32_1 : i32, i32, i32
  }
  func.func @transform_2(%arg0: i32) -> (i32, i32) {
    %c0_i32 = arith.constant 0 : i32
    %c0_i32_0 = arith.constant 0 : i32
    %c0_i32_1 = arith.constant 0 : i32
    return %c0_i32, %c0_i32_0 : i32, i32
  }
  func.func @transform_3(%arg0: i32) -> (i32, i32, i32) {
    %c0_i32 = arith.constant 0 : i32
    %c0_i32_0 = arith.constant 0 : i32
    %c0_i32_1 = arith.constant 0 : i32
    %c0_i32_2 = arith.constant 0 : i32
    return %c0_i32, %c0_i32_0, %c0_i32_1 : i32, i32, i32
  }
}

module attributes {stable_mosaic.version = 11 : i64} {
  func.func @_cbr_small_kernel(%arg0: i32, %arg1: memref<16x32x128xbf16, #tpu.memory_space<vmem>>, %arg2: memref<16x128x128xbf16, #tpu.memory_space<vmem>>, %arg3: memref<1x128xf32, #tpu.memory_space<vmem>>, %arg4: memref<2x16x128xbf16, #tpu.memory_space<vmem>>) attributes {dimension_semantics = [#tpu.dimension_semantics<arbitrary>], iteration_bounds = array<i64: 1>, scalar_prefetch = 0 : i64, scratch_operands = 0 : i64, tpu.core_type = #tpu.core_type<tc>, window_params = [{pipeline_mode = #tpu.pipeline_mode<synchronous>, transform_indices = @transform_0, window_bounds = array<i64: 16, 32, 128>}, {pipeline_mode = #tpu.pipeline_mode<synchronous>, transform_indices = @transform_1, window_bounds = array<i64: 16, 128, 128>}, {pipeline_mode = #tpu.pipeline_mode<synchronous>, transform_indices = @transform_2, window_bounds = array<i64: 1, 128>}, {pipeline_mode = #tpu.pipeline_mode<synchronous>, transform_indices = @transform_3, window_bounds = array<i64: 2, 16, 128>}]} {
    %cst = arith.constant 0.000000e+00 : f32
    %0 = vector.broadcast %cst : f32 to vector<32x128xf32>
    %c0 = arith.constant 0 : index
    %c0_0 = arith.constant 0 : index
    %c0_1 = arith.constant 0 : index
    %1 = vector.load %arg1[%c0, %c0_0, %c0_1] : memref<16x32x128xbf16, #tpu.memory_space<vmem>>, vector<1x32x128xbf16>
    %2 = vector.shape_cast %1 : vector<1x32x128xbf16> to vector<32x128xbf16>
    %c0_2 = arith.constant 0 : index
    %c0_3 = arith.constant 0 : index
    %c0_4 = arith.constant 0 : index
    %3 = vector.load %arg2[%c0_2, %c0_3, %c0_4] : memref<16x128x128xbf16, #tpu.memory_space<vmem>>, vector<1x128x128xbf16>
    %4 = vector.shape_cast %3 : vector<1x128x128xbf16> to vector<128x128xbf16>
    %cst_5 = arith.constant dense<0.000000e+00> : vector<32x128xf32>
    %5 = tpu.matmul %2, %4, %cst_5 {dimension_numbers = #tpu.dot_dimension_numbers<[1], [0], [0], [1], [0, 0, 1, 1], [], []>} : vector<32x128xbf16>, vector<128x128xbf16>, vector<32x128xf32> -> vector<32x128xf32>
    %6 = arith.addf %0, %5 : vector<32x128xf32>
    %c1 = arith.constant 1 : index
    %c0_6 = arith.constant 0 : index
    %c0_7 = arith.constant 0 : index
    %7 = vector.load %arg1[%c1, %c0_6, %c0_7] : memref<16x32x128xbf16, #tpu.memory_space<vmem>>, vector<1x32x128xbf16>
    %8 = vector.shape_cast %7 : vector<1x32x128xbf16> to vector<32x128xbf16>
    %c1_8 = arith.constant 1 : index
    %c0_9 = arith.constant 0 : index
    %c0_10 = arith.constant 0 : index
    %9 = vector.load %arg2[%c1_8, %c0_9, %c0_10] : memref<16x128x128xbf16, #tpu.memory_space<vmem>>, vector<1x128x128xbf16>
    %10 = vector.shape_cast %9 : vector<1x128x128xbf16> to vector<128x128xbf16>
    %cst_11 = arith.constant dense<0.000000e+00> : vector<32x128xf32>
    %11 = tpu.matmul %8, %10, %cst_11 {dimension_numbers = #tpu.dot_dimension_numbers<[1], [0], [0], [1], [0, 0, 1, 1], [], []>} : vector<32x128xbf16>, vector<128x128xbf16>, vector<32x128xf32> -> vector<32x128xf32>
    %12 = arith.addf %6, %11 : vector<32x128xf32>
    %c2 = arith.constant 2 : index
    %c0_12 = arith.constant 0 : index
    %c0_13 = arith.constant 0 : index
    %13 = vector.load %arg1[%c2, %c0_12, %c0_13] : memref<16x32x128xbf16, #tpu.memory_space<vmem>>, vector<1x32x128xbf16>
    %14 = vector.shape_cast %13 : vector<1x32x128xbf16> to vector<32x128xbf16>
    %c2_14 = arith.constant 2 : index
    %c0_15 = arith.constant 0 : index
    %c0_16 = arith.constant 0 : index
    %15 = vector.load %arg2[%c2_14, %c0_15, %c0_16] : memref<16x128x128xbf16, #tpu.memory_space<vmem>>, vector<1x128x128xbf16>
    %16 = vector.shape_cast %15 : vector<1x128x128xbf16> to vector<128x128xbf16>
    %cst_17 = arith.constant dense<0.000000e+00> : vector<32x128xf32>
    %17 = tpu.matmul %14, %16, %cst_17 {dimension_numbers = #tpu.dot_dimension_numbers<[1], [0], [0], [1], [0, 0, 1, 1], [], []>} : vector<32x128xbf16>, vector<128x128xbf16>, vector<32x128xf32> -> vector<32x128xf32>
    %18 = arith.addf %12, %17 : vector<32x128xf32>
    %c3 = arith.constant 3 : index
    %c0_18 = arith.constant 0 : index
    %c0_19 = arith.constant 0 : index
    %19 = vector.load %arg1[%c3, %c0_18, %c0_19] : memref<16x32x128xbf16, #tpu.memory_space<vmem>>, vector<1x32x128xbf16>
    %20 = vector.shape_cast %19 : vector<1x32x128xbf16> to vector<32x128xbf16>
    %c3_20 = arith.constant 3 : index
    %c0_21 = arith.constant 0 : index
    %c0_22 = arith.constant 0 : index
    %21 = vector.load %arg2[%c3_20, %c0_21, %c0_22] : memref<16x128x128xbf16, #tpu.memory_space<vmem>>, vector<1x128x128xbf16>
    %22 = vector.shape_cast %21 : vector<1x128x128xbf16> to vector<128x128xbf16>
    %cst_23 = arith.constant dense<0.000000e+00> : vector<32x128xf32>
    %23 = tpu.matmul %20, %22, %cst_23 {dimension_numbers = #tpu.dot_dimension_numbers<[1], [0], [0], [1], [0, 0, 1, 1], [], []>} : vector<32x128xbf16>, vector<128x128xbf16>, vector<32x128xf32> -> vector<32x128xf32>
    %24 = arith.addf %18, %23 : vector<32x128xf32>
    %c4 = arith.constant 4 : index
    %c0_24 = arith.constant 0 : index
    %c0_25 = arith.constant 0 : index
    %25 = vector.load %arg1[%c4, %c0_24, %c0_25] : memref<16x32x128xbf16, #tpu.memory_space<vmem>>, vector<1x32x128xbf16>
    %26 = vector.shape_cast %25 : vector<1x32x128xbf16> to vector<32x128xbf16>
    %c4_26 = arith.constant 4 : index
    %c0_27 = arith.constant 0 : index
    %c0_28 = arith.constant 0 : index
    %27 = vector.load %arg2[%c4_26, %c0_27, %c0_28] : memref<16x128x128xbf16, #tpu.memory_space<vmem>>, vector<1x128x128xbf16>
    %28 = vector.shape_cast %27 : vector<1x128x128xbf16> to vector<128x128xbf16>
    %cst_29 = arith.constant dense<0.000000e+00> : vector<32x128xf32>
    %29 = tpu.matmul %26, %28, %cst_29 {dimension_numbers = #tpu.dot_dimension_numbers<[1], [0], [0], [1], [0, 0, 1, 1], [], []>} : vector<32x128xbf16>, vector<128x128xbf16>, vector<32x128xf32> -> vector<32x128xf32>
    %30 = arith.addf %24, %29 : vector<32x128xf32>
    %c5 = arith.constant 5 : index
    %c0_30 = arith.constant 0 : index
    %c0_31 = arith.constant 0 : index
    %31 = vector.load %arg1[%c5, %c0_30, %c0_31] : memref<16x32x128xbf16, #tpu.memory_space<vmem>>, vector<1x32x128xbf16>
    %32 = vector.shape_cast %31 : vector<1x32x128xbf16> to vector<32x128xbf16>
    %c5_32 = arith.constant 5 : index
    %c0_33 = arith.constant 0 : index
    %c0_34 = arith.constant 0 : index
    %33 = vector.load %arg2[%c5_32, %c0_33, %c0_34] : memref<16x128x128xbf16, #tpu.memory_space<vmem>>, vector<1x128x128xbf16>
    %34 = vector.shape_cast %33 : vector<1x128x128xbf16> to vector<128x128xbf16>
    %cst_35 = arith.constant dense<0.000000e+00> : vector<32x128xf32>
    %35 = tpu.matmul %32, %34, %cst_35 {dimension_numbers = #tpu.dot_dimension_numbers<[1], [0], [0], [1], [0, 0, 1, 1], [], []>} : vector<32x128xbf16>, vector<128x128xbf16>, vector<32x128xf32> -> vector<32x128xf32>
    %36 = arith.addf %30, %35 : vector<32x128xf32>
    %c6 = arith.constant 6 : index
    %c0_36 = arith.constant 0 : index
    %c0_37 = arith.constant 0 : index
    %37 = vector.load %arg1[%c6, %c0_36, %c0_37] : memref<16x32x128xbf16, #tpu.memory_space<vmem>>, vector<1x32x128xbf16>
    %38 = vector.shape_cast %37 : vector<1x32x128xbf16> to vector<32x128xbf16>
    %c6_38 = arith.constant 6 : index
    %c0_39 = arith.constant 0 : index
    %c0_40 = arith.constant 0 : index
    %39 = vector.load %arg2[%c6_38, %c0_39, %c0_40] : memref<16x128x128xbf16, #tpu.memory_space<vmem>>, vector<1x128x128xbf16>
    %40 = vector.shape_cast %39 : vector<1x128x128xbf16> to vector<128x128xbf16>
    %cst_41 = arith.constant dense<0.000000e+00> : vector<32x128xf32>
    %41 = tpu.matmul %38, %40, %cst_41 {dimension_numbers = #tpu.dot_dimension_numbers<[1], [0], [0], [1], [0, 0, 1, 1], [], []>} : vector<32x128xbf16>, vector<128x128xbf16>, vector<32x128xf32> -> vector<32x128xf32>
    %42 = arith.addf %36, %41 : vector<32x128xf32>
    %c7 = arith.constant 7 : index
    %c0_42 = arith.constant 0 : index
    %c0_43 = arith.constant 0 : index
    %43 = vector.load %arg1[%c7, %c0_42, %c0_43] : memref<16x32x128xbf16, #tpu.memory_space<vmem>>, vector<1x32x128xbf16>
    %44 = vector.shape_cast %43 : vector<1x32x128xbf16> to vector<32x128xbf16>
    %c7_44 = arith.constant 7 : index
    %c0_45 = arith.constant 0 : index
    %c0_46 = arith.constant 0 : index
    %45 = vector.load %arg2[%c7_44, %c0_45, %c0_46] : memref<16x128x128xbf16, #tpu.memory_space<vmem>>, vector<1x128x128xbf16>
    %46 = vector.shape_cast %45 : vector<1x128x128xbf16> to vector<128x128xbf16>
    %cst_47 = arith.constant dense<0.000000e+00> : vector<32x128xf32>
    %47 = tpu.matmul %44, %46, %cst_47 {dimension_numbers = #tpu.dot_dimension_numbers<[1], [0], [0], [1], [0, 0, 1, 1], [], []>} : vector<32x128xbf16>, vector<128x128xbf16>, vector<32x128xf32> -> vector<32x128xf32>
    %48 = arith.addf %42, %47 : vector<32x128xf32>
    %c8 = arith.constant 8 : index
    %c0_48 = arith.constant 0 : index
    %c0_49 = arith.constant 0 : index
    %49 = vector.load %arg1[%c8, %c0_48, %c0_49] : memref<16x32x128xbf16, #tpu.memory_space<vmem>>, vector<1x32x128xbf16>
    %50 = vector.shape_cast %49 : vector<1x32x128xbf16> to vector<32x128xbf16>
    %c8_50 = arith.constant 8 : index
    %c0_51 = arith.constant 0 : index
    %c0_52 = arith.constant 0 : index
    %51 = vector.load %arg2[%c8_50, %c0_51, %c0_52] : memref<16x128x128xbf16, #tpu.memory_space<vmem>>, vector<1x128x128xbf16>
    %52 = vector.shape_cast %51 : vector<1x128x128xbf16> to vector<128x128xbf16>
    %cst_53 = arith.constant dense<0.000000e+00> : vector<32x128xf32>
    %53 = tpu.matmul %50, %52, %cst_53 {dimension_numbers = #tpu.dot_dimension_numbers<[1], [0], [0], [1], [0, 0, 1, 1], [], []>} : vector<32x128xbf16>, vector<128x128xbf16>, vector<32x128xf32> -> vector<32x128xf32>
    %54 = arith.addf %48, %53 : vector<32x128xf32>
    %c9 = arith.constant 9 : index
    %c0_54 = arith.constant 0 : index
    %c0_55 = arith.constant 0 : index
    %55 = vector.load %arg1[%c9, %c0_54, %c0_55] : memref<16x32x128xbf16, #tpu.memory_space<vmem>>, vector<1x32x128xbf16>
    %56 = vector.shape_cast %55 : vector<1x32x128xbf16> to vector<32x128xbf16>
    %c9_56 = arith.constant 9 : index
    %c0_57 = arith.constant 0 : index
    %c0_58 = arith.constant 0 : index
    %57 = vector.load %arg2[%c9_56, %c0_57, %c0_58] : memref<16x128x128xbf16, #tpu.memory_space<vmem>>, vector<1x128x128xbf16>
    %58 = vector.shape_cast %57 : vector<1x128x128xbf16> to vector<128x128xbf16>
    %cst_59 = arith.constant dense<0.000000e+00> : vector<32x128xf32>
    %59 = tpu.matmul %56, %58, %cst_59 {dimension_numbers = #tpu.dot_dimension_numbers<[1], [0], [0], [1], [0, 0, 1, 1], [], []>} : vector<32x128xbf16>, vector<128x128xbf16>, vector<32x128xf32> -> vector<32x128xf32>
    %60 = arith.addf %54, %59 : vector<32x128xf32>
    %c10 = arith.constant 10 : index
    %c0_60 = arith.constant 0 : index
    %c0_61 = arith.constant 0 : index
    %61 = vector.load %arg1[%c10, %c0_60, %c0_61] : memref<16x32x128xbf16, #tpu.memory_space<vmem>>, vector<1x32x128xbf16>
    %62 = vector.shape_cast %61 : vector<1x32x128xbf16> to vector<32x128xbf16>
    %c10_62 = arith.constant 10 : index
    %c0_63 = arith.constant 0 : index
    %c0_64 = arith.constant 0 : index
    %63 = vector.load %arg2[%c10_62, %c0_63, %c0_64] : memref<16x128x128xbf16, #tpu.memory_space<vmem>>, vector<1x128x128xbf16>
    %64 = vector.shape_cast %63 : vector<1x128x128xbf16> to vector<128x128xbf16>
    %cst_65 = arith.constant dense<0.000000e+00> : vector<32x128xf32>
    %65 = tpu.matmul %62, %64, %cst_65 {dimension_numbers = #tpu.dot_dimension_numbers<[1], [0], [0], [1], [0, 0, 1, 1], [], []>} : vector<32x128xbf16>, vector<128x128xbf16>, vector<32x128xf32> -> vector<32x128xf32>
    %66 = arith.addf %60, %65 : vector<32x128xf32>
    %c11 = arith.constant 11 : index
    %c0_66 = arith.constant 0 : index
    %c0_67 = arith.constant 0 : index
    %67 = vector.load %arg1[%c11, %c0_66, %c0_67] : memref<16x32x128xbf16, #tpu.memory_space<vmem>>, vector<1x32x128xbf16>
    %68 = vector.shape_cast %67 : vector<1x32x128xbf16> to vector<32x128xbf16>
    %c11_68 = arith.constant 11 : index
    %c0_69 = arith.constant 0 : index
    %c0_70 = arith.constant 0 : index
    %69 = vector.load %arg2[%c11_68, %c0_69, %c0_70] : memref<16x128x128xbf16, #tpu.memory_space<vmem>>, vector<1x128x128xbf16>
    %70 = vector.shape_cast %69 : vector<1x128x128xbf16> to vector<128x128xbf16>
    %cst_71 = arith.constant dense<0.000000e+00> : vector<32x128xf32>
    %71 = tpu.matmul %68, %70, %cst_71 {dimension_numbers = #tpu.dot_dimension_numbers<[1], [0], [0], [1], [0, 0, 1, 1], [], []>} : vector<32x128xbf16>, vector<128x128xbf16>, vector<32x128xf32> -> vector<32x128xf32>
    %72 = arith.addf %66, %71 : vector<32x128xf32>
    %c12 = arith.constant 12 : index
    %c0_72 = arith.constant 0 : index
    %c0_73 = arith.constant 0 : index
    %73 = vector.load %arg1[%c12, %c0_72, %c0_73] : memref<16x32x128xbf16, #tpu.memory_space<vmem>>, vector<1x32x128xbf16>
    %74 = vector.shape_cast %73 : vector<1x32x128xbf16> to vector<32x128xbf16>
    %c12_74 = arith.constant 12 : index
    %c0_75 = arith.constant 0 : index
    %c0_76 = arith.constant 0 : index
    %75 = vector.load %arg2[%c12_74, %c0_75, %c0_76] : memref<16x128x128xbf16, #tpu.memory_space<vmem>>, vector<1x128x128xbf16>
    %76 = vector.shape_cast %75 : vector<1x128x128xbf16> to vector<128x128xbf16>
    %cst_77 = arith.constant dense<0.000000e+00> : vector<32x128xf32>
    %77 = tpu.matmul %74, %76, %cst_77 {dimension_numbers = #tpu.dot_dimension_numbers<[1], [0], [0], [1], [0, 0, 1, 1], [], []>} : vector<32x128xbf16>, vector<128x128xbf16>, vector<32x128xf32> -> vector<32x128xf32>
    %78 = arith.addf %72, %77 : vector<32x128xf32>
    %c13 = arith.constant 13 : index
    %c0_78 = arith.constant 0 : index
    %c0_79 = arith.constant 0 : index
    %79 = vector.load %arg1[%c13, %c0_78, %c0_79] : memref<16x32x128xbf16, #tpu.memory_space<vmem>>, vector<1x32x128xbf16>
    %80 = vector.shape_cast %79 : vector<1x32x128xbf16> to vector<32x128xbf16>
    %c13_80 = arith.constant 13 : index
    %c0_81 = arith.constant 0 : index
    %c0_82 = arith.constant 0 : index
    %81 = vector.load %arg2[%c13_80, %c0_81, %c0_82] : memref<16x128x128xbf16, #tpu.memory_space<vmem>>, vector<1x128x128xbf16>
    %82 = vector.shape_cast %81 : vector<1x128x128xbf16> to vector<128x128xbf16>
    %cst_83 = arith.constant dense<0.000000e+00> : vector<32x128xf32>
    %83 = tpu.matmul %80, %82, %cst_83 {dimension_numbers = #tpu.dot_dimension_numbers<[1], [0], [0], [1], [0, 0, 1, 1], [], []>} : vector<32x128xbf16>, vector<128x128xbf16>, vector<32x128xf32> -> vector<32x128xf32>
    %84 = arith.addf %78, %83 : vector<32x128xf32>
    %c14 = arith.constant 14 : index
    %c0_84 = arith.constant 0 : index
    %c0_85 = arith.constant 0 : index
    %85 = vector.load %arg1[%c14, %c0_84, %c0_85] : memref<16x32x128xbf16, #tpu.memory_space<vmem>>, vector<1x32x128xbf16>
    %86 = vector.shape_cast %85 : vector<1x32x128xbf16> to vector<32x128xbf16>
    %c14_86 = arith.constant 14 : index
    %c0_87 = arith.constant 0 : index
    %c0_88 = arith.constant 0 : index
    %87 = vector.load %arg2[%c14_86, %c0_87, %c0_88] : memref<16x128x128xbf16, #tpu.memory_space<vmem>>, vector<1x128x128xbf16>
    %88 = vector.shape_cast %87 : vector<1x128x128xbf16> to vector<128x128xbf16>
    %cst_89 = arith.constant dense<0.000000e+00> : vector<32x128xf32>
    %89 = tpu.matmul %86, %88, %cst_89 {dimension_numbers = #tpu.dot_dimension_numbers<[1], [0], [0], [1], [0, 0, 1, 1], [], []>} : vector<32x128xbf16>, vector<128x128xbf16>, vector<32x128xf32> -> vector<32x128xf32>
    %90 = arith.addf %84, %89 : vector<32x128xf32>
    %c15 = arith.constant 15 : index
    %c0_90 = arith.constant 0 : index
    %c0_91 = arith.constant 0 : index
    %91 = vector.load %arg1[%c15, %c0_90, %c0_91] : memref<16x32x128xbf16, #tpu.memory_space<vmem>>, vector<1x32x128xbf16>
    %92 = vector.shape_cast %91 : vector<1x32x128xbf16> to vector<32x128xbf16>
    %c15_92 = arith.constant 15 : index
    %c0_93 = arith.constant 0 : index
    %c0_94 = arith.constant 0 : index
    %93 = vector.load %arg2[%c15_92, %c0_93, %c0_94] : memref<16x128x128xbf16, #tpu.memory_space<vmem>>, vector<1x128x128xbf16>
    %94 = vector.shape_cast %93 : vector<1x128x128xbf16> to vector<128x128xbf16>
    %cst_95 = arith.constant dense<0.000000e+00> : vector<32x128xf32>
    %95 = tpu.matmul %92, %94, %cst_95 {dimension_numbers = #tpu.dot_dimension_numbers<[1], [0], [0], [1], [0, 0, 1, 1], [], []>} : vector<32x128xbf16>, vector<128x128xbf16>, vector<32x128xf32> -> vector<32x128xf32>
    %96 = arith.addf %90, %95 : vector<32x128xf32>
    %c0_96 = arith.constant 0 : index
    %c0_97 = arith.constant 0 : index
    %97 = vector.load %arg3[%c0_96, %c0_97] : memref<1x128xf32, #tpu.memory_space<vmem>>, vector<1x128xf32>
    %98 = vector.broadcast %97 : vector<1x128xf32> to vector<32x128xf32>
    %99 = arith.addf %96, %98 : vector<32x128xf32>
    %100 = vector.shape_cast %99 : vector<32x128xf32> to vector<2x16x128xf32>
    %cst_98 = arith.constant dense<0.000000e+00> : vector<2x128xf32>
    %101 = vector.multi_reduction <add>, %100, %cst_98 [1] : vector<2x16x128xf32> to vector<2x128xf32>
    %102 = vector.shape_cast %101 : vector<2x128xf32> to vector<2x1x128xf32>
    %cst_99 = arith.constant 6.250000e-02 : f32
    %103 = vector.broadcast %cst_99 : f32 to vector<2x1x128xf32>
    %104 = arith.mulf %102, %103 : vector<2x1x128xf32>
    %105 = arith.mulf %100, %100 : vector<2x16x128xf32>
    %cst_100 = arith.constant dense<0.000000e+00> : vector<2x128xf32>
    %106 = vector.multi_reduction <add>, %105, %cst_100 [1] : vector<2x16x128xf32> to vector<2x128xf32>
    %107 = vector.shape_cast %106 : vector<2x128xf32> to vector<2x1x128xf32>
    %cst_101 = arith.constant 6.250000e-02 : f32
    %108 = vector.broadcast %cst_101 : f32 to vector<2x1x128xf32>
    %109 = arith.mulf %107, %108 : vector<2x1x128xf32>
    %110 = arith.mulf %104, %104 : vector<2x1x128xf32>
    %111 = arith.subf %109, %110 : vector<2x1x128xf32>
    %112 = vector.broadcast %104 : vector<2x1x128xf32> to vector<2x16x128xf32>
    %113 = arith.subf %100, %112 : vector<2x16x128xf32>
    %cst_102 = arith.constant 9.99999974E-6 : f32
    %114 = vector.broadcast %cst_102 : f32 to vector<2x1x128xf32>
    %115 = arith.addf %111, %114 : vector<2x1x128xf32>
    %116 = math.rsqrt %115 : vector<2x1x128xf32>
    %117 = vector.broadcast %116 : vector<2x1x128xf32> to vector<2x16x128xf32>
    %118 = arith.mulf %113, %117 : vector<2x16x128xf32>
    %cst_103 = arith.constant 0.000000e+00 : f32
    %119 = vector.broadcast %cst_103 : f32 to vector<2x16x128xf32>
    %120 = arith.maximumf %118, %119 : vector<2x16x128xf32>
    %121 = arith.truncf %120 : vector<2x16x128xf32> to vector<2x16x128xbf16>
    %c0_104 = arith.constant 0 : index
    %c0_105 = arith.constant 0 : index
    %c0_106 = arith.constant 0 : index
    %122 = vector.load %arg4[%c0_104, %c0_105, %c0_106] : memref<2x16x128xbf16, #tpu.memory_space<vmem>>, vector<2x16x128xbf16>
    tpu.vector_store %arg4[%c0_104, %c0_105, %c0_106], %121 {strides = array<i32>} : memref<2x16x128xbf16, #tpu.memory_space<vmem>>, vector<2x16x128xbf16>,
    return
  }
  func.func @transform_0(%arg0: i32) -> (i32, i32, i32) {
    %c0_i32 = arith.constant 0 : i32
    %c0_i32_0 = arith.constant 0 : i32
    %c0_i32_1 = arith.constant 0 : i32
    %c0_i32_2 = arith.constant 0 : i32
    return %c0_i32, %c0_i32_0, %c0_i32_1 : i32, i32, i32
  }
  func.func @transform_1(%arg0: i32) -> (i32, i32, i32) {
    %c0_i32 = arith.constant 0 : i32
    %c0_i32_0 = arith.constant 0 : i32
    %c0_i32_1 = arith.constant 0 : i32
    %c0_i32_2 = arith.constant 0 : i32
    return %c0_i32, %c0_i32_0, %c0_i32_1 : i32, i32, i32
  }
  func.func @transform_2(%arg0: i32) -> (i32, i32) {
    %c0_i32 = arith.constant 0 : i32
    %c0_i32_0 = arith.constant 0 : i32
    %c0_i32_1 = arith.constant 0 : i32
    return %c0_i32, %c0_i32_0 : i32, i32
  }
  func.func @transform_3(%arg0: i32) -> (i32, i32, i32) {
    %c0_i32 = arith.constant 0 : i32
    %c0_i32_0 = arith.constant 0 : i32
    %c0_i32_1 = arith.constant 0 : i32
    %c0_i32_2 = arith.constant 0 : i32
    return %c0_i32, %c0_i32_0, %c0_i32_1 : i32, i32, i32
  }
}

module attributes {stable_mosaic.version = 11 : i64} {
  func.func @_tail_kernel(%arg0: i32, %arg1: memref<2x2048xbf16, #tpu.memory_space<vmem>>, %arg2: memref<2048x128xbf16, #tpu.memory_space<vmem>>, %arg3: memref<1x128xf32, #tpu.memory_space<vmem>>, %arg4: memref<1x128xf32, #tpu.memory_space<vmem>>, %arg5: memref<1x1xf32, #tpu.memory_space<vmem>>, %arg6: memref<2x1xf32, #tpu.memory_space<vmem>>) attributes {dimension_semantics = [#tpu.dimension_semantics<arbitrary>], iteration_bounds = array<i64: 1>, scalar_prefetch = 0 : i64, scratch_operands = 0 : i64, tpu.core_type = #tpu.core_type<tc>, window_params = [{pipeline_mode = #tpu.pipeline_mode<synchronous>, transform_indices = @transform_0, window_bounds = array<i64: 2, 2048>}, {pipeline_mode = #tpu.pipeline_mode<synchronous>, transform_indices = @transform_1, window_bounds = array<i64: 2048, 128>}, {pipeline_mode = #tpu.pipeline_mode<synchronous>, transform_indices = @transform_2, window_bounds = array<i64: 1, 128>}, {pipeline_mode = #tpu.pipeline_mode<synchronous>, transform_indices = @transform_3, window_bounds = array<i64: 1, 128>}, {pipeline_mode = #tpu.pipeline_mode<synchronous>, transform_indices = @transform_4, window_bounds = array<i64: 1, 1>}, {pipeline_mode = #tpu.pipeline_mode<synchronous>, transform_indices = @transform_5, window_bounds = array<i64: 2, 1>}]} {
    %c0 = arith.constant 0 : index
    %c0_0 = arith.constant 0 : index
    %0 = vector.load %arg1[%c0, %c0_0] : memref<2x2048xbf16, #tpu.memory_space<vmem>>, vector<2x2048xbf16>
    %c0_1 = arith.constant 0 : index
    %c0_2 = arith.constant 0 : index
    %1 = vector.load %arg2[%c0_1, %c0_2] : memref<2048x128xbf16, #tpu.memory_space<vmem>>, vector<2048x128xbf16>
    %cst = arith.constant dense<0.000000e+00> : vector<2x128xf32>
    %2 = tpu.matmul %0, %1, %cst {dimension_numbers = #tpu.dot_dimension_numbers<[1], [0], [0], [1], [0, 0, 1, 1], [], []>} : vector<2x2048xbf16>, vector<2048x128xbf16>, vector<2x128xf32> -> vector<2x128xf32>
    %c0_3 = arith.constant 0 : index
    %c0_4 = arith.constant 0 : index
    %3 = vector.load %arg3[%c0_3, %c0_4] : memref<1x128xf32, #tpu.memory_space<vmem>>, vector<1x128xf32>
    %4 = vector.broadcast %3 : vector<1x128xf32> to vector<2x128xf32>
    %5 = arith.addf %2, %4 : vector<2x128xf32>
    %6 = arith.mulf %5, %5 : vector<2x128xf32>
    %7 = arith.mulf %5, %5 : vector<2x128xf32>
    %8 = arith.subf %6, %7 : vector<2x128xf32>
    %9 = arith.subf %5, %5 : vector<2x128xf32>
    %cst_5 = arith.constant 9.99999974E-6 : f32
    %10 = vector.broadcast %cst_5 : f32 to vector<2x128xf32>
    %11 = arith.addf %8, %10 : vector<2x128xf32>
    %12 = math.rsqrt %11 : vector<2x128xf32>
    %13 = arith.mulf %9, %12 : vector<2x128xf32>
    %cst_6 = arith.constant 0.000000e+00 : f32
    %14 = vector.broadcast %cst_6 : f32 to vector<2x128xf32>
    %15 = arith.maximumf %13, %14 : vector<2x128xf32>
    %c0_7 = arith.constant 0 : index
    %c0_8 = arith.constant 0 : index
    %16 = vector.load %arg4[%c0_7, %c0_8] : memref<1x128xf32, #tpu.memory_space<vmem>>, vector<1x128xf32>
    %17 = vector.broadcast %16 : vector<1x128xf32> to vector<2x128xf32>
    %18 = arith.mulf %15, %17 : vector<2x128xf32>
    %cst_9 = arith.constant dense<0.000000e+00> : vector<2xf32>
    %19 = vector.multi_reduction <add>, %18, %cst_9 [1] : vector<2x128xf32> to vector<2xf32>
    %20 = vector.shape_cast %19 : vector<2xf32> to vector<2x1xf32>
    %c0_10 = arith.constant 0 : index
    %c0_11 = arith.constant 0 : index
    %21 = vector.load %arg5[%c0_10, %c0_11] : memref<1x1xf32, #tpu.memory_space<vmem>>, vector<1x1xf32>
    %22 = vector.broadcast %21 : vector<1x1xf32> to vector<2x1xf32>
    %23 = arith.addf %20, %22 : vector<2x1xf32>
    %c0_12 = arith.constant 0 : index
    %c0_13 = arith.constant 0 : index
    %24 = vector.load %arg6[%c0_12, %c0_13] : memref<2x1xf32, #tpu.memory_space<vmem>>, vector<2x1xf32>
    tpu.vector_store %arg6[%c0_12, %c0_13], %23 {strides = array<i32>} : memref<2x1xf32, #tpu.memory_space<vmem>>, vector<2x1xf32>,
    return
  }
  func.func @transform_0(%arg0: i32) -> (i32, i32) {
    %c0_i32 = arith.constant 0 : i32
    %c0_i32_0 = arith.constant 0 : i32
    %c0_i32_1 = arith.constant 0 : i32
    return %c0_i32, %c0_i32_0 : i32, i32
  }
  func.func @transform_1(%arg0: i32) -> (i32, i32) {
    %c0_i32 = arith.constant 0 : i32
    %c0_i32_0 = arith.constant 0 : i32
    %c0_i32_1 = arith.constant 0 : i32
    return %c0_i32, %c0_i32_0 : i32, i32
  }
  func.func @transform_2(%arg0: i32) -> (i32, i32) {
    %c0_i32 = arith.constant 0 : i32
    %c0_i32_0 = arith.constant 0 : i32
    %c0_i32_1 = arith.constant 0 : i32
    return %c0_i32, %c0_i32_0 : i32, i32
  }
  func.func @transform_3(%arg0: i32) -> (i32, i32) {
    %c0_i32 = arith.constant 0 : i32
    %c0_i32_0 = arith.constant 0 : i32
    %c0_i32_1 = arith.constant 0 : i32
    return %c0_i32, %c0_i32_0 : i32, i32
  }
  func.func @transform_4(%arg0: i32) -> (i32, i32) {
    %c0_i32 = arith.constant 0 : i32
    %c0_i32_0 = arith.constant 0 : i32
    %c0_i32_1 = arith.constant 0 : i32
    return %c0_i32, %c0_i32_0 : i32, i32
  }
  func.func @transform_5(%arg0: i32) -> (i32, i32) {
    %c0_i32 = arith.constant 0 : i32
    %c0_i32_0 = arith.constant 0 : i32
    %c0_i32_1 = arith.constant 0 : i32
    return %c0_i32, %c0_i32_0 : i32, i32
  }
}

</mosaic_0001>

<bundles_post_ra>
// kernel: content_discriminator_forward.4
= control target key start
LH: loop header
LB: loop body
LE: loop exit
PB: predicated region body
PF: predicated region fallthrough
CT: control target
= control target key end

     0   :  { %s6443_s12 = smov 0   ;;  %s7186_s0 = inlined_call_operand.vmem [shape: bf16[2,2176,128], index: 0, kind: input, shape index: {}]   ;;  %s7187_s1 = inlined_call_operand.vmem [shape: bf16[16,128,128], index: 1, kind: input, shape index: {}]   ;;  %s7188_s2 = inlined_call_operand.vmem [shape: f32[1,128], index: 2, kind: input, shape index: {}]   ;;  %s7189_s3 = inlined_call_operand.vmem [shape: bf16[2,256,128], index: 3, kind: output, shape index: {}]  }
   0x1 LB: > { %s4470_s13 = sadd.s32 4294967295, %s6405_s12   ;;  %p4474_p0 = scmp.ge.s32.totalorder %s6405_s12, 1  ;;  %s6405_s12 = sphi %s6443_s12, %s13_s12  }
   0x2   : > { %p137_p1 = scmp.lt.s32.totalorder %s6405_s12, 3 }
   0x4   : > { %p138_p2 = pnand %p4474_p0, %p137_p1 }
   0x5   : > { %p161_p3 = scmp.lt.s32.totalorder (!%p138_p2), %s4470_s13, 1  ;;  %v6454_v0 = vld [vmem:[%s7188_s2] ss:$0 sm:$0xff] (!%p138_p2)  ;;  %v6466_v1 = vmov (!%p138_p2), 0.0   ;;  %v6468_v2 = vmov (!%p138_p2), 0.0   ;;  %s6470_s24 = smov (!%p138_p2), 0  }
   0x6   : > { %141 = sbr.rel (%p138_p2) target bundleno = 580 (0x244), region = 32 }
   0xd   : > { %s7193_s13 = smov (!%p161_p3, %s4470_s13), 1 }
   0xe   : > { %s6084_s16 = smul.u32 1088, %s7193_s13  ;;  %s5012_s17 = sshll.u32 %s7193_s13, 7 }
   0xf   : > { %s6459_s20 = scalar_lea.vmem %s7189_s3, %s5012_s17 }
  0x10   : > { %s6464_s23 = scalar_lea.vmem %s7186_s0, %s6084_s16 }
  0x11 LB: >> { %v6125_v3 = vld [vmem:[%s7187_s1 + $0x40] sm:$0xff]   ;;  %v6127_v5 = vld [vmem:[%s7187_s1 + $0x48] sm:$0xff]   ;;  %s6491_s4 = sshll.u32 %s6417_s24, 7  ;;  %v6129_v7 = vld [vmem:[%s7187_s1 + $0x50] sm:$0xff]   ;;  %s178_s24 = sadd.s32 1, %s6417_s24   ;;  %s6417_s24 = sphi %s6470_s24, %s178_s24   ;;  %v6413_v2 = vphi %v6468_v2, %v7191_v2   ;;  %v6409_v1 = vphi %v6466_v1, %v7190_v1  }
  0x12   : >> { %v6126_v4 = vld [vmem:[%s7187_s1 + $0x200] sm:$0xff]   ;;  %5332 = vmatprep.subr.bf16.mxu1 %v6125_v3  ;;  %v6128_v6 = vld [vmem:[%s7187_s1 + $0x208] sm:$0xff]   ;;  %s218_s9 = sadd.s32 272, %s6491_s4  ;;  %v6130_v8 = vld [vmem:[%s7187_s1 + $0x210] sm:$0xff]   ;;  %s2124_s13 = sadd.s32 16, %s6491_s4 }
  0x13   : >> { %5588 = vmatprep.subr.bf16.mxu0 %v6126_v4  ;;  %5333 = vmatpush3.bf16.msra.mxu1 %v6125_v3  ;;  %s219_s14 = sshra.s32 %s218_s9, 3  ;;  %v6131_v9 = vld [vmem:[%s7187_s1 + $0x58] sm:$0xff]   ;;  %s2125_s17 = sshra.s32 %s2124_s13, 3  ;;  %v6133_v11 = vld [vmem:[%s7187_s1 + $0x60] sm:$0xff]   ;;  %v6135_v13 = vld [vmem:[%s7187_s1 + $0x68] sm:$0xff]  }
  0x14   : >> { %5589 = vmatpush3.bf16.msra.mxu0 %v6126_v4  ;;  %5334 = vmatprep.subr.bf16.mxu1 %v6127_v5  ;;  %v6132_v10 = vld [vmem:[%s7187_s1 + $0x218] sm:$0xff]   ;;  %s4480_s21 = sshll.u32 %s219_s14, 2  ;;  %s4727_s22 = sshll.u32 %s2125_s17, 2  ;;  %v6134_v12 = vld [vmem:[%s7187_s1 + $0x220] sm:$0xff]   ;;  %v6136_v14 = vld [vmem:[%s7187_s1 + $0x228] sm:$0xff]  }
  0x15   : >> { %5590 = vmatprep.subr.bf16.mxu0 %v6128_v6  ;;  %s6517_s29 = scalar_lea.vmem %s6464_s23, %s4480_s21  ;;  %s6523_s6 = scalar_lea.vmem %s6464_s23, %s4727_s22  ;;  %v6137_v17 = vld [vmem:[%s7187_s1 + $0x70] sm:$0xff]   ;;  %v6139_v19 = vld [vmem:[%s7187_s1 + $0x78] sm:$0xff]   ;;  %v6144_v22 = vld [vmem:[%s7187_s1] sm:$0xff]  }
  0x16   : >> { %v6141_v15 = vld [vmem:[%s6517_s29] sm:$0xff]   ;;  %v6138_v18 = vld [vmem:[%s7187_s1 + $0x230] sm:$0xff]   ;;  %v6140_v20 = vld [vmem:[%s7187_s1 + $0x238] sm:$0xff]   ;;  %s2371_s11 = sadd.s32 288, %s6491_s4  ;;  %s182_s15 = sshra.s32 %s6491_s4, 3 }
  0x17   : >> { %5335 = vmatpush3.bf16.msra.mxu1 %v6127_v5  ;;  %v6142_v16 = vld [vmem:[%s6523_s6] sm:$0xff]   ;;  %5348 = vmatprep.mubr.bf16.mxu1 %v6141_v15  ;;  %v6143_v21 = vld [vmem:[%s6517_s29 + $0x8] sm:$0xff]   ;;  %v6149_v27 = vld [vmem:[%s6517_s29 + $0x10] sm:$0xff]   ;;  %s2372_s16 = sshra.s32 %s2371_s11, 3  ;;  %s4479_s19 = sshll.u32 %s182_s15, 2 }
  0x18   : >> { %5591 = vmatpush3.bf16.msra.mxu0 %v6128_v6  ;;  %5336 = vmatprep.subr.bf16.mxu1 %v6129_v7  ;;  %v6146_v23 = vld [vmem:[%s7187_s1 + $0x240] sm:$0xff]   ;;  %v6145_v24 = vld [vmem:[%s6523_s6 + $0x8] sm:$0xff]   ;;  %v6150_v28 = vld [vmem:[%s6523_s6 + $0x10] sm:$0xff]   ;;  %s4760_s25 = sshll.u32 %s2372_s16, 2  ;;  %s6588_s28 = scalar_lea.vmem %s6464_s23, %s4479_s19 }
  0x19   : >> { %5592 = vmatprep.subr.bf16.mxu0 %v6130_v8  ;;  %5604 = vmatprep.mubr.bf16.mxu0 %v6142_v16  ;;  %v6147_v25 = vld [vmem:[%s7187_s1 + $0x8] sm:$0xff]   ;;  %v6151_v29 = vld [vmem:[%s6517_s29 + $0x18] sm:$0xff]   ;;  %v6152_v30 = vld [vmem:[%s7187_s1 + $0x10] sm:$0xff]   ;;  %s6594_s7 = scalar_lea.vmem %s6464_s23, %s4760_s25  ;;  %s642_s8 = sadd.s32 1088, %s6491_s4 }
  0x1a   : >> { %v6148_v26 = vld [vmem:[%s7187_s1 + $0x248] sm:$0xff]   ;;  %v6154_v31 = vld [vmem:[%s7187_s1 + $0x250] sm:$0xff]   ;;  %v6153_v32 = vld [vmem:[%s6523_s6 + $0x18] sm:$0xff]   ;;  %s2618_s11 = sadd.s32 1104, %s6491_s4  ;;  %p175_p4 = scmp.ge.s32.totalorder %s178_s24, 2  }
  0x1b   : >> { %5337 = vmatpush3.bf16.msra.mxu1 %v6129_v7  ;;  %v6155_v33 = vld [vmem:[%s7187_s1 + $0x18] sm:$0xff]   ;;  %v6157_v35 = vld [vmem:[%s6517_s29 + $0x20] sm:$0xff]   ;;  %v6159_v37 = vld [vmem:[%s6517_s29 + $0x28] sm:$0xff]   ;;  %s2619_s15 = sshra.s32 %s2618_s11, 3  ;;  %s2865_s11 = sadd.s32 1376, %s6491_s4 }
  0x1c   : >> { %5593 = vmatpush3.bf16.msra.mxu0 %v6130_v8  ;;  %5338 = vmatprep.subr.bf16.mxu1 %v6131_v9  ;;  %v6156_v34 = vld [vmem:[%s7187_s1 + $0x258] sm:$0xff]   ;;  %v6158_v36 = vld [vmem:[%s6523_s6 + $0x20] sm:$0xff]   ;;  %v6161_v40 = vld [vmem:[%s6523_s6 + $0x28] sm:$0xff]   ;;  %s4793_s21 = sshll.u32 %s2619_s15, 2 }
  0x1d   : >> { %5594 = vmatprep.subr.bf16.mxu0 %v6132_v10  ;;  %v6160_v38 = vld [vmem:[%s7187_s1 + $0x20] sm:$0xff]   ;;  %v6163_v41 = vld [vmem:[%s7187_s1 + $0x28] sm:$0xff]   ;;  %v6165_v43 = vld [vmem:[%s6517_s29 + $0x30] sm:$0xff]   ;;  %s6666_s5 = scalar_lea.vmem %s6464_s23, %s4793_s21 }
  0x1e   : >> { %v6162_v39 = vld [vmem:[%s7187_s1 + $0x260] sm:$0xff]   ;;  %v6164_v42 = vld [vmem:[%s7187_s1 + $0x268] sm:$0xff]   ;;  %v6166_v44 = vld [vmem:[%s6523_s6 + $0x30] sm:$0xff]  }
  0x1f   : >> { %5339 = vmatpush3.bf16.msra.mxu1 %v6131_v9  ;;  %v6167_v45 = vld [vmem:[%s6517_s29 + $0x38] sm:$0xff]   ;;  %v6168_v46 = vld [vmem:[%s7187_s1 + $0x30] sm:$0xff]   ;;  %v6173_v51 = vld [vmem:[%s6588_s28] sm:$0xff]   ;;  %s643_s29 = sshra.s32 %s642_s8, 3  ;;  %s889_s8 = sadd.s32 1360, %s6491_s4 }
  0x20   : >> { %5595 = vmatpush3.bf16.msra.mxu0 %v6132_v10  ;;  %5340 = vmatprep.subr.bf16.mxu1 %v6133_v11  ;;  %v6170_v47 = vld [vmem:[%s7187_s1 + $0x270] sm:$0xff]   ;;  %v6169_v48 = vld [vmem:[%s6523_s6 + $0x38] sm:$0xff]   ;;  %v6174_v52 = vld [vmem:[%s6594_s7] sm:$0xff]   ;;  %s4529_s17 = sshll.u32 %s643_s29, 2  ;;  %s2866_s29 = sshra.s32 %s2865_s11, 3 }
  0x21   : >> { %5596 = vmatprep.subr.bf16.mxu0 %v6134_v12  ;;  %v6171_v49 = vld [vmem:[%s7187_s1 + $0x38] sm:$0xff]   ;;  %v6175_v53 = vld [vmem:[%s6588_s28 + $0x8] sm:$0xff]   ;;  %v6176_v54 = vld [vmem:[%s7187_s1 + $0x80] sm:$0xff]   ;;  %s6660_s26 = scalar_lea.vmem %s6464_s23, %s4529_s17  ;;  %s4826_s18 = sshll.u32 %s2866_s29, 2 }
  0x22   : >> { %v6172_v50 = vld [vmem:[%s7187_s1 + $0x278] sm:$0xff]   ;;  %v6178_v55 = vld [vmem:[%s7187_s1 + $0x280] sm:$0xff]   ;;  %v6177_v56 = vld [vmem:[%s6594_s7 + $0x8] sm:$0xff]   ;;  %s6738_s30 = scalar_lea.vmem %s6464_s23, %s4826_s18  ;;  %s3112_s11 = sadd.s32 560, %s6491_s4 }
  0x23   : >> { %5341 = vmatpush3.bf16.msra.mxu1 %v6133_v11  ;;  %v6179_v57 = vld [vmem:[%s7187_s1 + $0x88] sm:$0xff]   ;;  %v6181_v59 = vld [vmem:[%s6588_s28 + $0x10] sm:$0xff]   ;;  %v6183_v61 = vld [vmem:[%s6588_s28 + $0x18] sm:$0xff]  }
  0x24   : >> { %5597 = vmatpush3.bf16.msra.mxu0 %v6134_v12  ;;  %5342 = vmatprep.subr.bf16.mxu1 %v6135_v13  ;;  %v6180_v58 = vld [vmem:[%s7187_s1 + $0x288] sm:$0xff]   ;;  %v6182_v60 = vld [vmem:[%s6594_s7 + $0x10] sm:$0xff]   ;;  %v6185_v3 = vld [vmem:[%s6594_s7 + $0x18] sm:$0xff]  }
  0x25   : >> { %5598 = vmatprep.subr.bf16.mxu0 %v6136_v14  ;;  %v6184_v62 = vld [vmem:[%s7187_s1 + $0x90] sm:$0xff]   ;;  %v6187_v4 = vld [vmem:[%s7187_s1 + $0x98] sm:$0xff]   ;;  %v6189_v6 = vld [vmem:[%s6588_s28 + $0x20] sm:$0xff]  }
  0x26   : >> { %v6186_v63 = vld [vmem:[%s7187_s1 + $0x290] sm:$0xff]   ;;  %v6188_v5 = vld [vmem:[%s7187_s1 + $0x298] sm:$0xff]   ;;  %v6190_v7 = vld [vmem:[%s6594_s7 + $0x20] sm:$0xff]  }
  0x27   : >> { %5343 = vmatpush3.bf16.msra.mxu1 %v6135_v13  ;;  %v6191_v8 = vld [vmem:[%s6588_s28 + $0x28] sm:$0xff]   ;;  %v6192_v9 = vld [vmem:[%s7187_s1 + $0xa0] sm:$0xff]   ;;  %v6198_v15 = vld [vmem:[%s6594_s7 + $0x30] sm:$0xff]  }
  0x28   : >> { %5599 = vmatpush3.bf16.msra.mxu0 %v6136_v14  ;;  %5344 = vmatprep.subr.bf16.mxu1 %v6137_v17  ;;  %v6194_v10 = vld [vmem:[%s7187_s1 + $0x2a0] sm:$0xff]   ;;  %v6193_v11 = vld [vmem:[%s6594_s7 + $0x28] sm:$0xff]   ;;  %v6197_v14 = vld [vmem:[%s6588_s28 + $0x30] sm:$0xff]  }
  0x29   : >> { %5600 = vmatprep.subr.bf16.mxu0 %v6138_v18  ;;  %v6195_v12 = vld [vmem:[%s7187_s1 + $0xa8] sm:$0xff]   ;;  %v6199_v16 = vld [vmem:[%s6588_s28 + $0x38] sm:$0xff]   ;;  %s890_s28 = sshra.s32 %s889_s8, 3  ;;  %s1136_s8 = sadd.s32 544, %s6491_s4 }
  0x2a   : >> { %v6196_v13 = vld [vmem:[%s7187_s1 + $0x2a8] sm:$0xff]   ;;  %s4562_s6 = sshll.u32 %s890_s28, 2  ;;  %s3113_s28 = sshra.s32 %s3112_s11, 3 }
  0x2b   : >> { %5345 = vmatpush3.bf16.msra.mxu1 %v6137_v17  ;;  %v6200_v17 = vld [vmem:[%s7187_s1 + $0xb0] sm:$0xff]   ;;  %s6732_s22 = scalar_lea.vmem %s6464_s23, %s4562_s6  ;;  %s4859_s16 = sshll.u32 %s3113_s28, 2 }
  0x2c   : >> { %5601 = vmatpush3.bf16.msra.mxu0 %v6138_v18  ;;  %5346 = vmatprep.subr.bf16.mxu1 %v6139_v19  ;;  %v6202_v18 = vld [vmem:[%s7187_s1 + $0x2b0] sm:$0xff]   ;;  %s6810_s27 = scalar_lea.vmem %s6464_s23, %s4859_s16  ;;  %s3359_s11 = sadd.s32 832, %s6491_s4 }
  0x2d   : >> { %5602 = vmatprep.subr.bf16.mxu0 %v6140_v20 }
  0x2f   : >> { %5347 = vmatpush3.bf16.msra.mxu1 %v6139_v19  ;;  %v6201_v19 = vld [vmem:[%s6594_s7 + $0x38] sm:$0xff]  }
  0x30   : >> { %5603 = vmatpush3.bf16.msra.mxu0 %v6140_v20  ;;  %5364 = vmatprep.subr.bf16.mxu1 %v6144_v22  ;;  %v6203_v20 = vld [vmem:[%s7187_s1 + $0xb8] sm:$0xff]  }
  0x31   : >> { %5620 = vmatprep.subr.bf16.mxu0 %v6146_v23 }
  0x32   : >> { %5349 = vmatmul.mubr.bf16.vlgmr.msra.gmra.mrb[0].mxu1 %v6143_v21  ;;  %v6204_v21 = vld [vmem:[%s7187_s1 + $0x2b8] sm:$0xff]  }
  0x33   : >> { %5605 = vmatmul.mubr.bf16.vlgmr.msra.gmra.mrb[0].mxu0 %v6145_v24  ;;  %5365 = vmatpush3.bf16.msra.mxu1 %v6144_v22  ;;  %v6205_v22 = vld [vmem:[%s6660_s26] sm:$0xff]   ;;  %v6207_v24 = vld [vmem:[%s6660_s26 + $0x8] sm:$0xff]  }
  0x34   : >> { %5621 = vmatpush3.bf16.msra.mxu0 %v6146_v23  ;;  %5366 = vmatprep.subr.bf16.mxu1 %v6147_v25  ;;  %v6206_v23 = vld [vmem:[%s6666_s5] sm:$0xff]  }
  0x35   : >> { %5622 = vmatprep.subr.bf16.mxu0 %v6148_v26  ;;  %5352 = vmatprep.mubr.bf16.mxu1 %v6149_v27  ;;  %v6209_v27 = vld [vmem:[%s6666_s5 + $0x8] sm:$0xff]  }
  0x36   : >> { %5608 = vmatprep.mubr.bf16.mxu0 %v6150_v28  ;;  %v6211_v28 = vld [vmem:[%s7187_s1 + $0xc8] sm:$0xff]  }
  0x37   : >> { %5367 = vmatpush3.bf16.msra.mxu1 %v6147_v25  ;;  %v6208_v25 = vld [vmem:[%s7187_s1 + $0xc0] sm:$0xff]  }
  0x38   : >> { %5623 = vmatpush3.bf16.msra.mxu0 %v6148_v26  ;;  %5368 = vmatprep.subr.bf16.mxu1 %v6152_v30  ;;  %v6210_v26 = vld [vmem:[%s7187_s1 + $0x2c0] sm:$0xff]  }
  0x39   : >> { %5624 = vmatprep.subr.bf16.mxu0 %v6154_v31 }
  0x3a   : >> { %5353 = vmatmul.mubr.bf16.gmra.mrb[4].mxu1 %v6151_v29  ;;  %v6212_v29 = vld [vmem:[%s7187_s1 + $0x2c8] sm:$0xff]  }
  0x3b   : >> { %5609 = vmatmul.mubr.bf16.gmra.mrb[4].mxu0 %v6153_v32  ;;  %5369 = vmatpush3.bf16.msra.mxu1 %v6152_v30  ;;  %v6213_v30 = vld [vmem:[%s6660_s26 + $0x10] sm:$0xff]   ;;  %v6215_v32 = vld [vmem:[%s6660_s26 + $0x18] sm:$0xff]  }
  0x3c   : >> { %5625 = vmatpush3.bf16.msra.mxu0 %v6154_v31  ;;  %5370 = vmatprep.subr.bf16.mxu1 %v6155_v33  ;;  %v6214_v31 = vld [vmem:[%s6666_s5 + $0x10] sm:$0xff]  }
  0x3d   : >> { %5626 = vmatprep.subr.bf16.mxu0 %v6156_v34  ;;  %5356 = vmatprep.mubr.bf16.mxu1 %v6157_v35  ;;  %v6217_v35 = vld [vmem:[%s6666_s5 + $0x18] sm:$0xff]  }
  0x3e   : >> { %5612 = vmatprep.mubr.bf16.mxu0 %v6158_v36  ;;  %v6219_v36 = vld [vmem:[%s7187_s1 + $0xd8] sm:$0xff]  }
  0x3f   : >> { %5371 = vmatpush3.bf16.msra.mxu1 %v6155_v33  ;;  %v6216_v33 = vld [vmem:[%s7187_s1 + $0xd0] sm:$0xff]  }
  0x40   : >> { %5627 = vmatpush3.bf16.msra.mxu0 %v6156_v34  ;;  %5372 = vmatprep.subr.bf16.mxu1 %v6160_v38  ;;  %v6218_v34 = vld [vmem:[%s7187_s1 + $0x2d0] sm:$0xff]  }
  0x41   : >> { %5628 = vmatprep.subr.bf16.mxu0 %v6162_v39 }
  0x42   : >> { %5357 = vmatmul.mubr.bf16.gmra.mrb[8].mxu1 %v6159_v37  ;;  %v6220_v37 = vld [vmem:[%s7187_s1 + $0x2d8] sm:$0xff]  }
  0x43   : >> { %5613 = vmatmul.mubr.bf16.gmra.mrb[8].mxu0 %v6161_v40  ;;  %5373 = vmatpush3.bf16.msra.mxu1 %v6160_v38  ;;  %v6221_v38 = vld [vmem:[%s6660_s26 + $0x20] sm:$0xff]   ;;  %v6223_v40 = vld [vmem:[%s6660_s26 + $0x28] sm:$0xff]  }
  0x44   : >> { %5629 = vmatpush3.bf16.msra.mxu0 %v6162_v39  ;;  %5374 = vmatprep.subr.bf16.mxu1 %v6163_v41  ;;  %v6222_v39 = vld [vmem:[%s6666_s5 + $0x20] sm:$0xff]  }
  0x45   : >> { %5630 = vmatprep.subr.bf16.mxu0 %v6164_v42  ;;  %5360 = vmatprep.mubr.bf16.mxu1 %v6165_v43  ;;  %v6225_v43 = vld [vmem:[%s6666_s5 + $0x28] sm:$0xff]  }
  0x46   : >> { %5616 = vmatprep.mubr.bf16.mxu0 %v6166_v44  ;;  %v6227_v44 = vld [vmem:[%s7187_s1 + $0xe8] sm:$0xff]  }
  0x47   : >> { %5375 = vmatpush3.bf16.msra.mxu1 %v6163_v41  ;;  %v6224_v41 = vld [vmem:[%s7187_s1 + $0xe0] sm:$0xff]  }
  0x48   : >> { %5631 = vmatpush3.bf16.msra.mxu0 %v6164_v42  ;;  %5376 = vmatprep.subr.bf16.mxu1 %v6168_v46  ;;  %v6226_v42 = vld [vmem:[%s7187_s1 + $0x2e0] sm:$0xff]  }
  0x49   : >> { %5632 = vmatprep.subr.bf16.mxu0 %v6170_v47 }
  0x4a   : >> { %5361 = vmatmul.mubr.bf16.gmra.mrb[12].mxu1 %v6167_v45  ;;  %v6228_v45 = vld [vmem:[%s7187_s1 + $0x2e8] sm:$0xff]  }
  0x4b   : >> { %5617 = vmatmul.mubr.bf16.gmra.mrb[12].mxu0 %v6169_v48  ;;  %5377 = vmatpush3.bf16.msra.mxu1 %v6168_v46  ;;  %v6229_v46 = vld [vmem:[%s6660_s26 + $0x30] sm:$0xff]   ;;  %v6231_v48 = vld [vmem:[%s6660_s26 + $0x38] sm:$0xff]   ;;  %s1137_s26 = sshra.s32 %s1136_s8, 3  ;;  %s1383_s8 = sadd.s32 816, %s6491_s4 }
  0x4c   : >> { %5633 = vmatpush3.bf16.msra.mxu0 %v6170_v47  ;;  %5378 = vmatprep.subr.bf16.mxu1 %v6171_v49  ;;  %v6230_v47 = vld [vmem:[%s6666_s5 + $0x30] sm:$0xff]   ;;  %s4595_s7 = sshll.u32 %s1137_s26, 2  ;;  %s3360_s26 = sshra.s32 %s3359_s11, 3 }
  0x4d   : >> { %5634 = vmatprep.subr.bf16.mxu0 %v6172_v50  ;;  %5380 = vmatprep.mubr.bf16.mxu1 %v6173_v51  ;;  %v6233_v51 = vld [vmem:[%s6666_s5 + $0x38] sm:$0xff]   ;;  %s6804_s19 = scalar_lea.vmem %s6464_s23, %s4595_s7  ;;  %s4892_s15 = sshll.u32 %s3360_s26, 2 }
  0x4e   : >> { %5636 = vmatprep.mubr.bf16.mxu0 %v6174_v52  ;;  %v6235_v52 = vld [vmem:[%s7187_s1 + $0xf8] sm:$0xff]   ;;  %s6882_s25 = scalar_lea.vmem %s6464_s23, %s4892_s15  ;;  %s3606_s11 = sadd.s32 1648, %s6491_s4 }
  0x4f   : >> { %5379 = vmatpush3.bf16.msra.mxu1 %v6171_v49  ;;  %v6232_v49 = vld [vmem:[%s7187_s1 + $0xf0] sm:$0xff]  }
  0x50   : >> { %5635 = vmatpush3.bf16.msra.mxu0 %v6172_v50  ;;  %5396 = vmatprep.subr.bf16.mxu1 %v6176_v54  ;;  %v6234_v50 = vld [vmem:[%s7187_s1 + $0x2f0] sm:$0xff]  }
  0x51   : >> { %5652 = vmatprep.subr.bf16.mxu0 %v6178_v55 }
  0x52   : >> { %5381 = vmatmul.mubr.bf16.vlgmr.msra.gmra.mrb[0].mxu1 %v6175_v53  ;;  %v6236_v53 = vld [vmem:[%s7187_s1 + $0x2f8] sm:$0xff]  }
  0x53   : >> { %5637 = vmatmul.mubr.bf16.vlgmr.msra.gmra.mrb[0].mxu0 %v6177_v56  ;;  %5397 = vmatpush3.bf16.msra.mxu1 %v6176_v54  ;;  %v6237_v54 = vld [vmem:[%s6732_s22] sm:$0xff]   ;;  %v6239_v56 = vld [vmem:[%s6732_s22 + $0x8] sm:$0xff]  }
  0x54   : >> { %5653 = vmatpush3.bf16.msra.mxu0 %v6178_v55  ;;  %5398 = vmatprep.subr.bf16.mxu1 %v6179_v57  ;;  %v6238_v55 = vld [vmem:[%s6738_s30] sm:$0xff]  }
  0x55   : >> { %5654 = vmatprep.subr.bf16.mxu0 %v6180_v58  ;;  %5384 = vmatprep.mubr.bf16.mxu1 %v6181_v59  ;;  %v6241_v59 = vld [vmem:[%s6738_s30 + $0x8] sm:$0xff]  }
  0x56   : >> { %5640 = vmatprep.mubr.bf16.mxu0 %v6182_v60  ;;  %v6243_v60 = vld [vmem:[%s7187_s1 + $0x108] sm:$0xff]  }
  0x57   : >> { %5399 = vmatpush3.bf16.msra.mxu1 %v6179_v57  ;;  %v6240_v57 = vld [vmem:[%s7187_s1 + $0x100] sm:$0xff]  }
  0x58   : >> { %5655 = vmatpush3.bf16.msra.mxu0 %v6180_v58  ;;  %5400 = vmatprep.subr.bf16.mxu1 %v6184_v62  ;;  %v6242_v58 = vld [vmem:[%s7187_s1 + $0x300] sm:$0xff]  }
  0x59   : >> { %5656 = vmatprep.subr.bf16.mxu0 %v6186_v63 }
  0x5a   : >> { %5385 = vmatmul.mubr.bf16.gmra.mrb[4].mxu1 %v6183_v61  ;;  %v6244_v61 = vld [vmem:[%s7187_s1 + $0x308] sm:$0xff]  }
  0x5b   : >> { %5641 = vmatmul.mubr.bf16.gmra.mrb[4].mxu0 %v6185_v3  ;;  %5401 = vmatpush3.bf16.msra.mxu1 %v6184_v62  ;;  %v6245_v62 = vld [vmem:[%s6732_s22 + $0x10] sm:$0xff]   ;;  %v6247_v3 = vld [vmem:[%s6732_s22 + $0x18] sm:$0xff]  }
  0x5c   : >> { %5657 = vmatpush3.bf16.msra.mxu0 %v6186_v63  ;;  %5402 = vmatprep.subr.bf16.mxu1 %v6187_v4  ;;  %v6246_v63 = vld [vmem:[%s6738_s30 + $0x10] sm:$0xff]  }
  0x5d   : >> { %5658 = vmatprep.subr.bf16.mxu0 %v6188_v5  ;;  %5388 = vmatprep.mubr.bf16.mxu1 %v6189_v6  ;;  %v6249_v6 = vld [vmem:[%s6738_s30 + $0x18] sm:$0xff]  }
  0x5e   : >> { %5644 = vmatprep.mubr.bf16.mxu0 %v6190_v7  ;;  %v6251_v7 = vld [vmem:[%s7187_s1 + $0x118] sm:$0xff]  }
  0x5f   : >> { %5403 = vmatpush3.bf16.msra.mxu1 %v6187_v4  ;;  %v6248_v4 = vld [vmem:[%s7187_s1 + $0x110] sm:$0xff]  }
  0x60   : >> { %5659 = vmatpush3.bf16.msra.mxu0 %v6188_v5  ;;  %5404 = vmatprep.subr.bf16.mxu1 %v6192_v9  ;;  %v6250_v5 = vld [vmem:[%s7187_s1 + $0x310] sm:$0xff]  }
  0x61   : >> { %5660 = vmatprep.subr.bf16.mxu0 %v6194_v10 }
  0x62   : >> { %5389 = vmatmul.mubr.bf16.gmra.mrb[8].mxu1 %v6191_v8  ;;  %v6252_v8 = vld [vmem:[%s7187_s1 + $0x318] sm:$0xff]  }
  0x63   : >> { %5645 = vmatmul.mubr.bf16.gmra.mrb[8].mxu0 %v6193_v11  ;;  %5405 = vmatpush3.bf16.msra.mxu1 %v6192_v9  ;;  %v6253_v9 = vld [vmem:[%s6732_s22 + $0x20] sm:$0xff]   ;;  %v6255_v11 = vld [vmem:[%s6732_s22 + $0x28] sm:$0xff]  }
  0x64   : >> { %5661 = vmatpush3.bf16.msra.mxu0 %v6194_v10  ;;  %5406 = vmatprep.subr.bf16.mxu1 %v6195_v12  ;;  %v6254_v10 = vld [vmem:[%s6738_s30 + $0x20] sm:$0xff]  }
  0x65   : >> { %5662 = vmatprep.subr.bf16.mxu0 %v6196_v13  ;;  %5392 = vmatprep.mubr.bf16.mxu1 %v6197_v14  ;;  %v6257_v14 = vld [vmem:[%s6738_s30 + $0x28] sm:$0xff]  }
  0x66   : >> { %5648 = vmatprep.mubr.bf16.mxu0 %v6198_v15  ;;  %v6259_v15 = vld [vmem:[%s7187_s1 + $0x128] sm:$0xff]  }
  0x67   : >> { %5407 = vmatpush3.bf16.msra.mxu1 %v6195_v12  ;;  %v6256_v12 = vld [vmem:[%s7187_s1 + $0x120] sm:$0xff]  }
  0x68   : >> { %5663 = vmatpush3.bf16.msra.mxu0 %v6196_v13  ;;  %5408 = vmatprep.subr.bf16.mxu1 %v6200_v17  ;;  %v6258_v13 = vld [vmem:[%s7187_s1 + $0x320] sm:$0xff]  }
  0x69   : >> { %5664 = vmatprep.subr.bf16.mxu0 %v6202_v18 }
  0x6a   : >> { %5393 = vmatmul.mubr.bf16.gmra.mrb[12].mxu1 %v6199_v16  ;;  %v6260_v16 = vld [vmem:[%s7187_s1 + $0x328] sm:$0xff]  }
  0x6b   : >> { %5649 = vmatmul.mubr.bf16.gmra.mrb[12].mxu0 %v6201_v19  ;;  %5409 = vmatpush3.bf16.msra.mxu1 %v6200_v17  ;;  %v6261_v17 = vld [vmem:[%s6732_s22 + $0x30] sm:$0xff]   ;;  %v6263_v19 = vld [vmem:[%s6732_s22 + $0x38] sm:$0xff]   ;;  %s1384_s22 = sshra.s32 %s1383_s8, 3  ;;  %s1630_s8 = sadd.s32 1632, %s6491_s4 }
  0x6c   : >> { %5665 = vmatpush3.bf16.msra.mxu0 %v6202_v18  ;;  %5410 = vmatprep.subr.bf16.mxu1 %v6203_v20  ;;  %v6262_v18 = vld [vmem:[%s6738_s30 + $0x30] sm:$0xff]   ;;  %s4628_s5 = sshll.u32 %s1384_s22, 2  ;;  %s3607_s22 = sshra.s32 %s3606_s11, 3 }
  0x6d   : >> { %5666 = vmatprep.subr.bf16.mxu0 %v6204_v21  ;;  %5412 = vmatprep.mubr.bf16.mxu1 %v6205_v22  ;;  %v6265_v22 = vld [vmem:[%s6738_s30 + $0x38] sm:$0xff]   ;;  %s6876_s17 = scalar_lea.vmem %s6464_s23, %s4628_s5  ;;  %s4925_s29 = sshll.u32 %s3607_s22, 2 }
  0x6e   : >> { %5668 = vmatprep.mubr.bf16.mxu0 %v6206_v23  ;;  %v6267_v23 = vld [vmem:[%s7187_s1 + $0x138] sm:$0xff]   ;;  %s6954_s21 = scalar_lea.vmem %s6464_s23, %s4925_s29  ;;  %s3853_s11 = sadd.s32 1920, %s6491_s4 }
  0x6f   : >> { %5411 = vmatpush3.bf16.msra.mxu1 %v6203_v20  ;;  %v6264_v20 = vld [vmem:[%s7187_s1 + $0x130] sm:$0xff]  }
  0x70   : >> { %5667 = vmatpush3.bf16.msra.mxu0 %v6204_v21  ;;  %5428 = vmatprep.subr.bf16.mxu1 %v6208_v25  ;;  %v6266_v21 = vld [vmem:[%s7187_s1 + $0x330] sm:$0xff]  }
  0x71   : >> { %5684 = vmatprep.subr.bf16.mxu0 %v6210_v26 }
  0x72   : >> { %5413 = vmatmul.mubr.bf16.vlgmr.msra.gmra.mrb[0].mxu1 %v6207_v24  ;;  %v6268_v24 = vld [vmem:[%s7187_s1 + $0x338] sm:$0xff]  }
  0x73   : >> { %5669 = vmatmul.mubr.bf16.vlgmr.msra.gmra.mrb[0].mxu0 %v6209_v27  ;;  %5429 = vmatpush3.bf16.msra.mxu1 %v6208_v25  ;;  %v6269_v25 = vld [vmem:[%s6804_s19] sm:$0xff]   ;;  %v6271_v27 = vld [vmem:[%s6804_s19 + $0x8] sm:$0xff]  }
  0x74   : >> { %5685 = vmatpush3.bf16.msra.mxu0 %v6210_v26  ;;  %5430 = vmatprep.subr.bf16.mxu1 %v6211_v28  ;;  %v6270_v26 = vld [vmem:[%s6810_s27] sm:$0xff]  }
  0x75   : >> { %5686 = vmatprep.subr.bf16.mxu0 %v6212_v29  ;;  %5416 = vmatprep.mubr.bf16.mxu1 %v6213_v30  ;;  %v6273_v30 = vld [vmem:[%s6810_s27 + $0x8] sm:$0xff]  }
  0x76   : >> { %5672 = vmatprep.mubr.bf16.mxu0 %v6214_v31  ;;  %v6275_v31 = vld [vmem:[%s7187_s1 + $0x148] sm:$0xff]  }
  0x77   : >> { %5431 = vmatpush3.bf16.msra.mxu1 %v6211_v28  ;;  %v6272_v28 = vld [vmem:[%s7187_s1 + $0x140] sm:$0xff]  }
  0x78   : >> { %5687 = vmatpush3.bf16.msra.mxu0 %v6212_v29  ;;  %5432 = vmatprep.subr.bf16.mxu1 %v6216_v33  ;;  %v6274_v29 = vld [vmem:[%s7187_s1 + $0x340] sm:$0xff]  }
  0x79   : >> { %5688 = vmatprep.subr.bf16.mxu0 %v6218_v34 }
  0x7a   : >> { %5417 = vmatmul.mubr.bf16.gmra.mrb[4].mxu1 %v6215_v32  ;;  %v6276_v32 = vld [vmem:[%s7187_s1 + $0x348] sm:$0xff]  }
  0x7b   : >> { %5673 = vmatmul.mubr.bf16.gmra.mrb[4].mxu0 %v6217_v35  ;;  %5433 = vmatpush3.bf16.msra.mxu1 %v6216_v33  ;;  %v6277_v33 = vld [vmem:[%s6804_s19 + $0x10] sm:$0xff]   ;;  %v6279_v35 = vld [vmem:[%s6804_s19 + $0x18] sm:$0xff]  }
  0x7c   : >> { %5689 = vmatpush3.bf16.msra.mxu0 %v6218_v34  ;;  %5434 = vmatprep.subr.bf16.mxu1 %v6219_v36  ;;  %v6278_v34 = vld [vmem:[%s6810_s27 + $0x10] sm:$0xff]  }
  0x7d   : >> { %5690 = vmatprep.subr.bf16.mxu0 %v6220_v37  ;;  %5420 = vmatprep.mubr.bf16.mxu1 %v6221_v38  ;;  %v6281_v38 = vld [vmem:[%s6810_s27 + $0x18] sm:$0xff]  }
  0x7e   : >> { %5676 = vmatprep.mubr.bf16.mxu0 %v6222_v39  ;;  %v6283_v39 = vld [vmem:[%s7187_s1 + $0x158] sm:$0xff]  }
  0x7f   : >> { %5435 = vmatpush3.bf16.msra.mxu1 %v6219_v36  ;;  %v6280_v36 = vld [vmem:[%s7187_s1 + $0x150] sm:$0xff]  }
  0x80   : >> { %5691 = vmatpush3.bf16.msra.mxu0 %v6220_v37  ;;  %5436 = vmatprep.subr.bf16.mxu1 %v6224_v41  ;;  %v6282_v37 = vld [vmem:[%s7187_s1 + $0x350] sm:$0xff]  }
  0x81   : >> { %5692 = vmatprep.subr.bf16.mxu0 %v6226_v42 }
  0x82   : >> { %5421 = vmatmul.mubr.bf16.gmra.mrb[8].mxu1 %v6223_v40  ;;  %v6284_v40 = vld [vmem:[%s7187_s1 + $0x358] sm:$0xff]  }
  0x83   : >> { %5677 = vmatmul.mubr.bf16.gmra.mrb[8].mxu0 %v6225_v43  ;;  %5437 = vmatpush3.bf16.msra.mxu1 %v6224_v41  ;;  %v6285_v41 = vld [vmem:[%s6804_s19 + $0x20] sm:$0xff]   ;;  %v6287_v43 = vld [vmem:[%s6804_s19 + $0x28] sm:$0xff]  }
  0x84   : >> { %5693 = vmatpush3.bf16.msra.mxu0 %v6226_v42  ;;  %5438 = vmatprep.subr.bf16.mxu1 %v6227_v44  ;;  %v6286_v42 = vld [vmem:[%s6810_s27 + $0x20] sm:$0xff]  }
  0x85   : >> { %5694 = vmatprep.subr.bf16.mxu0 %v6228_v45  ;;  %5424 = vmatprep.mubr.bf16.mxu1 %v6229_v46  ;;  %v6289_v46 = vld [vmem:[%s6810_s27 + $0x28] sm:$0xff]  }
  0x86   : >> { %5680 = vmatprep.mubr.bf16.mxu0 %v6230_v47  ;;  %v6291_v47 = vld [vmem:[%s7187_s1 + $0x168] sm:$0xff]  }
  0x87   : >> { %5439 = vmatpush3.bf16.msra.mxu1 %v6227_v44  ;;  %v6288_v44 = vld [vmem:[%s7187_s1 + $0x160] sm:$0xff]  }
  0x88   : >> { %5695 = vmatpush3.bf16.msra.mxu0 %v6228_v45  ;;  %5440 = vmatprep.subr.bf16.mxu1 %v6232_v49  ;;  %v6290_v45 = vld [vmem:[%s7187_s1 + $0x360] sm:$0xff]  }
  0x89   : >> { %5696 = vmatprep.subr.bf16.mxu0 %v6234_v50 }
  0x8a   : >> { %5425 = vmatmul.mubr.bf16.gmra.mrb[12].mxu1 %v6231_v48  ;;  %v6292_v48 = vld [vmem:[%s7187_s1 + $0x368] sm:$0xff]  }
  0x8b   : >> { %5681 = vmatmul.mubr.bf16.gmra.mrb[12].mxu0 %v6233_v51  ;;  %5441 = vmatpush3.bf16.msra.mxu1 %v6232_v49  ;;  %v6293_v49 = vld [vmem:[%s6804_s19 + $0x30] sm:$0xff]   ;;  %v6295_v51 = vld [vmem:[%s6804_s19 + $0x38] sm:$0xff]   ;;  %s1631_s19 = sshra.s32 %s1630_s8, 3  ;;  %s1877_s8 = sadd.s32 1904, %s6491_s4 }
  0x8c   : >> { %5697 = vmatpush3.bf16.msra.mxu0 %v6234_v50  ;;  %5442 = vmatprep.subr.bf16.mxu1 %v6235_v52  ;;  %v6294_v50 = vld [vmem:[%s6810_s27 + $0x30] sm:$0xff]   ;;  %s4661_s30 = sshll.u32 %s1631_s19, 2  ;;  %s3854_s19 = sshra.s32 %s3853_s11, 3 }
  0x8d   : >> { %5698 = vmatprep.subr.bf16.mxu0 %v6236_v53  ;;  %5444 = vmatprep.mubr.bf16.mxu1 %v6237_v54  ;;  %v6297_v54 = vld [vmem:[%s6810_s27 + $0x38] sm:$0xff]   ;;  %s6948_s6 = scalar_lea.vmem %s6464_s23, %s4661_s30  ;;  %s4958_s28 = sshll.u32 %s3854_s19, 2 }
  0x8e   : >> { %5700 = vmatprep.mubr.bf16.mxu0 %v6238_v55  ;;  %v6299_v55 = vld [vmem:[%s7187_s1 + $0x178] sm:$0xff]   ;;  %s7026_s18 = scalar_lea.vmem %s6464_s23, %s4958_s28 }
  0x8f   : >> { %5443 = vmatpush3.bf16.msra.mxu1 %v6235_v52  ;;  %v6296_v52 = vld [vmem:[%s7187_s1 + $0x170] sm:$0xff]  }
  0x90   : >> { %5699 = vmatpush3.bf16.msra.mxu0 %v6236_v53  ;;  %5460 = vmatprep.subr.bf16.mxu1 %v6240_v57  ;;  %v6298_v53 = vld [vmem:[%s7187_s1 + $0x370] sm:$0xff]  }
  0x91   : >> { %5716 = vmatprep.subr.bf16.mxu0 %v6242_v58 }
  0x92   : >> { %5445 = vmatmul.mubr.bf16.vlgmr.msra.gmra.mrb[0].mxu1 %v6239_v56  ;;  %v6300_v56 = vld [vmem:[%s7187_s1 + $0x378] sm:$0xff]  }
  0x93   : >> { %5701 = vmatmul.mubr.bf16.vlgmr.msra.gmra.mrb[0].mxu0 %v6241_v59  ;;  %5461 = vmatpush3.bf16.msra.mxu1 %v6240_v57  ;;  %v6301_v57 = vld [vmem:[%s6876_s17] sm:$0xff]   ;;  %v6303_v59 = vld [vmem:[%s6876_s17 + $0x8] sm:$0xff]  }
  0x94   : >> { %5717 = vmatpush3.bf16.msra.mxu0 %v6242_v58  ;;  %5462 = vmatprep.subr.bf16.mxu1 %v6243_v60  ;;  %v6302_v58 = vld [vmem:[%s6882_s25] sm:$0xff]  }
  0x95   : >> { %5718 = vmatprep.subr.bf16.mxu0 %v6244_v61  ;;  %5448 = vmatprep.mubr.bf16.mxu1 %v6245_v62  ;;  %v6305_v62 = vld [vmem:[%s6882_s25 + $0x8] sm:$0xff]  }
  0x96   : >> { %5704 = vmatprep.mubr.bf16.mxu0 %v6246_v63  ;;  %v6307_v63 = vld [vmem:[%s7187_s1 + $0x188] sm:$0xff]  }
  0x97   : >> { %5463 = vmatpush3.bf16.msra.mxu1 %v6243_v60  ;;  %v6304_v60 = vld [vmem:[%s7187_s1 + $0x180] sm:$0xff]  }
  0x98   : >> { %5719 = vmatpush3.bf16.msra.mxu0 %v6244_v61  ;;  %5464 = vmatprep.subr.bf16.mxu1 %v6248_v4  ;;  %v6306_v61 = vld [vmem:[%s7187_s1 + $0x380] sm:$0xff]  }
  0x99   : >> { %5720 = vmatprep.subr.bf16.mxu0 %v6250_v5 }
  0x9a   : >> { %5449 = vmatmul.mubr.bf16.gmra.mrb[4].mxu1 %v6247_v3  ;;  %v6308_v3 = vld [vmem:[%s7187_s1 + $0x388] sm:$0xff]  }
  0x9b   : >> { %5705 = vmatmul.mubr.bf16.gmra.mrb[4].mxu0 %v6249_v6  ;;  %5465 = vmatpush3.bf16.msra.mxu1 %v6248_v4  ;;  %v6309_v4 = vld [vmem:[%s6876_s17 + $0x10] sm:$0xff]   ;;  %v6311_v6 = vld [vmem:[%s6876_s17 + $0x18] sm:$0xff]  }
  0x9c   : >> { %5721 = vmatpush3.bf16.msra.mxu0 %v6250_v5  ;;  %5466 = vmatprep.subr.bf16.mxu1 %v6251_v7  ;;  %v6310_v5 = vld [vmem:[%s6882_s25 + $0x10] sm:$0xff]  }
  0x9d   : >> { %5722 = vmatprep.subr.bf16.mxu0 %v6252_v8  ;;  %5452 = vmatprep.mubr.bf16.mxu1 %v6253_v9  ;;  %v6313_v9 = vld [vmem:[%s6882_s25 + $0x18] sm:$0xff]  }
  0x9e   : >> { %5708 = vmatprep.mubr.bf16.mxu0 %v6254_v10  ;;  %v6315_v10 = vld [vmem:[%s7187_s1 + $0x198] sm:$0xff]  }
  0x9f   : >> { %5467 = vmatpush3.bf16.msra.mxu1 %v6251_v7  ;;  %v6312_v7 = vld [vmem:[%s7187_s1 + $0x190] sm:$0xff]  }
  0xa0   : >> { %5723 = vmatpush3.bf16.msra.mxu0 %v6252_v8  ;;  %5468 = vmatprep.subr.bf16.mxu1 %v6256_v12  ;;  %v6314_v8 = vld [vmem:[%s7187_s1 + $0x390] sm:$0xff]  }
  0xa1   : >> { %5724 = vmatprep.subr.bf16.mxu0 %v6258_v13 }
  0xa2   : >> { %5453 = vmatmul.mubr.bf16.gmra.mrb[8].mxu1 %v6255_v11  ;;  %v6316_v11 = vld [vmem:[%s7187_s1 + $0x398] sm:$0xff]  }
  0xa3   : >> { %5709 = vmatmul.mubr.bf16.gmra.mrb[8].mxu0 %v6257_v14  ;;  %5469 = vmatpush3.bf16.msra.mxu1 %v6256_v12  ;;  %v6317_v12 = vld [vmem:[%s6876_s17 + $0x20] sm:$0xff]   ;;  %v6319_v14 = vld [vmem:[%s6876_s17 + $0x28] sm:$0xff]  }
  0xa4   : >> { %5725 = vmatpush3.bf16.msra.mxu0 %v6258_v13  ;;  %5470 = vmatprep.subr.bf16.mxu1 %v6259_v15  ;;  %v6318_v13 = vld [vmem:[%s6882_s25 + $0x20] sm:$0xff]  }
  0xa5   : >> { %5726 = vmatprep.subr.bf16.mxu0 %v6260_v16  ;;  %5456 = vmatprep.mubr.bf16.mxu1 %v6261_v17  ;;  %v6321_v17 = vld [vmem:[%s6882_s25 + $0x28] sm:$0xff]  }
  0xa6   : >> { %5712 = vmatprep.mubr.bf16.mxu0 %v6262_v18  ;;  %v6323_v18 = vld [vmem:[%s7187_s1 + $0x1a8] sm:$0xff]  }
  0xa7   : >> { %5471 = vmatpush3.bf16.msra.mxu1 %v6259_v15  ;;  %v6320_v15 = vld [vmem:[%s7187_s1 + $0x1a0] sm:$0xff]  }
  0xa8   : >> { %5727 = vmatpush3.bf16.msra.mxu0 %v6260_v16  ;;  %5472 = vmatprep.subr.bf16.mxu1 %v6264_v20  ;;  %v6322_v16 = vld [vmem:[%s7187_s1 + $0x3a0] sm:$0xff]  }
  0xa9   : >> { %5728 = vmatprep.subr.bf16.mxu0 %v6266_v21 }
  0xaa   : >> { %5457 = vmatmul.mubr.bf16.gmra.mrb[12].mxu1 %v6263_v19  ;;  %v6324_v19 = vld [vmem:[%s7187_s1 + $0x3a8] sm:$0xff]  }
  0xab   : >> { %5713 = vmatmul.mubr.bf16.gmra.mrb[12].mxu0 %v6265_v22  ;;  %5473 = vmatpush3.bf16.msra.mxu1 %v6264_v20  ;;  %v6325_v20 = vld [vmem:[%s6876_s17 + $0x30] sm:$0xff]   ;;  %v6327_v22 = vld [vmem:[%s6876_s17 + $0x38] sm:$0xff]   ;;  %s1878_s17 = sshra.s32 %s1877_s8, 3 }
  0xac   : >> { %5729 = vmatpush3.bf16.msra.mxu0 %v6266_v21  ;;  %5474 = vmatprep.subr.bf16.mxu1 %v6267_v23  ;;  %v6326_v21 = vld [vmem:[%s6882_s25 + $0x30] sm:$0xff]   ;;  %s4694_s27 = sshll.u32 %s1878_s17, 2 }
  0xad   : >> { %5730 = vmatprep.subr.bf16.mxu0 %v6268_v24  ;;  %5476 = vmatprep.mubr.bf16.mxu1 %v6269_v25  ;;  %v6329_v25 = vld [vmem:[%s6882_s25 + $0x38] sm:$0xff]   ;;  %s7020_s7 = scalar_lea.vmem %s6464_s23, %s4694_s27 }
  0xae   : >> { %5732 = vmatprep.mubr.bf16.mxu0 %v6270_v26  ;;  %v6331_v26 = vld [vmem:[%s7187_s1 + $0x1b8] sm:$0xff]  }
  0xaf   : >> { %5475 = vmatpush3.bf16.msra.mxu1 %v6267_v23  ;;  %v6328_v23 = vld [vmem:[%s7187_s1 + $0x1b0] sm:$0xff]  }
  0xb0   : >> { %5731 = vmatpush3.bf16.msra.mxu0 %v6268_v24  ;;  %5492 = vmatprep.subr.bf16.mxu1 %v6272_v28  ;;  %v6330_v24 = vld [vmem:[%s7187_s1 + $0x3b0] sm:$0xff]  }
  0xb1   : >> { %5748 = vmatprep.subr.bf16.mxu0 %v6274_v29 }
  0xb2   : >> { %5477 = vmatmul.mubr.bf16.vlgmr.msra.gmra.mrb[0].mxu1 %v6271_v27  ;;  %v6332_v27 = vld [vmem:[%s7187_s1 + $0x3b8] sm:$0xff]  }
  0xb3   : >> { %5733 = vmatmul.mubr.bf16.vlgmr.msra.gmra.mrb[0].mxu0 %v6273_v30  ;;  %5493 = vmatpush3.bf16.msra.mxu1 %v6272_v28  ;;  %v6333_v28 = vld [vmem:[%s6948_s6] sm:$0xff]   ;;  %v6335_v30 = vld [vmem:[%s6948_s6 + $0x8] sm:$0xff]  }
  0xb4   : >> { %5749 = vmatpush3.bf16.msra.mxu0 %v6274_v29  ;;  %5494 = vmatprep.subr.bf16.mxu1 %v6275_v31  ;;  %v6334_v29 = vld [vmem:[%s6954_s21] sm:$0xff]  }
  0xb5   : >> { %5750 = vmatprep.subr.bf16.mxu0 %v6276_v32  ;;  %5480 = vmatprep.mubr.bf16.mxu1 %v6277_v33  ;;  %v6337_v33 = vld [vmem:[%s6954_s21 + $0x8] sm:$0xff]  }
  0xb6   : >> { %5736 = vmatprep.mubr.bf16.mxu0 %v6278_v34  ;;  %v6339_v34 = vld [vmem:[%s7187_s1 + $0x1c8] sm:$0xff]  }
  0xb7   : >> { %5495 = vmatpush3.bf16.msra.mxu1 %v6275_v31  ;;  %v6336_v31 = vld [vmem:[%s7187_s1 + $0x1c0] sm:$0xff]  }
  0xb8   : >> { %5751 = vmatpush3.bf16.msra.mxu0 %v6276_v32  ;;  %5496 = vmatprep.subr.bf16.mxu1 %v6280_v36  ;;  %v6338_v32 = vld [vmem:[%s7187_s1 + $0x3c0] sm:$0xff]  }
  0xb9   : >> { %5752 = vmatprep.subr.bf16.mxu0 %v6282_v37 }
  0xba   : >> { %5481 = vmatmul.mubr.bf16.gmra.mrb[4].mxu1 %v6279_v35  ;;  %v6340_v35 = vld [vmem:[%s7187_s1 + $0x3c8] sm:$0xff]  }
  0xbb   : >> { %5737 = vmatmul.mubr.bf16.gmra.mrb[4].mxu0 %v6281_v38  ;;  %5497 = vmatpush3.bf16.msra.mxu1 %v6280_v36  ;;  %v6341_v36 = vld [vmem:[%s6948_s6 + $0x10] sm:$0xff]   ;;  %v6343_v38 = vld [vmem:[%s6948_s6 + $0x18] sm:$0xff]  }
  0xbc   : >> { %5753 = vmatpush3.bf16.msra.mxu0 %v6282_v37  ;;  %5498 = vmatprep.subr.bf16.mxu1 %v6283_v39  ;;  %v6342_v37 = vld [vmem:[%s6954_s21 + $0x10] sm:$0xff]  }
  0xbd   : >> { %5754 = vmatprep.subr.bf16.mxu0 %v6284_v40  ;;  %5484 = vmatprep.mubr.bf16.mxu1 %v6285_v41  ;;  %v6345_v41 = vld [vmem:[%s6954_s21 + $0x18] sm:$0xff]  }
  0xbe   : >> { %5740 = vmatprep.mubr.bf16.mxu0 %v6286_v42  ;;  %v6347_v42 = vld [vmem:[%s7187_s1 + $0x1d8] sm:$0xff]  }
  0xbf   : >> { %5499 = vmatpush3.bf16.msra.mxu1 %v6283_v39  ;;  %v6344_v39 = vld [vmem:[%s7187_s1 + $0x1d0] sm:$0xff]  }
  0xc0   : >> { %5755 = vmatpush3.bf16.msra.mxu0 %v6284_v40  ;;  %5500 = vmatprep.subr.bf16.mxu1 %v6288_v44  ;;  %v6346_v40 = vld [vmem:[%s7187_s1 + $0x3d0] sm:$0xff]  }
  0xc1   : >> { %5756 = vmatprep.subr.bf16.mxu0 %v6290_v45 }
  0xc2   : >> { %5485 = vmatmul.mubr.bf16.gmra.mrb[8].mxu1 %v6287_v43  ;;  %v6348_v43 = vld [vmem:[%s7187_s1 + $0x3d8] sm:$0xff]  }
  0xc3   : >> { %5741 = vmatmul.mubr.bf16.gmra.mrb[8].mxu0 %v6289_v46  ;;  %5501 = vmatpush3.bf16.msra.mxu1 %v6288_v44  ;;  %v6349_v44 = vld [vmem:[%s6948_s6 + $0x20] sm:$0xff]   ;;  %v6351_v46 = vld [vmem:[%s6948_s6 + $0x28] sm:$0xff]  }
  0xc4   : >> { %5757 = vmatpush3.bf16.msra.mxu0 %v6290_v45  ;;  %5502 = vmatprep.subr.bf16.mxu1 %v6291_v47  ;;  %v6350_v45 = vld [vmem:[%s6954_s21 + $0x20] sm:$0xff]  }
  0xc5   : >> { %5758 = vmatprep.subr.bf16.mxu0 %v6292_v48  ;;  %5488 = vmatprep.mubr.bf16.mxu1 %v6293_v49  ;;  %v6353_v49 = vld [vmem:[%s6954_s21 + $0x28] sm:$0xff]  }
  0xc6   : >> { %5744 = vmatprep.mubr.bf16.mxu0 %v6294_v50  ;;  %v6355_v50 = vld [vmem:[%s7187_s1 + $0x1e8] sm:$0xff]  }
  0xc7   : >> { %5503 = vmatpush3.bf16.msra.mxu1 %v6291_v47  ;;  %v6352_v47 = vld [vmem:[%s7187_s1 + $0x1e0] sm:$0xff]  }
  0xc8   : >> { %5759 = vmatpush3.bf16.msra.mxu0 %v6292_v48  ;;  %5504 = vmatprep.subr.bf16.mxu1 %v6296_v52  ;;  %v6354_v48 = vld [vmem:[%s7187_s1 + $0x3e0] sm:$0xff]  }
  0xc9   : >> { %5760 = vmatprep.subr.bf16.mxu0 %v6298_v53 }
  0xca   : >> { %5489 = vmatmul.mubr.bf16.gmra.mrb[12].mxu1 %v6295_v51  ;;  %v6356_v51 = vld [vmem:[%s7187_s1 + $0x3e8] sm:$0xff]  }
  0xcb   : >> { %5745 = vmatmul.mubr.bf16.gmra.mrb[12].mxu0 %v6297_v54  ;;  %5505 = vmatpush3.bf16.msra.mxu1 %v6296_v52  ;;  %v6357_v52 = vld [vmem:[%s6948_s6 + $0x30] sm:$0xff]   ;;  %v6359_v54 = vld [vmem:[%s6948_s6 + $0x38] sm:$0xff]  }
  0xcc   : >> { %5761 = vmatpush3.bf16.msra.mxu0 %v6298_v53  ;;  %5506 = vmatprep.subr.bf16.mxu1 %v6299_v55  ;;  %v6358_v53 = vld [vmem:[%s6954_s21 + $0x30] sm:$0xff]  }
  0xcd   : >> { %5762 = vmatprep.subr.bf16.mxu0 %v6300_v56  ;;  %5508 = vmatprep.mubr.bf16.mxu1 %v6301_v57  ;;  %v6361_v57 = vld [vmem:[%s6954_s21 + $0x38] sm:$0xff]   ;;  %s7063_s21 = scalar_lea.vmem [#allocation2], %s6491_s4  ;;  %s7110_s4 = smov (%p175_p4), 0  }
  0xce   : >> { %5764 = vmatprep.mubr.bf16.mxu0 %v6302_v58  ;;  %v6363_v58 = vld [vmem:[%s7187_s1 + $0x1f8] sm:$0xff]  }
  0xcf   : >> { %5507 = vmatpush3.bf16.msra.mxu1 %v6299_v55  ;;  %v6360_v55 = vld [vmem:[%s7187_s1 + $0x1f0] sm:$0xff]  }
  0xd0   : >> { %5763 = vmatpush3.bf16.msra.mxu0 %v6300_v56  ;;  %5524 = vmatprep.subr.bf16.mxu1 %v6304_v60  ;;  %v6362_v56 = vld [vmem:[%s7187_s1 + $0x3f0] sm:$0xff]  }
  0xd1   : >> { %5780 = vmatprep.subr.bf16.mxu0 %v6306_v61 }
  0xd2   : >> { %5509 = vmatmul.mubr.bf16.vlgmr.msra.gmra.mrb[0].mxu1 %v6303_v59  ;;  %v6364_v59 = vld [vmem:[%s7187_s1 + $0x3f8] sm:$0xff]  }
  0xd3   : >> { %5765 = vmatmul.mubr.bf16.vlgmr.msra.gmra.mrb[0].mxu0 %v6305_v62  ;;  %5525 = vmatpush3.bf16.msra.mxu1 %v6304_v60  ;;  %v6365_v60 = vld [vmem:[%s7020_s7] sm:$0xff]   ;;  %v6367_v62 = vld [vmem:[%s7020_s7 + $0x8] sm:$0xff]  }
  0xd4   : >> { %5781 = vmatpush3.bf16.msra.mxu0 %v6306_v61  ;;  %5526 = vmatprep.subr.bf16.mxu1 %v6307_v63  ;;  %v6366_v61 = vld [vmem:[%s7026_s18] sm:$0xff]  }
  0xd5   : >> { %5782 = vmatprep.subr.bf16.mxu0 %v6308_v3  ;;  %5512 = vmatprep.mubr.bf16.mxu1 %v6309_v4  ;;  %v6370_v4 = vld [vmem:[%s7026_s18 + $0x10] sm:$0xff]  }
  0xd6   : >> { %5768 = vmatprep.mubr.bf16.mxu0 %v6310_v5  ;;  %v6371_v5 = vld [vmem:[%s7020_s7 + $0x18] sm:$0xff]  }
  0xd7   : >> { %5527 = vmatpush3.bf16.msra.mxu1 %v6307_v63  ;;  %v6368_v63 = vld [vmem:[%s7026_s18 + $0x8] sm:$0xff]  }
  0xd8   : >> { %5783 = vmatpush3.bf16.msra.mxu0 %v6308_v3  ;;  %5528 = vmatprep.subr.bf16.mxu1 %v6312_v7  ;;  %v6369_v3 = vld [vmem:[%s7020_s7 + $0x10] sm:$0xff]  }
  0xd9   : >> { %5784 = vmatprep.subr.bf16.mxu0 %v6314_v8 }
  0xda   : >> { %5513 = vmatmul.mubr.bf16.gmra.mrb[4].mxu1 %v6311_v6  ;;  %v6372_v6 = vld [vmem:[%s7026_s18 + $0x18] sm:$0xff]  }
  0xdb   : >> { %5769 = vmatmul.mubr.bf16.gmra.mrb[4].mxu0 %v6313_v9  ;;  %5529 = vmatpush3.bf16.msra.mxu1 %v6312_v7  ;;  %v6373_v7 = vld [vmem:[%s7020_s7 + $0x20] sm:$0xff]   ;;  %v6375_v9 = vld [vmem:[%s7020_s7 + $0x28] sm:$0xff]  }
  0xdc   : >> { %5785 = vmatpush3.bf16.msra.mxu0 %v6314_v8  ;;  %5530 = vmatprep.subr.bf16.mxu1 %v6315_v10  ;;  %v6374_v8 = vld [vmem:[%s7026_s18 + $0x20] sm:$0xff]  }
  0xdd   : >> { %5786 = vmatprep.subr.bf16.mxu0 %v6316_v11  ;;  %5516 = vmatprep.mubr.bf16.mxu1 %v6317_v12  ;;  %v6378_v12 = vld [vmem:[%s7026_s18 + $0x30] sm:$0xff]  }
  0xde   : >> { %5772 = vmatprep.mubr.bf16.mxu0 %v6318_v13  ;;  %v6379_v13 = vld [vmem:[%s7020_s7 + $0x38] sm:$0xff]  }
  0xdf   : >> { %5531 = vmatpush3.bf16.msra.mxu1 %v6315_v10  ;;  %v6376_v10 = vld [vmem:[%s7026_s18 + $0x28] sm:$0xff]  }
  0xe0   : >> { %5787 = vmatpush3.bf16.msra.mxu0 %v6316_v11  ;;  %5532 = vmatprep.subr.bf16.mxu1 %v6320_v15  ;;  %v6377_v11 = vld [vmem:[%s7020_s7 + $0x30] sm:$0xff]  }
  0xe1   : >> { %5788 = vmatprep.subr.bf16.mxu0 %v6322_v16 }
  0xe2   : >> { %5517 = vmatmul.mubr.bf16.gmra.mrb[8].mxu1 %v6319_v14  ;;  %v6380_v14 = vld [vmem:[%s7026_s18 + $0x38] sm:$0xff]  }
  0xe3   : >> { %5773 = vmatmul.mubr.bf16.gmra.mrb[8].mxu0 %v6321_v17  ;;  %5533 = vmatpush3.bf16.msra.mxu1 %v6320_v15 }
  0xe4   : >> { %5789 = vmatpush3.bf16.msra.mxu0 %v6322_v16  ;;  %5534 = vmatprep.subr.bf16.mxu1 %v6323_v18 }
  0xe5   : >> { %5790 = vmatprep.subr.bf16.mxu0 %v6324_v19  ;;  %5520 = vmatprep.mubr.bf16.mxu1 %v6325_v20 }
  0xe6   : >> { %5776 = vmatprep.mubr.bf16.mxu0 %v6326_v21 }
  0xe7   : >> { %5535 = vmatpush3.bf16.msra.mxu1 %v6323_v18 }
  0xe8   : >> { %5791 = vmatpush3.bf16.msra.mxu0 %v6324_v19  ;;  %5536 = vmatprep.subr.bf16.mxu1 %v6328_v23 }
  0xe9   : >> { %5792 = vmatprep.subr.bf16.mxu0 %v6330_v24 }
  0xea   : >> { %5521 = vmatmul.mubr.bf16.gmra.mrb[12].mxu1 %v6327_v22 }
  0xeb   : >> { %5777 = vmatmul.mubr.bf16.gmra.mrb[12].mxu0 %v6329_v25  ;;  %5537 = vmatpush3.bf16.msra.mxu1 %v6328_v23 }
  0xec   : >> { %5793 = vmatpush3.bf16.msra.mxu0 %v6330_v24  ;;  %5538 = vmatprep.subr.bf16.mxu1 %v6331_v26 }
  0xed   : >> { %5794 = vmatprep.subr.bf16.mxu0 %v6332_v27  ;;  %5540 = vmatprep.mubr.bf16.mxu1 %v6333_v28 }
  0xee   : >> { %5796 = vmatprep.mubr.bf16.mxu0 %v6334_v29 }
  0xef   : >> { %5539 = vmatpush3.bf16.msra.mxu1 %v6331_v26 }
  0xf0   : >> { %5795 = vmatpush3.bf16.msra.mxu0 %v6332_v27  ;;  %5556 = vmatprep.subr.bf16.mxu1 %v6336_v31 }
  0xf1   : >> { %5812 = vmatprep.subr.bf16.mxu0 %v6338_v32 }
  0xf2   : >> { %5541 = vmatmul.mubr.bf16.vlgmr.msra.gmra.mrb[0].mxu1 %v6335_v30 }
  0xf3   : >> { %5797 = vmatmul.mubr.bf16.vlgmr.msra.gmra.mrb[0].mxu0 %v6337_v33  ;;  %5557 = vmatpush3.bf16.msra.mxu1 %v6336_v31 }
  0xf4   : >> { %5813 = vmatpush3.bf16.msra.mxu0 %v6338_v32  ;;  %5558 = vmatprep.subr.bf16.mxu1 %v6339_v34 }
  0xf5   : >> { %5814 = vmatprep.subr.bf16.mxu0 %v6340_v35  ;;  %5544 = vmatprep.mubr.bf16.mxu1 %v6341_v36 }
  0xf6   : >> { %5800 = vmatprep.mubr.bf16.mxu0 %v6342_v37 }
  0xf7   : >> { %5559 = vmatpush3.bf16.msra.mxu1 %v6339_v34 }
  0xf8   : >> { %5815 = vmatpush3.bf16.msra.mxu0 %v6340_v35  ;;  %5560 = vmatprep.subr.bf16.mxu1 %v6344_v39 }
  0xf9   : >> { %5816 = vmatprep.subr.bf16.mxu0 %v6346_v40 }
  0xfa   : >> { %5545 = vmatmul.mubr.bf16.gmra.mrb[4].mxu1 %v6343_v38 }
  0xfb   : >> { %5801 = vmatmul.mubr.bf16.gmra.mrb[4].mxu0 %v6345_v41  ;;  %5561 = vmatpush3.bf16.msra.mxu1 %v6344_v39 }
  0xfc   : >> { %5817 = vmatpush3.bf16.msra.mxu0 %v6346_v40  ;;  %5562 = vmatprep.subr.bf16.mxu1 %v6347_v42 }
  0xfd   : >> { %5818 = vmatprep.subr.bf16.mxu0 %v6348_v43  ;;  %5548 = vmatprep.mubr.bf16.mxu1 %v6349_v44 }
  0xfe   : >> { %5804 = vmatprep.mubr.bf16.mxu0 %v6350_v45 }
  0xff   : >> { %5563 = vmatpush3.bf16.msra.mxu1 %v6347_v42 }
 0x100   : >> { %5819 = vmatpush3.bf16.msra.mxu0 %v6348_v43  ;;  %5564 = vmatprep.subr.bf16.mxu1 %v6352_v47 }
 0x101   : >> { %5820 = vmatprep.subr.bf16.mxu0 %v6354_v48 }
 0x102   : >> { %5549 = vmatmul.mubr.bf16.gmra.mrb[8].mxu1 %v6351_v46 }
 0x103   : >> { %5805 = vmatmul.mubr.bf16.gmra.mrb[8].mxu0 %v6353_v49  ;;  %5565 = vmatpush3.bf16.msra.mxu1 %v6352_v47 }
 0x104   : >> { %5821 = vmatpush3.bf16.msra.mxu0 %v6354_v48  ;;  %5566 = vmatprep.subr.bf16.mxu1 %v6355_v50 }
 0x105   : >> { %5822 = vmatprep.subr.bf16.mxu0 %v6356_v51  ;;  %5552 = vmatprep.mubr.bf16.mxu1 %v6357_v52 }
 0x106   : >> { %5808 = vmatprep.mubr.bf16.mxu0 %v6358_v53 }
 0x107   : >> { %5567 = vmatpush3.bf16.msra.mxu1 %v6355_v50 }
 0x108   : >> { %5823 = vmatpush3.bf16.msra.mxu0 %v6356_v51  ;;  %5568 = vmatprep.subr.bf16.mxu1 %v6360_v55 }
 0x109   : >> { %5824 = vmatprep.subr.bf16.mxu0 %v6362_v56 }
 0x10a   : >> { %5553 = vmatmul.mubr.bf16.gmra.mrb[12].mxu1 %v6359_v54 }
 0x10b   : >> { %5809 = vmatmul.mubr.bf16.gmra.mrb[12].mxu0 %v6361_v57  ;;  %5569 = vmatpush3.bf16.msra.mxu1 %v6360_v55 }
 0x10c   : >> { %5825 = vmatpush3.bf16.msra.mxu0 %v6362_v56  ;;  %5570 = vmatprep.subr.bf16.mxu1 %v6363_v58 }
 0x10d   : >> { %5826 = vmatprep.subr.bf16.mxu0 %v6364_v59  ;;  %5572 = vmatprep.mubr.bf16.mxu1 %v6365_v60 }
 0x10e   : >> { %5828 = vmatprep.mubr.bf16.mxu0 %v6366_v61 }
 0x10f   : >> { %5571 = vmatpush3.bf16.msra.mxu1 %v6363_v58 }
 0x110   : >> { %5827 = vmatpush3.bf16.msra.mxu0 %v6364_v59 }
 0x112   : >> { %5573 = vmatmul.mubr.bf16.vlgmr.msra.gmra.mrb[0].mxu1 %v6367_v62 }
 0x113   : >> { %5829 = vmatmul.mubr.bf16.vlgmr.msra.gmra.mrb[0].mxu0 %v6368_v63  ;;  %5576 = vmatprep.mubr.bf16.mxu1 %v6369_v3 }
 0x114   : >> { %5832 = vmatprep.mubr.bf16.mxu0 %v6370_v4 }
 0x11a   : >> { %5577 = vmatmul.mubr.bf16.gmra.mrb[4].mxu1 %v6371_v5 }
 0x11b   : >> { %5833 = vmatmul.mubr.bf16.gmra.mrb[4].mxu0 %v6372_v6  ;;  %5580 = vmatprep.mubr.bf16.mxu1 %v6373_v7 }
 0x11c   : >> { %5836 = vmatprep.mubr.bf16.mxu0 %v6374_v8 }
 0x122   : >> { %5581 = vmatmul.mubr.bf16.gmra.mrb[8].mxu1 %v6375_v9 }
 0x123   : >> { %5837 = vmatmul.mubr.bf16.gmra.mrb[8].mxu0 %v6376_v10  ;;  %5584 = vmatprep.mubr.bf16.mxu1 %v6377_v11 }
 0x124   : >> { %5840 = vmatprep.mubr.bf16.mxu0 %v6378_v12 }
 0x12a   : >> { %5585 = vmatmul.mubr.bf16.gmra.mrb[12].mxu1 %v6379_v13 }
 0x12b   : >> { %5841 = vmatmul.mubr.bf16.gmra.mrb[12].mxu0 %v6380_v14 }
 0x1e5   : >> { %v5574_v15 = vpop.f32.mrb[0].mxu1 }
 0x1e6   : >> { %v5830_v16 = vpop.f32.mrb[0].mxu0  ;;  %v2045_v17 = vpop.f32.mrb[1].mxu1 }
 0x1e7   : >> { %v5844_v18 = vadd.f32 %v5830_v16, %v5574_v15  ;;  %v4021_v19 = vpop.f32.mrb[1].mxu0  ;;  %v5575_v20 = vpop.f32.mrb[2].mxu1 }
 0x1e8   : >> { %v5845_v21 = vadd.f32 %v4021_v19, %v2045_v17  ;;  %v5831_v22 = vpop.f32.mrb[2].mxu0  ;;  %v2048_v23 = vpop.f32.mrb[3].mxu1 }
 0x1e9   : >> { %v4108_v24 = vadd.f32 %v5844_v18, %v6454_v0  ;;  %v5846_v25 = vadd.f32 %v5831_v22, %v5575_v20  ;;  %v4024_v26 = vpop.f32.mrb[3].mxu0 }
 0x1ea   : >> { %v4106_v27 = vadd.f32 %v5845_v21, %v6454_v0  ;;  %v5847_v28 = vadd.f32 %v4024_v26, %v2048_v23 }
 0x1eb   : >> { %4125 = vst [vmem:[%s7063_s21 + $0x10] sm:$0xff] %v4108_v24  ;;  %v4109_v29 = vadd.f32 %v5846_v25, %v6454_v0  ;;  %v4163_v40 = vmul.f32 %v4108_v24, %v4108_v24 }
 0x1ec   : >> { %4123 = vst [vmem:[%s7063_s21] sm:$0xff] %v4106_v27  ;;  %v4107_v30 = vadd.f32 %v5847_v28, %v6454_v0  ;;  %v4161_v32 = vmul.f32 %v4106_v27, %v4106_v27 }
 0x1ed   : >> { %4126 = vst [vmem:[%s7063_s21 + $0x18] sm:$0xff] %v4109_v29  ;;  %v5578_v31 = vpop.f32.mrb[4].mxu1  ;;  %v4164_v46 = vmul.f32 %v4109_v29, %v4109_v29 }
 0x1ee   : >> { %4124 = vst [vmem:[%s7063_s21 + $0x8] sm:$0xff] %v4107_v30  ;;  %v4139_v33 = vadd.f32 %v4107_v30, %v4106_v27  ;;  %v4162_v34 = vmul.f32 %v4107_v30, %v4107_v30  ;;  %v5834_v35 = vpop.f32.mrb[4].mxu0  ;;  %v2061_v36 = vpop.f32.mrb[5].mxu1 }
 0x1ef   : >> { %v5848_v37 = vadd.f32 %v5834_v35, %v5578_v31  ;;  %v4037_v38 = vpop.f32.mrb[5].mxu0  ;;  %v5579_v39 = vpop.f32.mrb[6].mxu1 }
 0x1f0   : >> { %v4140_v41 = vadd.f32 %v4139_v33, %v4108_v24  ;;  %v4177_v42 = vadd.f32 %v4162_v34, %v4161_v32  ;;  %v5849_v43 = vadd.f32 %v4037_v38, %v2061_v36  ;;  %v5835_v44 = vpop.f32.mrb[6].mxu0  ;;  %v2064_v45 = vpop.f32.mrb[7].mxu1 }
 0x1f1   : >> { %v4112_v47 = vadd.f32 %v5848_v37, %v6454_v0  ;;  %v5850_v48 = vadd.f32 %v5835_v44, %v5579_v39  ;;  %v4040_v49 = vpop.f32.mrb[7].mxu0 }
 0x1f2   : >> { %v4178_v50 = vadd.f32 %v4177_v42, %v4163_v40  ;;  %v4110_v51 = vadd.f32 %v5849_v43, %v6454_v0  ;;  %v4141_v52 = vadd.f32 %v4140_v41, %v4109_v29  ;;  %v5851_v53 = vadd.f32 %v4040_v49, %v2064_v45 }
 0x1f3   : >> { %4129 = vst [vmem:[%s7063_s21 + $0x30] sm:$0xff] %v4112_v47  ;;  %v4113_v54 = vadd.f32 %v5850_v48, %v6454_v0  ;;  %v4167_v7 = vmul.f32 %v4112_v47, %v4112_v47 }
 0x1f4   : >> { %4127 = vst [vmem:[%s7063_s21 + $0x20] sm:$0xff] %v4110_v51  ;;  %v4142_v55 = vadd.f32 %v4141_v52, %v4110_v51  ;;  %v4165_v56 = vmul.f32 %v4110_v51, %v4110_v51  ;;  %v4179_v57 = vadd.f32 %v4178_v50, %v4164_v46  ;;  %v4111_v58 = vadd.f32 %v5851_v53, %v6454_v0 }
 0x1f5   : >> { %4130 = vst [vmem:[%s7063_s21 + $0x38] sm:$0xff] %v4113_v54  ;;  %v5582_v59 = vpop.f32.mrb[8].mxu1  ;;  %v4168_v13 = vmul.f32 %v4113_v54, %v4113_v54 }
 0x1f6   : >> { %v4180_v60 = vadd.f32 %v4179_v57, %v4165_v56  ;;  %4128 = vst [vmem:[%s7063_s21 + $0x28] sm:$0xff] %v4111_v58  ;;  %v4143_v61 = vadd.f32 %v4142_v55, %v4111_v58  ;;  %v4166_v62 = vmul.f32 %v4111_v58, %v4111_v58  ;;  %v5838_v63 = vpop.f32.mrb[8].mxu0  ;;  %v2077_v3 = vpop.f32.mrb[9].mxu1 }
 0x1f7   : >> { %v5852_v4 = vadd.f32 %v5838_v63, %v5582_v59  ;;  %v4053_v5 = vpop.f32.mrb[9].mxu0  ;;  %v5583_v6 = vpop.f32.mrb[10].mxu1 }
 0x1f8   : >> { %v4144_v8 = vadd.f32 %v4143_v61, %v4112_v47  ;;  %v4181_v9 = vadd.f32 %v4180_v60, %v4166_v62  ;;  %v5853_v10 = vadd.f32 %v4053_v5, %v2077_v3  ;;  %v5839_v11 = vpop.f32.mrb[10].mxu0  ;;  %v2080_v12 = vpop.f32.mrb[11].mxu1 }
 0x1f9   : >> { %v4116_v14 = vadd.f32 %v5852_v4, %v6454_v0  ;;  %v5854_v15 = vadd.f32 %v5839_v11, %v5583_v6  ;;  %v4056_v16 = vpop.f32.mrb[11].mxu0 }
 0x1fa   : >> { %v4182_v17 = vadd.f32 %v4181_v9, %v4167_v7  ;;  %v4114_v18 = vadd.f32 %v5853_v10, %v6454_v0  ;;  %v4145_v19 = vadd.f32 %v4144_v8, %v4113_v54  ;;  %v5855_v20 = vadd.f32 %v4056_v16, %v2080_v12 }
 0x1fb   : >> { %4133 = vst [vmem:[%s7063_s21 + $0x50] sm:$0xff] %v4116_v14  ;;  %v4117_v21 = vadd.f32 %v5854_v15, %v6454_v0  ;;  %v4171_v35 = vmul.f32 %v4116_v14, %v4116_v14 }
 0x1fc   : >> { %4131 = vst [vmem:[%s7063_s21 + $0x40] sm:$0xff] %v4114_v18  ;;  %v4146_v22 = vadd.f32 %v4145_v19, %v4114_v18  ;;  %v4169_v23 = vmul.f32 %v4114_v18, %v4114_v18  ;;  %v4183_v24 = vadd.f32 %v4182_v17, %v4168_v13  ;;  %v4115_v25 = vadd.f32 %v5855_v20, %v6454_v0 }
 0x1fd   : >> { %4134 = vst [vmem:[%s7063_s21 + $0x58] sm:$0xff] %v4117_v21  ;;  %v5586_v26 = vpop.f32.mrb[12].mxu1  ;;  %v4172_v41 = vmul.f32 %v4117_v21, %v4117_v21 }
 0x1fe   : >> { %v4184_v27 = vadd.f32 %v4183_v24, %v4169_v23  ;;  %4132 = vst [vmem:[%s7063_s21 + $0x48] sm:$0xff] %v4115_v25  ;;  %v4147_v28 = vadd.f32 %v4146_v22, %v4115_v25  ;;  %v4170_v29 = vmul.f32 %v4115_v25, %v4115_v25  ;;  %v5842_v30 = vpop.f32.mrb[12].mxu0  ;;  %v2093_v31 = vpop.f32.mrb[13].mxu1 }
 0x1ff   : >> { %v5856_v32 = vadd.f32 %v5842_v30, %v5586_v26  ;;  %v4069_v33 = vpop.f32.mrb[13].mxu0  ;;  %v5587_v34 = vpop.f32.mrb[14].mxu1 }
 0x200   : >> { %v4148_v36 = vadd.f32 %v4147_v28, %v4116_v14  ;;  %v4185_v37 = vadd.f32 %v4184_v27, %v4170_v29  ;;  %v5857_v38 = vadd.f32 %v4069_v33, %v2093_v31  ;;  %v5843_v39 = vpop.f32.mrb[14].mxu0  ;;  %v2096_v40 = vpop.f32.mrb[15].mxu1 }
 0x201   : >> { %v4120_v42 = vadd.f32 %v5856_v32, %v6454_v0  ;;  %v5858_v43 = vadd.f32 %v5843_v39, %v5587_v34  ;;  %v4072_v44 = vpop.f32.mrb[15].mxu0 }
 0x202   : >> { %v4186_v45 = vadd.f32 %v4185_v37, %v4171_v35  ;;  %v4118_v46 = vadd.f32 %v5857_v38, %v6454_v0  ;;  %v4149_v47 = vadd.f32 %v4148_v36, %v4117_v21  ;;  %v5859_v48 = vadd.f32 %v4072_v44, %v2096_v40 }
 0x203   : >> { %4137 = vst [vmem:[%s7063_s21 + $0x70] sm:$0xff] %v4120_v42  ;;  %v4121_v49 = vadd.f32 %v5858_v43, %v6454_v0  ;;  %v4175_v57 = vmul.f32 %v4120_v42, %v4120_v42 }
 0x204   : >> { %4135 = vst [vmem:[%s7063_s21 + $0x60] sm:$0xff] %v4118_v46  ;;  %v4150_v50 = vadd.f32 %v4149_v47, %v4118_v46  ;;  %v4173_v51 = vmul.f32 %v4118_v46, %v4118_v46  ;;  %v4187_v52 = vadd.f32 %v4186_v45, %v4172_v41  ;;  %v4119_v53 = vadd.f32 %v5859_v48, %v6454_v0 }
 0x205   : >> { %4138 = vst [vmem:[%s7063_s21 + $0x78] sm:$0xff] %v4121_v49  ;;  %v4176_v60 = vmul.f32 %v4121_v49, %v4121_v49 }
 0x206   : >> { %v4188_v54 = vadd.f32 %v4187_v52, %v4173_v51  ;;  %4136 = vst [vmem:[%s7063_s21 + $0x68] sm:$0xff] %v4119_v53  ;;  %v4151_v55 = vadd.f32 %v4150_v50, %v4119_v53  ;;  %v4174_v56 = vmul.f32 %v4119_v53, %v4119_v53 }
 0x208   : >> { %v4152_v58 = vadd.f32 %v4151_v55, %v4120_v42  ;;  %v4189_v59 = vadd.f32 %v4188_v54, %v4174_v56 }
 0x20a   : >> { %v4153_v61 = vadd.f32 %v4152_v58, %v4121_v49  ;;  %v4190_v62 = vadd.f32 %v4189_v59, %v4175_v57 }
 0x20c   : >> { %v4154_v63 = vrot.slane %v4153_v61, 4  ;;  %v4191_v3 = vadd.f32 %v4190_v62, %v4176_v60 }
 0x20e   : >> { %v4155_v4 = vadd.f32 %v4154_v63, %v4153_v61  ;;  %v4192_v5 = vrot.slane %v4191_v3, 4 }
 0x210   : >> { %v4156_v6 = vrot.slane %v4155_v4, 2  ;;  %v4193_v7 = vadd.f32 %v4192_v5, %v4191_v3 }
 0x212   : >> { %v4157_v8 = vadd.f32 %v4156_v6, %v4155_v4  ;;  %v4194_v9 = vrot.slane %v4193_v7, 2 }
 0x214   : >> { %v4158_v10 = vrot.slane %v4157_v8, 1  ;;  %v4195_v11 = vadd.f32 %v4194_v9, %v4193_v7 }
 0x216   : >> { %v4159_v12 = vadd.f32 %v4158_v10, %v4157_v8  ;;  %v4196_v13 = vrot.slane %v4195_v11, 1  ;;  %177 = sbr.rel (!%p175_p4) target bundleno = 17 (0x11), region = 110 }
 0x218   : >> { %v4160_v14 = vadd.f32 %v6413_v2, %v4159_v12   ;;  %v4197_v15 = vadd.f32 %v4196_v13, %v4195_v11 }
 0x21a   : >> { %v4198_v16 = vadd.f32 %v6409_v1, %v4197_v15   ;;  %v7191_v2 = vmov %v4160_v14  ;;  %v7104_v17 = vmul.f32 (%p175_p4), 0.00390625, %v4160_v14 }
 0x21c   : >> { %v7190_v1 = vmov %v4198_v16  ;;  %v4200_v18 = vmul.f32 (%p175_p4), 0.00390625, %v4198_v16  ;;  %v4201_v19 = vmul.f32 (%p175_p4), %v7104_v17, %v7104_v17 }
 0x21e   : > { %v4202_v2 = vsub.f32 %v4200_v18, %v4201_v19 }
 0x220   : > { %v4203_v20 = vadd.f32 1e-05, %v4202_v2 }
 0x222   : > { %6381 = vrsqrt.f32 %v4203_v20 }
 0x22c   : > { %v7108_v21 = vpop.eup %6381 }
 0x22d LB: >> { %s4992_s24 = sshll.u32 %s6421_s4, 7  ;;  %s4210_s4 = sadd.s32 1, %s6421_s4   ;;  %s6421_s4 = sphi %s7110_s4, %s4210_s4  }
 0x22e   : >> { %s7116_s23 = scalar_lea.vmem [#allocation2], %s4992_s24  ;;  %s7120_s19 = sshra.s32 %s4992_s24, 3 }
 0x22f   : >> { %v4213_v0 = vld [vmem:[%s7116_s23] sm:$0xff]  ;;  %v4214_v1 = vld [vmem:[%s7116_s23 + $0x8] sm:$0xff]  ;;  %v4215_v22 = vld [vmem:[%s7116_s23 + $0x10] sm:$0xff]  ;;  %s5009_s25 = sshll.u32 %s7120_s19, 2  ;;  %p4207_p5 = scmp.ge.s32.totalorder %s4210_s4, 2  }
 0x230   : >> { %v4229_v23 = vsub.f32 %v4213_v0, %v7104_v17  ;;  %v4230_v24 = vsub.f32 %v4214_v1, %v7104_v17  ;;  %v4216_v25 = vld [vmem:[%s7116_s23 + $0x18] sm:$0xff]  ;;  %v4231_v26 = vsub.f32 %v4215_v22, %v7104_v17  ;;  %v4217_v27 = vld [vmem:[%s7116_s23 + $0x20] sm:$0xff]  ;;  %v4218_v28 = vld [vmem:[%s7116_s23 + $0x28] sm:$0xff]  ;;  %s7148_s22 = scalar_lea.vmem %s6459_s20, %s5009_s25 }
 0x231   : >> { %v4232_v29 = vsub.f32 %v4216_v25, %v7104_v17  ;;  %v4233_v30 = vsub.f32 %v4217_v27, %v7104_v17  ;;  %v4234_v31 = vsub.f32 %v4218_v28, %v7104_v17  ;;  %v4219_v32 = vld [vmem:[%s7116_s23 + $0x30] sm:$0xff]  ;;  %v4220_v33 = vld [vmem:[%s7116_s23 + $0x38] sm:$0xff]  ;;  %v4221_v42 = vld [vmem:[%s7116_s23 + $0x40] sm:$0xff] }
 0x232   : >> { %v4245_v34 = vmul.f32 %v7108_v21, %v4229_v23  ;;  %v4246_v35 = vmul.f32 %v7108_v21, %v4230_v24  ;;  %v4247_v36 = vmul.f32 %v7108_v21, %v4231_v26  ;;  %v4235_v37 = vsub.f32 %v4219_v32, %v7104_v17  ;;  %v4222_v43 = vld [vmem:[%s7116_s23 + $0x48] sm:$0xff]  ;;  %v4223_v48 = vld [vmem:[%s7116_s23 + $0x50] sm:$0xff]  ;;  %v4224_v53 = vld [vmem:[%s7116_s23 + $0x58] sm:$0xff] }
 0x233   : >> { %v4248_v38 = vmul.f32 %v7108_v21, %v4232_v29  ;;  %v4249_v39 = vmul.f32 %v7108_v21, %v4233_v30  ;;  %v4250_v40 = vmul.f32 %v7108_v21, %v4234_v31  ;;  %v4236_v41 = vsub.f32 %v4220_v33, %v7104_v17  ;;  %v4225_v54 = vld [vmem:[%s7116_s23 + $0x60] sm:$0xff]  ;;  %v4226_v59 = vld [vmem:[%s7116_s23 + $0x68] sm:$0xff]  ;;  %v4227_v60 = vld [vmem:[%s7116_s23 + $0x70] sm:$0xff] }
 0x234   : >> { %v4261_v44 = vmax.f32 %v4245_v34, 0.0  ;;  %v4262_v45 = vmax.f32 %v4246_v35, 0.0  ;;  %v4263_v46 = vmax.f32 %v4247_v36, 0.0  ;;  %v4251_v47 = vmul.f32 %v7108_v21, %v4235_v37  ;;  %v4228_v8 = vld [vmem:[%s7116_s23 + $0x78] sm:$0xff] }
 0x235   : >> { %v4264_v49 = vmax.f32 %v4248_v38, 0.0  ;;  %v4265_v50 = vmax.f32 %v4249_v39, 0.0  ;;  %v4266_v51 = vmax.f32 %v4250_v40, 0.0  ;;  %v4252_v52 = vmul.f32 %v7108_v21, %v4236_v41 }
 0x236   : >> { %v5032_v55 = vpack.c.bf16 %v4262_v45, %v4261_v44  ;;  %v4267_v56 = vmax.f32 %v4251_v47, 0.0  ;;  %v4237_v57 = vsub.f32 %v4221_v42, %v7104_v17  ;;  %v4238_v58 = vsub.f32 %v4222_v43, %v7104_v17 }
 0x237   : >> { %v5037_v61 = vpack.c.bf16 %v4264_v49, %v4263_v46  ;;  %v5042_v62 = vpack.c.bf16 %v4266_v51, %v4265_v50  ;;  %v4268_v63 = vmax.f32 %v4252_v52, 0.0  ;;  %v4239_v3 = vsub.f32 %v4223_v48, %v7104_v17 }
 0x238   : >> { %5033 = vst [vmem:[%s7148_s22] sm:$0xff] %v5032_v55   ;;  %v4253_v4 = vmul.f32 %v7108_v21, %v4237_v57  ;;  %v4254_v5 = vmul.f32 %v7108_v21, %v4238_v58  ;;  %v4240_v6 = vsub.f32 %v4224_v53, %v7104_v17  ;;  %v4241_v7 = vsub.f32 %v4225_v54, %v7104_v17 }
 0x239   : >> { %5069 = vst [vmem:[%s7148_s22 + $0x8] sm:$0xff] %v5037_v61   ;;  %5070 = vst [vmem:[%s7148_s22 + $0x10] sm:$0xff] %v5042_v62   ;;  %v5047_v9 = vpack.c.bf16 %v4268_v63, %v4267_v56  ;;  %v4255_v10 = vmul.f32 %v7108_v21, %v4239_v3  ;;  %v4242_v11 = vsub.f32 %v4226_v59, %v7104_v17 }
 0x23a   : >> { %v4243_v12 = vsub.f32 %v4227_v60, %v7104_v17  ;;  %v4269_v13 = vmax.f32 %v4253_v4, 0.0  ;;  %v4270_v14 = vmax.f32 %v4254_v5, 0.0  ;;  %v4256_v15 = vmul.f32 %v7108_v21, %v4240_v6 }
 0x23b   : >> { %v4257_v16 = vmul.f32 %v7108_v21, %v4241_v7  ;;  %5071 = vst [vmem:[%s7148_s22 + $0x18] sm:$0xff] %v5047_v9   ;;  %v4271_v18 = vmax.f32 %v4255_v10, 0.0  ;;  %v4258_v19 = vmul.f32 %v7108_v21, %v4242_v11  ;;  %v4244_v2 = vsub.f32 %v4228_v8, %v7104_v17 }
 0x23c   : >> { %v4259_v20 = vmul.f32 %v7108_v21, %v4243_v12  ;;  %v5052_v0 = vpack.c.bf16 %v4270_v14, %v4269_v13  ;;  %v4272_v1 = vmax.f32 %v4256_v15, 0.0 }
 0x23d   : >> { %v4273_v22 = vmax.f32 %v4257_v16, 0.0  ;;  %v4274_v23 = vmax.f32 %v4258_v19, 0.0  ;;  %v4260_v24 = vmul.f32 %v7108_v21, %v4244_v2  ;;  %4209 = sbr.rel (!%p4207_p5) target bundleno = 557 (0x22d), region = 121 }
 0x23e   : >> { %v4275_v25 = vmax.f32 %v4259_v20, 0.0  ;;  %5072 = vst [vmem:[%s7148_s22 + $0x20] sm:$0xff] %v5052_v0   ;;  %v5057_v26 = vpack.c.bf16 %v4272_v1, %v4271_v18 }
 0x23f   : >> { %v5062_v27 = vpack.c.bf16 %v4274_v23, %v4273_v22  ;;  %v4276_v28 = vmax.f32 %v4260_v24, 0.0 }
 0x240   : >> { %5073 = vst [vmem:[%s7148_s22 + $0x28] sm:$0xff] %v5057_v26  }
 0x241   : >> { %5074 = vst [vmem:[%s7148_s22 + $0x30] sm:$0xff] %v5062_v27   ;;  %v5067_v29 = vpack.c.bf16 %v4276_v28, %v4275_v25 }
 0x243   : >> { %5075 = vst [vmem:[%s7148_s22 + $0x38] sm:$0xff] %v5067_v29  }
 0x244 PF: > { %s13_s12 = sadd.s32 1, %s6405_s12  }
 0x245   : > { %p10_p6 = scmp.ge.s32.totalorder %s13_s12, 4  }
 0x247   :  { %12 = sbr.rel (!%p10_p6) target bundleno = 1 (0x1), region = 132 }

// kernel: content_discriminator_forward.5
= control target key start
LH: loop header
LB: loop body
LE: loop exit
PB: predicated region body
PF: predicated region fallthrough
CT: control target
= control target key end

     0   :  { %s7117_s1 = inlined_call_operand.vmem [shape: bf16[16,128,128], index: 1, kind: input, shape index: {}]   ;;  %s7118_s0 = inlined_call_operand.vmem [shape: bf16[16,128,128], index: 0, kind: input, shape index: {}]   ;;  %s7119_s2 = inlined_call_operand.vmem [shape: f32[1,128], index: 2, kind: input, shape index: {}]   ;;  %s7120_s3 = inlined_call_operand.vmem [shape: bf16[2,64,128], index: 3, kind: output, shape index: {}]  }
   0x1   :  { %v5928_v0 = vld [vmem:[%s7117_s1 + $0x40] sm:$0xff]   ;;  %v5930_v2 = vld [vmem:[%s7117_s1 + $0x48] sm:$0xff]   ;;  %v5932_v4 = vld [vmem:[%s7117_s1 + $0x50] sm:$0xff]  }
   0x2   :  { %v5929_v1 = vld [vmem:[%s7117_s1 + $0x200] sm:$0xff]   ;;  %5176 = vmatprep.subr.bf16.mxu1 %v5928_v0  ;;  %v5931_v3 = vld [vmem:[%s7117_s1 + $0x208] sm:$0xff]   ;;  %v5933_v5 = vld [vmem:[%s7117_s1 + $0x210] sm:$0xff]  }
   0x3   :  { %5432 = vmatprep.subr.bf16.mxu0 %v5929_v1  ;;  %5177 = vmatpush3.bf16.msra.mxu1 %v5928_v0  ;;  %v5934_v6 = vld [vmem:[%s7117_s1 + $0x58] sm:$0xff]   ;;  %v5936_v8 = vld [vmem:[%s7117_s1 + $0x60] sm:$0xff]   ;;  %v5938_v10 = vld [vmem:[%s7117_s1 + $0x68] sm:$0xff]  }
   0x4   :  { %5433 = vmatpush3.bf16.msra.mxu0 %v5929_v1  ;;  %5178 = vmatprep.subr.bf16.mxu1 %v5930_v2  ;;  %v5935_v7 = vld [vmem:[%s7117_s1 + $0x218] sm:$0xff]   ;;  %v5937_v9 = vld [vmem:[%s7117_s1 + $0x220] sm:$0xff]   ;;  %v5939_v11 = vld [vmem:[%s7117_s1 + $0x228] sm:$0xff]  }
   0x5   :  { %5434 = vmatprep.subr.bf16.mxu0 %v5931_v3  ;;  %v5944_v12 = vld [vmem:[%s7118_s0 + $0x40] sm:$0xff]   ;;  %v5940_v14 = vld [vmem:[%s7117_s1 + $0x70] sm:$0xff]   ;;  %v5942_v16 = vld [vmem:[%s7117_s1 + $0x78] sm:$0xff]  }
   0x6   :  { %v5945_v13 = vld [vmem:[%s7118_s0 + $0x200] sm:$0xff]   ;;  %5192 = vmatprep.mubr.bf16.mxu1 %v5944_v12  ;;  %v5941_v15 = vld [vmem:[%s7117_s1 + $0x230] sm:$0xff]   ;;  %v5943_v17 = vld [vmem:[%s7117_s1 + $0x238] sm:$0xff]  }
   0x7   :  { %5179 = vmatpush3.bf16.msra.mxu1 %v5930_v2  ;;  %5448 = vmatprep.mubr.bf16.mxu0 %v5945_v13  ;;  %v5946_v18 = vld [vmem:[%s7118_s0 + $0x48] sm:$0xff]   ;;  %v5947_v19 = vld [vmem:[%s7117_s1] sm:$0xff]   ;;  %v5952_v24 = vld [vmem:[%s7118_s0 + $0x50] sm:$0xff]  }
   0x8   :  { %5435 = vmatpush3.bf16.msra.mxu0 %v5931_v3  ;;  %5180 = vmatprep.subr.bf16.mxu1 %v5932_v4  ;;  %v5949_v20 = vld [vmem:[%s7117_s1 + $0x240] sm:$0xff]   ;;  %v5948_v21 = vld [vmem:[%s7118_s0 + $0x208] sm:$0xff]   ;;  %v5953_v25 = vld [vmem:[%s7118_s0 + $0x210] sm:$0xff]  }
   0x9   :  { %5436 = vmatprep.subr.bf16.mxu0 %v5933_v5  ;;  %v5950_v22 = vld [vmem:[%s7117_s1 + $0x8] sm:$0xff]   ;;  %v5954_v26 = vld [vmem:[%s7118_s0 + $0x58] sm:$0xff]   ;;  %v5955_v27 = vld [vmem:[%s7117_s1 + $0x10] sm:$0xff]  }
   0xa   :  { %v5951_v23 = vld [vmem:[%s7117_s1 + $0x248] sm:$0xff]   ;;  %v5957_v28 = vld [vmem:[%s7117_s1 + $0x250] sm:$0xff]   ;;  %v5956_v29 = vld [vmem:[%s7118_s0 + $0x218] sm:$0xff]  }
   0xb   :  { %5181 = vmatpush3.bf16.msra.mxu1 %v5932_v4  ;;  %v5958_v30 = vld [vmem:[%s7117_s1 + $0x18] sm:$0xff]   ;;  %v5960_v32 = vld [vmem:[%s7118_s0 + $0x60] sm:$0xff]   ;;  %v5962_v34 = vld [vmem:[%s7118_s0 + $0x68] sm:$0xff]  }
   0xc   :  { %5437 = vmatpush3.bf16.msra.mxu0 %v5933_v5  ;;  %5182 = vmatprep.subr.bf16.mxu1 %v5934_v6  ;;  %v5959_v31 = vld [vmem:[%s7117_s1 + $0x258] sm:$0xff]   ;;  %v5961_v33 = vld [vmem:[%s7118_s0 + $0x220] sm:$0xff]   ;;  %v5964_v37 = vld [vmem:[%s7118_s0 + $0x228] sm:$0xff]  }
   0xd   :  { %5438 = vmatprep.subr.bf16.mxu0 %v5935_v7  ;;  %v5963_v35 = vld [vmem:[%s7117_s1 + $0x20] sm:$0xff]   ;;  %v5966_v38 = vld [vmem:[%s7117_s1 + $0x28] sm:$0xff]   ;;  %v5968_v40 = vld [vmem:[%s7118_s0 + $0x70] sm:$0xff]  }
   0xe   :  { %v5965_v36 = vld [vmem:[%s7117_s1 + $0x260] sm:$0xff]   ;;  %v5967_v39 = vld [vmem:[%s7117_s1 + $0x268] sm:$0xff]   ;;  %v5969_v41 = vld [vmem:[%s7118_s0 + $0x230] sm:$0xff]  }
   0xf   :  { %5183 = vmatpush3.bf16.msra.mxu1 %v5934_v6  ;;  %v5970_v42 = vld [vmem:[%s7118_s0 + $0x78] sm:$0xff]   ;;  %v5971_v43 = vld [vmem:[%s7117_s1 + $0x30] sm:$0xff]   ;;  %v5976_v48 = vld [vmem:[%s7118_s0] sm:$0xff]  }
  0x10   :  { %5439 = vmatpush3.bf16.msra.mxu0 %v5935_v7  ;;  %5184 = vmatprep.subr.bf16.mxu1 %v5936_v8  ;;  %v5973_v44 = vld [vmem:[%s7117_s1 + $0x270] sm:$0xff]   ;;  %v5972_v45 = vld [vmem:[%s7118_s0 + $0x238] sm:$0xff]   ;;  %v5977_v49 = vld [vmem:[%s7118_s0 + $0x240] sm:$0xff]  }
  0x11   :  { %5440 = vmatprep.subr.bf16.mxu0 %v5937_v9  ;;  %v5974_v46 = vld [vmem:[%s7117_s1 + $0x38] sm:$0xff]   ;;  %v5978_v50 = vld [vmem:[%s7118_s0 + $0x8] sm:$0xff]   ;;  %v5979_v51 = vld [vmem:[%s7117_s1 + $0x80] sm:$0xff]  }
  0x12   :  { %v5975_v47 = vld [vmem:[%s7117_s1 + $0x278] sm:$0xff]   ;;  %v5981_v52 = vld [vmem:[%s7117_s1 + $0x280] sm:$0xff]   ;;  %v5980_v53 = vld [vmem:[%s7118_s0 + $0x248] sm:$0xff]  }
  0x13   :  { %5185 = vmatpush3.bf16.msra.mxu1 %v5936_v8  ;;  %v5982_v54 = vld [vmem:[%s7117_s1 + $0x88] sm:$0xff]   ;;  %v5984_v56 = vld [vmem:[%s7118_s0 + $0x10] sm:$0xff]   ;;  %v5986_v58 = vld [vmem:[%s7118_s0 + $0x18] sm:$0xff]  }
  0x14   :  { %5441 = vmatpush3.bf16.msra.mxu0 %v5937_v9  ;;  %5186 = vmatprep.subr.bf16.mxu1 %v5938_v10  ;;  %v5983_v55 = vld [vmem:[%s7117_s1 + $0x288] sm:$0xff]   ;;  %v5985_v57 = vld [vmem:[%s7118_s0 + $0x250] sm:$0xff]   ;;  %v5988_v61 = vld [vmem:[%s7118_s0 + $0x258] sm:$0xff]  }
  0x15   :  { %5442 = vmatprep.subr.bf16.mxu0 %v5939_v11  ;;  %v5987_v59 = vld [vmem:[%s7117_s1 + $0x90] sm:$0xff]   ;;  %v5990_v62 = vld [vmem:[%s7117_s1 + $0x98] sm:$0xff]   ;;  %v5992_v0 = vld [vmem:[%s7118_s0 + $0x20] sm:$0xff]  }
  0x16   :  { %v5989_v60 = vld [vmem:[%s7117_s1 + $0x290] sm:$0xff]   ;;  %v5991_v63 = vld [vmem:[%s7117_s1 + $0x298] sm:$0xff]   ;;  %v5993_v1 = vld [vmem:[%s7118_s0 + $0x260] sm:$0xff]  }
  0x17   :  { %5187 = vmatpush3.bf16.msra.mxu1 %v5938_v10  ;;  %v5994_v2 = vld [vmem:[%s7118_s0 + $0x28] sm:$0xff]   ;;  %v5995_v3 = vld [vmem:[%s7117_s1 + $0xa0] sm:$0xff]   ;;  %v6000_v8 = vld [vmem:[%s7118_s0 + $0x30] sm:$0xff]  }
  0x18   :  { %5443 = vmatpush3.bf16.msra.mxu0 %v5939_v11  ;;  %5188 = vmatprep.subr.bf16.mxu1 %v5940_v14  ;;  %v5997_v4 = vld [vmem:[%s7117_s1 + $0x2a0] sm:$0xff]   ;;  %v5996_v5 = vld [vmem:[%s7118_s0 + $0x268] sm:$0xff]   ;;  %v6001_v9 = vld [vmem:[%s7118_s0 + $0x270] sm:$0xff]  }
  0x19   :  { %5444 = vmatprep.subr.bf16.mxu0 %v5941_v15  ;;  %v5998_v6 = vld [vmem:[%s7117_s1 + $0xa8] sm:$0xff]   ;;  %v6002_v10 = vld [vmem:[%s7118_s0 + $0x38] sm:$0xff]   ;;  %v6003_v11 = vld [vmem:[%s7117_s1 + $0xb0] sm:$0xff]  }
  0x1a   :  { %v5999_v7 = vld [vmem:[%s7117_s1 + $0x2a8] sm:$0xff]   ;;  %v6005_v12 = vld [vmem:[%s7117_s1 + $0x2b0] sm:$0xff]   ;;  %v6004_v13 = vld [vmem:[%s7118_s0 + $0x278] sm:$0xff]  }
  0x1b   :  { %5189 = vmatpush3.bf16.msra.mxu1 %v5940_v14  ;;  %v6006_v14 = vld [vmem:[%s7117_s1 + $0xb8] sm:$0xff]  }
  0x1c   :  { %5445 = vmatpush3.bf16.msra.mxu0 %v5941_v15  ;;  %5190 = vmatprep.subr.bf16.mxu1 %v5942_v16  ;;  %v6007_v15 = vld [vmem:[%s7117_s1 + $0x2b8] sm:$0xff]  }
  0x1d   :  { %5446 = vmatprep.subr.bf16.mxu0 %v5943_v17 }
  0x1f   :  { %5191 = vmatpush3.bf16.msra.mxu1 %v5942_v16  ;;  %v6008_v16 = vld [vmem:[%s7118_s0 + $0x80] sm:$0xff]  }
  0x20   :  { %5447 = vmatpush3.bf16.msra.mxu0 %v5943_v17  ;;  %5208 = vmatprep.subr.bf16.mxu1 %v5947_v19  ;;  %v6009_v17 = vld [vmem:[%s7118_s0 + $0x280] sm:$0xff]  }
  0x21   :  { %5464 = vmatprep.subr.bf16.mxu0 %v5949_v20 }
  0x22   :  { %5193 = vmatmul.mubr.bf16.vlgmr.msra.gmra.mrb[0].mxu1 %v5946_v18  ;;  %v6010_v18 = vld [vmem:[%s7118_s0 + $0x88] sm:$0xff]  }
  0x23   :  { %5449 = vmatmul.mubr.bf16.vlgmr.msra.gmra.mrb[0].mxu0 %v5948_v21  ;;  %5209 = vmatpush3.bf16.msra.mxu1 %v5947_v19  ;;  %v6011_v19 = vld [vmem:[%s7117_s1 + $0xc0] sm:$0xff]   ;;  %v6012_v21 = vld [vmem:[%s7118_s0 + $0x288] sm:$0xff]  }
  0x24   :  { %5465 = vmatpush3.bf16.msra.mxu0 %v5949_v20  ;;  %5210 = vmatprep.subr.bf16.mxu1 %v5950_v22  ;;  %v6013_v20 = vld [vmem:[%s7117_s1 + $0x2c0] sm:$0xff]  }
  0x25   :  { %5466 = vmatprep.subr.bf16.mxu0 %v5951_v23  ;;  %5196 = vmatprep.mubr.bf16.mxu1 %v5952_v24  ;;  %v6016_v24 = vld [vmem:[%s7118_s0 + $0x90] sm:$0xff]  }
  0x26   :  { %5452 = vmatprep.mubr.bf16.mxu0 %v5953_v25  ;;  %v6017_v25 = vld [vmem:[%s7118_s0 + $0x290] sm:$0xff]  }
  0x27   :  { %5211 = vmatpush3.bf16.msra.mxu1 %v5950_v22  ;;  %v6014_v22 = vld [vmem:[%s7117_s1 + $0xc8] sm:$0xff]  }
  0x28   :  { %5467 = vmatpush3.bf16.msra.mxu0 %v5951_v23  ;;  %5212 = vmatprep.subr.bf16.mxu1 %v5955_v27  ;;  %v6015_v23 = vld [vmem:[%s7117_s1 + $0x2c8] sm:$0xff]  }
  0x29   :  { %5468 = vmatprep.subr.bf16.mxu0 %v5957_v28 }
  0x2a   :  { %5197 = vmatmul.mubr.bf16.gmra.mrb[4].mxu1 %v5954_v26  ;;  %v6018_v26 = vld [vmem:[%s7118_s0 + $0x98] sm:$0xff]  }
  0x2b   :  { %5453 = vmatmul.mubr.bf16.gmra.mrb[4].mxu0 %v5956_v29  ;;  %5213 = vmatpush3.bf16.msra.mxu1 %v5955_v27  ;;  %v6019_v27 = vld [vmem:[%s7117_s1 + $0xd0] sm:$0xff]   ;;  %v6020_v29 = vld [vmem:[%s7118_s0 + $0x298] sm:$0xff]  }
  0x2c   :  { %5469 = vmatpush3.bf16.msra.mxu0 %v5957_v28  ;;  %5214 = vmatprep.subr.bf16.mxu1 %v5958_v30  ;;  %v6021_v28 = vld [vmem:[%s7117_s1 + $0x2d0] sm:$0xff]  }
  0x2d   :  { %5470 = vmatprep.subr.bf16.mxu0 %v5959_v31  ;;  %5200 = vmatprep.mubr.bf16.mxu1 %v5960_v32  ;;  %v6024_v32 = vld [vmem:[%s7118_s0 + $0xa0] sm:$0xff]  }
  0x2e   :  { %5456 = vmatprep.mubr.bf16.mxu0 %v5961_v33  ;;  %v6025_v33 = vld [vmem:[%s7118_s0 + $0x2a0] sm:$0xff]  }
  0x2f   :  { %5215 = vmatpush3.bf16.msra.mxu1 %v5958_v30  ;;  %v6022_v30 = vld [vmem:[%s7117_s1 + $0xd8] sm:$0xff]  }
  0x30   :  { %5471 = vmatpush3.bf16.msra.mxu0 %v5959_v31  ;;  %5216 = vmatprep.subr.bf16.mxu1 %v5963_v35  ;;  %v6023_v31 = vld [vmem:[%s7117_s1 + $0x2d8] sm:$0xff]  }
  0x31   :  { %5472 = vmatprep.subr.bf16.mxu0 %v5965_v36 }
  0x32   :  { %5201 = vmatmul.mubr.bf16.gmra.mrb[8].mxu1 %v5962_v34  ;;  %v6026_v34 = vld [vmem:[%s7118_s0 + $0xa8] sm:$0xff]  }
  0x33   :  { %5457 = vmatmul.mubr.bf16.gmra.mrb[8].mxu0 %v5964_v37  ;;  %5217 = vmatpush3.bf16.msra.mxu1 %v5963_v35  ;;  %v6027_v35 = vld [vmem:[%s7117_s1 + $0xe0] sm:$0xff]   ;;  %v6028_v37 = vld [vmem:[%s7118_s0 + $0x2a8] sm:$0xff]  }
  0x34   :  { %5473 = vmatpush3.bf16.msra.mxu0 %v5965_v36  ;;  %5218 = vmatprep.subr.bf16.mxu1 %v5966_v38  ;;  %v6029_v36 = vld [vmem:[%s7117_s1 + $0x2e0] sm:$0xff]  }
  0x35   :  { %5474 = vmatprep.subr.bf16.mxu0 %v5967_v39  ;;  %5204 = vmatprep.mubr.bf16.mxu1 %v5968_v40  ;;  %v6032_v40 = vld [vmem:[%s7118_s0 + $0xb0] sm:$0xff]  }
  0x36   :  { %5460 = vmatprep.mubr.bf16.mxu0 %v5969_v41  ;;  %v6033_v41 = vld [vmem:[%s7118_s0 + $0x2b0] sm:$0xff]  }
  0x37   :  { %5219 = vmatpush3.bf16.msra.mxu1 %v5966_v38  ;;  %v6030_v38 = vld [vmem:[%s7117_s1 + $0xe8] sm:$0xff]  }
  0x38   :  { %5475 = vmatpush3.bf16.msra.mxu0 %v5967_v39  ;;  %5220 = vmatprep.subr.bf16.mxu1 %v5971_v43  ;;  %v6031_v39 = vld [vmem:[%s7117_s1 + $0x2e8] sm:$0xff]  }
  0x39   :  { %5476 = vmatprep.subr.bf16.mxu0 %v5973_v44 }
  0x3a   :  { %5205 = vmatmul.mubr.bf16.gmra.mrb[12].mxu1 %v5970_v42  ;;  %v6034_v42 = vld [vmem:[%s7118_s0 + $0xb8] sm:$0xff]  }
  0x3b   :  { %5461 = vmatmul.mubr.bf16.gmra.mrb[12].mxu0 %v5972_v45  ;;  %5221 = vmatpush3.bf16.msra.mxu1 %v5971_v43  ;;  %v6035_v43 = vld [vmem:[%s7117_s1 + $0xf0] sm:$0xff]   ;;  %v6036_v45 = vld [vmem:[%s7118_s0 + $0x2b8] sm:$0xff]  }
  0x3c   :  { %5477 = vmatpush3.bf16.msra.mxu0 %v5973_v44  ;;  %5222 = vmatprep.subr.bf16.mxu1 %v5974_v46  ;;  %v6037_v44 = vld [vmem:[%s7117_s1 + $0x2f0] sm:$0xff]  }
  0x3d   :  { %5478 = vmatprep.subr.bf16.mxu0 %v5975_v47  ;;  %5224 = vmatprep.mubr.bf16.mxu1 %v5976_v48  ;;  %v6040_v48 = vld [vmem:[%s7118_s0 + $0xc0] sm:$0xff]  }
  0x3e   :  { %5480 = vmatprep.mubr.bf16.mxu0 %v5977_v49  ;;  %v6041_v49 = vld [vmem:[%s7118_s0 + $0x2c0] sm:$0xff]  }
  0x3f   :  { %5223 = vmatpush3.bf16.msra.mxu1 %v5974_v46  ;;  %v6038_v46 = vld [vmem:[%s7117_s1 + $0xf8] sm:$0xff]  }
  0x40   :  { %5479 = vmatpush3.bf16.msra.mxu0 %v5975_v47  ;;  %5240 = vmatprep.subr.bf16.mxu1 %v5979_v51  ;;  %v6039_v47 = vld [vmem:[%s7117_s1 + $0x2f8] sm:$0xff]  }
  0x41   :  { %5496 = vmatprep.subr.bf16.mxu0 %v5981_v52 }
  0x42   :  { %5225 = vmatmul.mubr.bf16.vlgmr.msra.gmra.mrb[0].mxu1 %v5978_v50  ;;  %v6042_v50 = vld [vmem:[%s7118_s0 + $0xc8] sm:$0xff]  }
  0x43   :  { %5481 = vmatmul.mubr.bf16.vlgmr.msra.gmra.mrb[0].mxu0 %v5980_v53  ;;  %5241 = vmatpush3.bf16.msra.mxu1 %v5979_v51  ;;  %v6043_v51 = vld [vmem:[%s7117_s1 + $0x100] sm:$0xff]   ;;  %v6044_v53 = vld [vmem:[%s7118_s0 + $0x2c8] sm:$0xff]  }
  0x44   :  { %5497 = vmatpush3.bf16.msra.mxu0 %v5981_v52  ;;  %5242 = vmatprep.subr.bf16.mxu1 %v5982_v54  ;;  %v6045_v52 = vld [vmem:[%s7117_s1 + $0x300] sm:$0xff]  }
  0x45   :  { %5498 = vmatprep.subr.bf16.mxu0 %v5983_v55  ;;  %5228 = vmatprep.mubr.bf16.mxu1 %v5984_v56  ;;  %v6048_v56 = vld [vmem:[%s7118_s0 + $0xd0] sm:$0xff]  }
  0x46   :  { %5484 = vmatprep.mubr.bf16.mxu0 %v5985_v57  ;;  %v6049_v57 = vld [vmem:[%s7118_s0 + $0x2d0] sm:$0xff]  }
  0x47   :  { %5243 = vmatpush3.bf16.msra.mxu1 %v5982_v54  ;;  %v6046_v54 = vld [vmem:[%s7117_s1 + $0x108] sm:$0xff]  }
  0x48   :  { %5499 = vmatpush3.bf16.msra.mxu0 %v5983_v55  ;;  %5244 = vmatprep.subr.bf16.mxu1 %v5987_v59  ;;  %v6047_v55 = vld [vmem:[%s7117_s1 + $0x308] sm:$0xff]  }
  0x49   :  { %5500 = vmatprep.subr.bf16.mxu0 %v5989_v60 }
  0x4a   :  { %5229 = vmatmul.mubr.bf16.gmra.mrb[4].mxu1 %v5986_v58  ;;  %v6050_v58 = vld [vmem:[%s7118_s0 + $0xd8] sm:$0xff]  }
  0x4b   :  { %5485 = vmatmul.mubr.bf16.gmra.mrb[4].mxu0 %v5988_v61  ;;  %5245 = vmatpush3.bf16.msra.mxu1 %v5987_v59  ;;  %v6051_v59 = vld [vmem:[%s7117_s1 + $0x110] sm:$0xff]   ;;  %v6052_v61 = vld [vmem:[%s7118_s0 + $0x2d8] sm:$0xff]  }
  0x4c   :  { %5501 = vmatpush3.bf16.msra.mxu0 %v5989_v60  ;;  %5246 = vmatprep.subr.bf16.mxu1 %v5990_v62  ;;  %v6053_v60 = vld [vmem:[%s7117_s1 + $0x310] sm:$0xff]  }
  0x4d   :  { %5502 = vmatprep.subr.bf16.mxu0 %v5991_v63  ;;  %5232 = vmatprep.mubr.bf16.mxu1 %v5992_v0  ;;  %v6056_v0 = vld [vmem:[%s7118_s0 + $0xe0] sm:$0xff]  }
  0x4e   :  { %5488 = vmatprep.mubr.bf16.mxu0 %v5993_v1  ;;  %v6057_v1 = vld [vmem:[%s7118_s0 + $0x2e0] sm:$0xff]  }
  0x4f   :  { %5247 = vmatpush3.bf16.msra.mxu1 %v5990_v62  ;;  %v6054_v62 = vld [vmem:[%s7117_s1 + $0x118] sm:$0xff]  }
  0x50   :  { %5503 = vmatpush3.bf16.msra.mxu0 %v5991_v63  ;;  %5248 = vmatprep.subr.bf16.mxu1 %v5995_v3  ;;  %v6055_v63 = vld [vmem:[%s7117_s1 + $0x318] sm:$0xff]  }
  0x51   :  { %5504 = vmatprep.subr.bf16.mxu0 %v5997_v4 }
  0x52   :  { %5233 = vmatmul.mubr.bf16.gmra.mrb[8].mxu1 %v5994_v2  ;;  %v6058_v2 = vld [vmem:[%s7118_s0 + $0xe8] sm:$0xff]  }
  0x53   :  { %5489 = vmatmul.mubr.bf16.gmra.mrb[8].mxu0 %v5996_v5  ;;  %5249 = vmatpush3.bf16.msra.mxu1 %v5995_v3  ;;  %v6059_v3 = vld [vmem:[%s7117_s1 + $0x120] sm:$0xff]   ;;  %v6060_v5 = vld [vmem:[%s7118_s0 + $0x2e8] sm:$0xff]  }
  0x54   :  { %5505 = vmatpush3.bf16.msra.mxu0 %v5997_v4  ;;  %5250 = vmatprep.subr.bf16.mxu1 %v5998_v6  ;;  %v6061_v4 = vld [vmem:[%s7117_s1 + $0x320] sm:$0xff]  }
  0x55   :  { %5506 = vmatprep.subr.bf16.mxu0 %v5999_v7  ;;  %5236 = vmatprep.mubr.bf16.mxu1 %v6000_v8  ;;  %v6064_v8 = vld [vmem:[%s7118_s0 + $0xf0] sm:$0xff]  }
  0x56   :  { %5492 = vmatprep.mubr.bf16.mxu0 %v6001_v9  ;;  %v6065_v9 = vld [vmem:[%s7118_s0 + $0x2f0] sm:$0xff]  }
  0x57   :  { %5251 = vmatpush3.bf16.msra.mxu1 %v5998_v6  ;;  %v6062_v6 = vld [vmem:[%s7117_s1 + $0x128] sm:$0xff]  }
  0x58   :  { %5507 = vmatpush3.bf16.msra.mxu0 %v5999_v7  ;;  %5252 = vmatprep.subr.bf16.mxu1 %v6003_v11  ;;  %v6063_v7 = vld [vmem:[%s7117_s1 + $0x328] sm:$0xff]  }
  0x59   :  { %5508 = vmatprep.subr.bf16.mxu0 %v6005_v12 }
  0x5a   :  { %5237 = vmatmul.mubr.bf16.gmra.mrb[12].mxu1 %v6002_v10  ;;  %v6066_v10 = vld [vmem:[%s7118_s0 + $0xf8] sm:$0xff]  }
  0x5b   :  { %5493 = vmatmul.mubr.bf16.gmra.mrb[12].mxu0 %v6004_v13  ;;  %5253 = vmatpush3.bf16.msra.mxu1 %v6003_v11  ;;  %v6067_v11 = vld [vmem:[%s7117_s1 + $0x130] sm:$0xff]   ;;  %v6068_v13 = vld [vmem:[%s7118_s0 + $0x2f8] sm:$0xff]  }
  0x5c   :  { %5509 = vmatpush3.bf16.msra.mxu0 %v6005_v12  ;;  %5254 = vmatprep.subr.bf16.mxu1 %v6006_v14  ;;  %v6069_v12 = vld [vmem:[%s7117_s1 + $0x330] sm:$0xff]  }
  0x5d   :  { %5510 = vmatprep.subr.bf16.mxu0 %v6007_v15  ;;  %5256 = vmatprep.mubr.bf16.mxu1 %v6008_v16  ;;  %v6072_v16 = vld [vmem:[%s7118_s0 + $0x100] sm:$0xff]  }
  0x5e   :  { %5512 = vmatprep.mubr.bf16.mxu0 %v6009_v17  ;;  %v6073_v17 = vld [vmem:[%s7118_s0 + $0x300] sm:$0xff]  }
  0x5f   :  { %5255 = vmatpush3.bf16.msra.mxu1 %v6006_v14  ;;  %v6070_v14 = vld [vmem:[%s7117_s1 + $0x138] sm:$0xff]  }
  0x60   :  { %5511 = vmatpush3.bf16.msra.mxu0 %v6007_v15  ;;  %5272 = vmatprep.subr.bf16.mxu1 %v6011_v19  ;;  %v6071_v15 = vld [vmem:[%s7117_s1 + $0x338] sm:$0xff]  }
  0x61   :  { %5528 = vmatprep.subr.bf16.mxu0 %v6013_v20 }
  0x62   :  { %5257 = vmatmul.mubr.bf16.vlgmr.msra.gmra.mrb[0].mxu1 %v6010_v18  ;;  %v6074_v18 = vld [vmem:[%s7118_s0 + $0x108] sm:$0xff]  }
  0x63   :  { %5513 = vmatmul.mubr.bf16.vlgmr.msra.gmra.mrb[0].mxu0 %v6012_v21  ;;  %5273 = vmatpush3.bf16.msra.mxu1 %v6011_v19  ;;  %v6075_v19 = vld [vmem:[%s7117_s1 + $0x140] sm:$0xff]   ;;  %v6076_v21 = vld [vmem:[%s7118_s0 + $0x308] sm:$0xff]  }
  0x64   :  { %5529 = vmatpush3.bf16.msra.mxu0 %v6013_v20  ;;  %5274 = vmatprep.subr.bf16.mxu1 %v6014_v22  ;;  %v6077_v20 = vld [vmem:[%s7117_s1 + $0x340] sm:$0xff]  }
  0x65   :  { %5530 = vmatprep.subr.bf16.mxu0 %v6015_v23  ;;  %5260 = vmatprep.mubr.bf16.mxu1 %v6016_v24  ;;  %v6080_v24 = vld [vmem:[%s7118_s0 + $0x110] sm:$0xff]  }
  0x66   :  { %5516 = vmatprep.mubr.bf16.mxu0 %v6017_v25  ;;  %v6081_v25 = vld [vmem:[%s7118_s0 + $0x310] sm:$0xff]  }
  0x67   :  { %5275 = vmatpush3.bf16.msra.mxu1 %v6014_v22  ;;  %v6078_v22 = vld [vmem:[%s7117_s1 + $0x148] sm:$0xff]  }
  0x68   :  { %5531 = vmatpush3.bf16.msra.mxu0 %v6015_v23  ;;  %5276 = vmatprep.subr.bf16.mxu1 %v6019_v27  ;;  %v6079_v23 = vld [vmem:[%s7117_s1 + $0x348] sm:$0xff]  }
  0x69   :  { %5532 = vmatprep.subr.bf16.mxu0 %v6021_v28 }
  0x6a   :  { %5261 = vmatmul.mubr.bf16.gmra.mrb[4].mxu1 %v6018_v26  ;;  %v6082_v26 = vld [vmem:[%s7118_s0 + $0x118] sm:$0xff]  }
  0x6b   :  { %5517 = vmatmul.mubr.bf16.gmra.mrb[4].mxu0 %v6020_v29  ;;  %5277 = vmatpush3.bf16.msra.mxu1 %v6019_v27  ;;  %v6083_v27 = vld [vmem:[%s7117_s1 + $0x150] sm:$0xff]   ;;  %v6084_v29 = vld [vmem:[%s7118_s0 + $0x318] sm:$0xff]  }
  0x6c   :  { %5533 = vmatpush3.bf16.msra.mxu0 %v6021_v28  ;;  %5278 = vmatprep.subr.bf16.mxu1 %v6022_v30  ;;  %v6085_v28 = vld [vmem:[%s7117_s1 + $0x350] sm:$0xff]  }
  0x6d   :  { %5534 = vmatprep.subr.bf16.mxu0 %v6023_v31  ;;  %5264 = vmatprep.mubr.bf16.mxu1 %v6024_v32  ;;  %v6088_v32 = vld [vmem:[%s7118_s0 + $0x120] sm:$0xff]  }
  0x6e   :  { %5520 = vmatprep.mubr.bf16.mxu0 %v6025_v33  ;;  %v6089_v33 = vld [vmem:[%s7118_s0 + $0x320] sm:$0xff]  }
  0x6f   :  { %5279 = vmatpush3.bf16.msra.mxu1 %v6022_v30  ;;  %v6086_v30 = vld [vmem:[%s7117_s1 + $0x158] sm:$0xff]  }
  0x70   :  { %5535 = vmatpush3.bf16.msra.mxu0 %v6023_v31  ;;  %5280 = vmatprep.subr.bf16.mxu1 %v6027_v35  ;;  %v6087_v31 = vld [vmem:[%s7117_s1 + $0x358] sm:$0xff]  }
  0x71   :  { %5536 = vmatprep.subr.bf16.mxu0 %v6029_v36 }
  0x72   :  { %5265 = vmatmul.mubr.bf16.gmra.mrb[8].mxu1 %v6026_v34  ;;  %v6090_v34 = vld [vmem:[%s7118_s0 + $0x128] sm:$0xff]  }
  0x73   :  { %5521 = vmatmul.mubr.bf16.gmra.mrb[8].mxu0 %v6028_v37  ;;  %5281 = vmatpush3.bf16.msra.mxu1 %v6027_v35  ;;  %v6091_v35 = vld [vmem:[%s7117_s1 + $0x160] sm:$0xff]   ;;  %v6092_v37 = vld [vmem:[%s7118_s0 + $0x328] sm:$0xff]  }
  0x74   :  { %5537 = vmatpush3.bf16.msra.mxu0 %v6029_v36  ;;  %5282 = vmatprep.subr.bf16.mxu1 %v6030_v38  ;;  %v6093_v36 = vld [vmem:[%s7117_s1 + $0x360] sm:$0xff]  }
  0x75   :  { %5538 = vmatprep.subr.bf16.mxu0 %v6031_v39  ;;  %5268 = vmatprep.mubr.bf16.mxu1 %v6032_v40  ;;  %v6096_v40 = vld [vmem:[%s7118_s0 + $0x130] sm:$0xff]  }
  0x76   :  { %5524 = vmatprep.mubr.bf16.mxu0 %v6033_v41  ;;  %v6097_v41 = vld [vmem:[%s7118_s0 + $0x330] sm:$0xff]  }
  0x77   :  { %5283 = vmatpush3.bf16.msra.mxu1 %v6030_v38  ;;  %v6094_v38 = vld [vmem:[%s7117_s1 + $0x168] sm:$0xff]  }
  0x78   :  { %5539 = vmatpush3.bf16.msra.mxu0 %v6031_v39  ;;  %5284 = vmatprep.subr.bf16.mxu1 %v6035_v43  ;;  %v6095_v39 = vld [vmem:[%s7117_s1 + $0x368] sm:$0xff]  }
  0x79   :  { %5540 = vmatprep.subr.bf16.mxu0 %v6037_v44 }
  0x7a   :  { %5269 = vmatmul.mubr.bf16.gmra.mrb[12].mxu1 %v6034_v42  ;;  %v6098_v42 = vld [vmem:[%s7118_s0 + $0x138] sm:$0xff]  }
  0x7b   :  { %5525 = vmatmul.mubr.bf16.gmra.mrb[12].mxu0 %v6036_v45  ;;  %5285 = vmatpush3.bf16.msra.mxu1 %v6035_v43  ;;  %v6099_v43 = vld [vmem:[%s7117_s1 + $0x170] sm:$0xff]   ;;  %v6100_v45 = vld [vmem:[%s7118_s0 + $0x338] sm:$0xff]  }
  0x7c   :  { %5541 = vmatpush3.bf16.msra.mxu0 %v6037_v44  ;;  %5286 = vmatprep.subr.bf16.mxu1 %v6038_v46  ;;  %v6101_v44 = vld [vmem:[%s7117_s1 + $0x370] sm:$0xff]  }
  0x7d   :  { %5542 = vmatprep.subr.bf16.mxu0 %v6039_v47  ;;  %5288 = vmatprep.mubr.bf16.mxu1 %v6040_v48  ;;  %v6104_v48 = vld [vmem:[%s7118_s0 + $0x140] sm:$0xff]  }
  0x7e   :  { %5544 = vmatprep.mubr.bf16.mxu0 %v6041_v49  ;;  %v6105_v49 = vld [vmem:[%s7118_s0 + $0x340] sm:$0xff]  }
  0x7f   :  { %5287 = vmatpush3.bf16.msra.mxu1 %v6038_v46  ;;  %v6102_v46 = vld [vmem:[%s7117_s1 + $0x178] sm:$0xff]  }
  0x80   :  { %5543 = vmatpush3.bf16.msra.mxu0 %v6039_v47  ;;  %5304 = vmatprep.subr.bf16.mxu1 %v6043_v51  ;;  %v6103_v47 = vld [vmem:[%s7117_s1 + $0x378] sm:$0xff]  }
  0x81   :  { %5560 = vmatprep.subr.bf16.mxu0 %v6045_v52 }
  0x82   :  { %5289 = vmatmul.mubr.bf16.vlgmr.msra.gmra.mrb[0].mxu1 %v6042_v50  ;;  %v6106_v50 = vld [vmem:[%s7118_s0 + $0x148] sm:$0xff]  }
  0x83   :  { %5545 = vmatmul.mubr.bf16.vlgmr.msra.gmra.mrb[0].mxu0 %v6044_v53  ;;  %5305 = vmatpush3.bf16.msra.mxu1 %v6043_v51  ;;  %v6107_v51 = vld [vmem:[%s7117_s1 + $0x180] sm:$0xff]   ;;  %v6108_v53 = vld [vmem:[%s7118_s0 + $0x348] sm:$0xff]  }
  0x84   :  { %5561 = vmatpush3.bf16.msra.mxu0 %v6045_v52  ;;  %5306 = vmatprep.subr.bf16.mxu1 %v6046_v54  ;;  %v6109_v52 = vld [vmem:[%s7117_s1 + $0x380] sm:$0xff]  }
  0x85   :  { %5562 = vmatprep.subr.bf16.mxu0 %v6047_v55  ;;  %5292 = vmatprep.mubr.bf16.mxu1 %v6048_v56  ;;  %v6112_v56 = vld [vmem:[%s7118_s0 + $0x150] sm:$0xff]  }
  0x86   :  { %5548 = vmatprep.mubr.bf16.mxu0 %v6049_v57  ;;  %v6113_v57 = vld [vmem:[%s7118_s0 + $0x350] sm:$0xff]  }
  0x87   :  { %5307 = vmatpush3.bf16.msra.mxu1 %v6046_v54  ;;  %v6110_v54 = vld [vmem:[%s7117_s1 + $0x188] sm:$0xff]  }
  0x88   :  { %5563 = vmatpush3.bf16.msra.mxu0 %v6047_v55  ;;  %5308 = vmatprep.subr.bf16.mxu1 %v6051_v59  ;;  %v6111_v55 = vld [vmem:[%s7117_s1 + $0x388] sm:$0xff]  }
  0x89   :  { %5564 = vmatprep.subr.bf16.mxu0 %v6053_v60 }
  0x8a   :  { %5293 = vmatmul.mubr.bf16.gmra.mrb[4].mxu1 %v6050_v58  ;;  %v6114_v58 = vld [vmem:[%s7118_s0 + $0x158] sm:$0xff]  }
  0x8b   :  { %5549 = vmatmul.mubr.bf16.gmra.mrb[4].mxu0 %v6052_v61  ;;  %5309 = vmatpush3.bf16.msra.mxu1 %v6051_v59  ;;  %v6115_v59 = vld [vmem:[%s7117_s1 + $0x190] sm:$0xff]   ;;  %v6116_v61 = vld [vmem:[%s7118_s0 + $0x358] sm:$0xff]  }
  0x8c   :  { %5565 = vmatpush3.bf16.msra.mxu0 %v6053_v60  ;;  %5310 = vmatprep.subr.bf16.mxu1 %v6054_v62  ;;  %v6117_v60 = vld [vmem:[%s7117_s1 + $0x390] sm:$0xff]  }
  0x8d   :  { %5566 = vmatprep.subr.bf16.mxu0 %v6055_v63  ;;  %5296 = vmatprep.mubr.bf16.mxu1 %v6056_v0  ;;  %v6120_v0 = vld [vmem:[%s7118_s0 + $0x160] sm:$0xff]  }
  0x8e   :  { %5552 = vmatprep.mubr.bf16.mxu0 %v6057_v1  ;;  %v6121_v1 = vld [vmem:[%s7118_s0 + $0x360] sm:$0xff]  }
  0x8f   :  { %5311 = vmatpush3.bf16.msra.mxu1 %v6054_v62  ;;  %v6118_v62 = vld [vmem:[%s7117_s1 + $0x198] sm:$0xff]  }
  0x90   :  { %5567 = vmatpush3.bf16.msra.mxu0 %v6055_v63  ;;  %5312 = vmatprep.subr.bf16.mxu1 %v6059_v3  ;;  %v6119_v63 = vld [vmem:[%s7117_s1 + $0x398] sm:$0xff]  }
  0x91   :  { %5568 = vmatprep.subr.bf16.mxu0 %v6061_v4 }
  0x92   :  { %5297 = vmatmul.mubr.bf16.gmra.mrb[8].mxu1 %v6058_v2  ;;  %v6122_v2 = vld [vmem:[%s7118_s0 + $0x168] sm:$0xff]  }
  0x93   :  { %5553 = vmatmul.mubr.bf16.gmra.mrb[8].mxu0 %v6060_v5  ;;  %5313 = vmatpush3.bf16.msra.mxu1 %v6059_v3  ;;  %v6123_v3 = vld [vmem:[%s7117_s1 + $0x1a0] sm:$0xff]   ;;  %v6124_v5 = vld [vmem:[%s7118_s0 + $0x368] sm:$0xff]  }
  0x94   :  { %5569 = vmatpush3.bf16.msra.mxu0 %v6061_v4  ;;  %5314 = vmatprep.subr.bf16.mxu1 %v6062_v6  ;;  %v6125_v4 = vld [vmem:[%s7117_s1 + $0x3a0] sm:$0xff]  }
  0x95   :  { %5570 = vmatprep.subr.bf16.mxu0 %v6063_v7  ;;  %5300 = vmatprep.mubr.bf16.mxu1 %v6064_v8  ;;  %v6128_v8 = vld [vmem:[%s7118_s0 + $0x170] sm:$0xff]  }
  0x96   :  { %5556 = vmatprep.mubr.bf16.mxu0 %v6065_v9  ;;  %v6129_v9 = vld [vmem:[%s7118_s0 + $0x370] sm:$0xff]  }
  0x97   :  { %5315 = vmatpush3.bf16.msra.mxu1 %v6062_v6  ;;  %v6126_v6 = vld [vmem:[%s7117_s1 + $0x1a8] sm:$0xff]  }
  0x98   :  { %5571 = vmatpush3.bf16.msra.mxu0 %v6063_v7  ;;  %5316 = vmatprep.subr.bf16.mxu1 %v6067_v11  ;;  %v6127_v7 = vld [vmem:[%s7117_s1 + $0x3a8] sm:$0xff]  }
  0x99   :  { %5572 = vmatprep.subr.bf16.mxu0 %v6069_v12 }
  0x9a   :  { %5301 = vmatmul.mubr.bf16.gmra.mrb[12].mxu1 %v6066_v10  ;;  %v6130_v10 = vld [vmem:[%s7118_s0 + $0x178] sm:$0xff]  }
  0x9b   :  { %5557 = vmatmul.mubr.bf16.gmra.mrb[12].mxu0 %v6068_v13  ;;  %5317 = vmatpush3.bf16.msra.mxu1 %v6067_v11  ;;  %v6131_v11 = vld [vmem:[%s7117_s1 + $0x1b0] sm:$0xff]   ;;  %v6132_v13 = vld [vmem:[%s7118_s0 + $0x378] sm:$0xff]  }
  0x9c   :  { %5573 = vmatpush3.bf16.msra.mxu0 %v6069_v12  ;;  %5318 = vmatprep.subr.bf16.mxu1 %v6070_v14  ;;  %v6133_v12 = vld [vmem:[%s7117_s1 + $0x3b0] sm:$0xff]  }
  0x9d   :  { %5574 = vmatprep.subr.bf16.mxu0 %v6071_v15  ;;  %5320 = vmatprep.mubr.bf16.mxu1 %v6072_v16  ;;  %v6136_v16 = vld [vmem:[%s7118_s0 + $0x180] sm:$0xff]  }
  0x9e   :  { %5576 = vmatprep.mubr.bf16.mxu0 %v6073_v17  ;;  %v6137_v17 = vld [vmem:[%s7118_s0 + $0x380] sm:$0xff]  }
  0x9f   :  { %5319 = vmatpush3.bf16.msra.mxu1 %v6070_v14  ;;  %v6134_v14 = vld [vmem:[%s7117_s1 + $0x1b8] sm:$0xff]  }
  0xa0   :  { %5575 = vmatpush3.bf16.msra.mxu0 %v6071_v15  ;;  %5336 = vmatprep.subr.bf16.mxu1 %v6075_v19  ;;  %v6135_v15 = vld [vmem:[%s7117_s1 + $0x3b8] sm:$0xff]  }
  0xa1   :  { %5592 = vmatprep.subr.bf16.mxu0 %v6077_v20 }
  0xa2   :  { %5321 = vmatmul.mubr.bf16.vlgmr.msra.gmra.mrb[0].mxu1 %v6074_v18  ;;  %v6138_v18 = vld [vmem:[%s7118_s0 + $0x188] sm:$0xff]  }
  0xa3   :  { %5577 = vmatmul.mubr.bf16.vlgmr.msra.gmra.mrb[0].mxu0 %v6076_v21  ;;  %5337 = vmatpush3.bf16.msra.mxu1 %v6075_v19  ;;  %v6139_v19 = vld [vmem:[%s7117_s1 + $0x1c0] sm:$0xff]   ;;  %v6140_v21 = vld [vmem:[%s7118_s0 + $0x388] sm:$0xff]  }
  0xa4   :  { %5593 = vmatpush3.bf16.msra.mxu0 %v6077_v20  ;;  %5338 = vmatprep.subr.bf16.mxu1 %v6078_v22  ;;  %v6141_v20 = vld [vmem:[%s7117_s1 + $0x3c0] sm:$0xff]  }
  0xa5   :  { %5594 = vmatprep.subr.bf16.mxu0 %v6079_v23  ;;  %5324 = vmatprep.mubr.bf16.mxu1 %v6080_v24  ;;  %v6144_v24 = vld [vmem:[%s7118_s0 + $0x190] sm:$0xff]  }
  0xa6   :  { %5580 = vmatprep.mubr.bf16.mxu0 %v6081_v25  ;;  %v6145_v25 = vld [vmem:[%s7118_s0 + $0x390] sm:$0xff]  }
  0xa7   :  { %5339 = vmatpush3.bf16.msra.mxu1 %v6078_v22  ;;  %v6142_v22 = vld [vmem:[%s7117_s1 + $0x1c8] sm:$0xff]  }
  0xa8   :  { %5595 = vmatpush3.bf16.msra.mxu0 %v6079_v23  ;;  %5340 = vmatprep.subr.bf16.mxu1 %v6083_v27  ;;  %v6143_v23 = vld [vmem:[%s7117_s1 + $0x3c8] sm:$0xff]  }
  0xa9   :  { %5596 = vmatprep.subr.bf16.mxu0 %v6085_v28 }
  0xaa   :  { %5325 = vmatmul.mubr.bf16.gmra.mrb[4].mxu1 %v6082_v26  ;;  %v6146_v26 = vld [vmem:[%s7118_s0 + $0x198] sm:$0xff]  }
  0xab   :  { %5581 = vmatmul.mubr.bf16.gmra.mrb[4].mxu0 %v6084_v29  ;;  %5341 = vmatpush3.bf16.msra.mxu1 %v6083_v27  ;;  %v6147_v27 = vld [vmem:[%s7117_s1 + $0x1d0] sm:$0xff]   ;;  %v6148_v29 = vld [vmem:[%s7118_s0 + $0x398] sm:$0xff]  }
  0xac   :  { %5597 = vmatpush3.bf16.msra.mxu0 %v6085_v28  ;;  %5342 = vmatprep.subr.bf16.mxu1 %v6086_v30  ;;  %v6149_v28 = vld [vmem:[%s7117_s1 + $0x3d0] sm:$0xff]  }
  0xad   :  { %5598 = vmatprep.subr.bf16.mxu0 %v6087_v31  ;;  %5328 = vmatprep.mubr.bf16.mxu1 %v6088_v32  ;;  %v6152_v32 = vld [vmem:[%s7118_s0 + $0x1a0] sm:$0xff]  }
  0xae   :  { %5584 = vmatprep.mubr.bf16.mxu0 %v6089_v33  ;;  %v6153_v33 = vld [vmem:[%s7118_s0 + $0x3a0] sm:$0xff]  }
  0xaf   :  { %5343 = vmatpush3.bf16.msra.mxu1 %v6086_v30  ;;  %v6150_v30 = vld [vmem:[%s7117_s1 + $0x1d8] sm:$0xff]  }
  0xb0   :  { %5599 = vmatpush3.bf16.msra.mxu0 %v6087_v31  ;;  %5344 = vmatprep.subr.bf16.mxu1 %v6091_v35  ;;  %v6151_v31 = vld [vmem:[%s7117_s1 + $0x3d8] sm:$0xff]  }
  0xb1   :  { %5600 = vmatprep.subr.bf16.mxu0 %v6093_v36 }
  0xb2   :  { %5329 = vmatmul.mubr.bf16.gmra.mrb[8].mxu1 %v6090_v34  ;;  %v6154_v34 = vld [vmem:[%s7118_s0 + $0x1a8] sm:$0xff]  }
  0xb3   :  { %5585 = vmatmul.mubr.bf16.gmra.mrb[8].mxu0 %v6092_v37  ;;  %5345 = vmatpush3.bf16.msra.mxu1 %v6091_v35  ;;  %v6155_v35 = vld [vmem:[%s7117_s1 + $0x1e0] sm:$0xff]   ;;  %v6156_v37 = vld [vmem:[%s7118_s0 + $0x3a8] sm:$0xff]  }
  0xb4   :  { %5601 = vmatpush3.bf16.msra.mxu0 %v6093_v36  ;;  %5346 = vmatprep.subr.bf16.mxu1 %v6094_v38  ;;  %v6157_v36 = vld [vmem:[%s7117_s1 + $0x3e0] sm:$0xff]  }
  0xb5   :  { %5602 = vmatprep.subr.bf16.mxu0 %v6095_v39  ;;  %5332 = vmatprep.mubr.bf16.mxu1 %v6096_v40  ;;  %v6160_v40 = vld [vmem:[%s7118_s0 + $0x1b0] sm:$0xff]  }
  0xb6   :  { %5588 = vmatprep.mubr.bf16.mxu0 %v6097_v41  ;;  %v6161_v41 = vld [vmem:[%s7118_s0 + $0x3b0] sm:$0xff]  }
  0xb7   :  { %5347 = vmatpush3.bf16.msra.mxu1 %v6094_v38  ;;  %v6158_v38 = vld [vmem:[%s7117_s1 + $0x1e8] sm:$0xff]  }
  0xb8   :  { %5603 = vmatpush3.bf16.msra.mxu0 %v6095_v39  ;;  %5348 = vmatprep.subr.bf16.mxu1 %v6099_v43  ;;  %v6159_v39 = vld [vmem:[%s7117_s1 + $0x3e8] sm:$0xff]  }
  0xb9   :  { %5604 = vmatprep.subr.bf16.mxu0 %v6101_v44 }
  0xba   :  { %5333 = vmatmul.mubr.bf16.gmra.mrb[12].mxu1 %v6098_v42  ;;  %v6162_v42 = vld [vmem:[%s7118_s0 + $0x1b8] sm:$0xff]  }
  0xbb   :  { %5589 = vmatmul.mubr.bf16.gmra.mrb[12].mxu0 %v6100_v45  ;;  %5349 = vmatpush3.bf16.msra.mxu1 %v6099_v43  ;;  %v6163_v43 = vld [vmem:[%s7117_s1 + $0x1f0] sm:$0xff]   ;;  %v6164_v45 = vld [vmem:[%s7118_s0 + $0x3b8] sm:$0xff]  }
  0xbc   :  { %5605 = vmatpush3.bf16.msra.mxu0 %v6101_v44  ;;  %5350 = vmatprep.subr.bf16.mxu1 %v6102_v46  ;;  %v6165_v44 = vld [vmem:[%s7117_s1 + $0x3f0] sm:$0xff]  }
  0xbd   :  { %5606 = vmatprep.subr.bf16.mxu0 %v6103_v47  ;;  %5352 = vmatprep.mubr.bf16.mxu1 %v6104_v48  ;;  %v6168_v48 = vld [vmem:[%s7118_s0 + $0x1c0] sm:$0xff]  }
  0xbe   :  { %5608 = vmatprep.mubr.bf16.mxu0 %v6105_v49  ;;  %v6169_v49 = vld [vmem:[%s7118_s0 + $0x3c0] sm:$0xff]  }
  0xbf   :  { %5351 = vmatpush3.bf16.msra.mxu1 %v6102_v46  ;;  %v6166_v46 = vld [vmem:[%s7117_s1 + $0x1f8] sm:$0xff]  }
  0xc0   :  { %5607 = vmatpush3.bf16.msra.mxu0 %v6103_v47  ;;  %5368 = vmatprep.subr.bf16.mxu1 %v6107_v51  ;;  %v6167_v47 = vld [vmem:[%s7117_s1 + $0x3f8] sm:$0xff]  }
  0xc1   :  { %5624 = vmatprep.subr.bf16.mxu0 %v6109_v52 }
  0xc2   :  { %5353 = vmatmul.mubr.bf16.vlgmr.msra.gmra.mrb[0].mxu1 %v6106_v50  ;;  %v6170_v50 = vld [vmem:[%s7118_s0 + $0x1c8] sm:$0xff]  }
  0xc3   :  { %5609 = vmatmul.mubr.bf16.vlgmr.msra.gmra.mrb[0].mxu0 %v6108_v53  ;;  %5369 = vmatpush3.bf16.msra.mxu1 %v6107_v51  ;;  %v6171_v51 = vld [vmem:[%s7118_s0 + $0x3c8] sm:$0xff]   ;;  %v6173_v53 = vld [vmem:[%s7118_s0 + $0x3d0] sm:$0xff]  }
  0xc4   :  { %5625 = vmatpush3.bf16.msra.mxu0 %v6109_v52  ;;  %5370 = vmatprep.subr.bf16.mxu1 %v6110_v54  ;;  %v6172_v52 = vld [vmem:[%s7118_s0 + $0x1d0] sm:$0xff]  }
  0xc5   :  { %5626 = vmatprep.subr.bf16.mxu0 %v6111_v55  ;;  %5356 = vmatprep.mubr.bf16.mxu1 %v6112_v56  ;;  %v6176_v56 = vld [vmem:[%s7118_s0 + $0x1e0] sm:$0xff]  }
  0xc6   :  { %5612 = vmatprep.mubr.bf16.mxu0 %v6113_v57  ;;  %v6177_v57 = vld [vmem:[%s7118_s0 + $0x3e0] sm:$0xff]  }
  0xc7   :  { %5371 = vmatpush3.bf16.msra.mxu1 %v6110_v54  ;;  %v6174_v54 = vld [vmem:[%s7118_s0 + $0x1d8] sm:$0xff]  }
  0xc8   :  { %5627 = vmatpush3.bf16.msra.mxu0 %v6111_v55  ;;  %5372 = vmatprep.subr.bf16.mxu1 %v6115_v59  ;;  %v6175_v55 = vld [vmem:[%s7118_s0 + $0x3d8] sm:$0xff]  }
  0xc9   :  { %5628 = vmatprep.subr.bf16.mxu0 %v6117_v60 }
  0xca   :  { %5357 = vmatmul.mubr.bf16.gmra.mrb[4].mxu1 %v6114_v58  ;;  %v6178_v58 = vld [vmem:[%s7118_s0 + $0x1e8] sm:$0xff]  }
  0xcb   :  { %5613 = vmatmul.mubr.bf16.gmra.mrb[4].mxu0 %v6116_v61  ;;  %5373 = vmatpush3.bf16.msra.mxu1 %v6115_v59  ;;  %v6179_v59 = vld [vmem:[%s7118_s0 + $0x3e8] sm:$0xff]   ;;  %v6181_v61 = vld [vmem:[%s7118_s0 + $0x3f0] sm:$0xff]  }
  0xcc   :  { %5629 = vmatpush3.bf16.msra.mxu0 %v6117_v60  ;;  %5374 = vmatprep.subr.bf16.mxu1 %v6118_v62  ;;  %v6180_v60 = vld [vmem:[%s7118_s0 + $0x1f0] sm:$0xff]  }
  0xcd   :  { %5630 = vmatprep.subr.bf16.mxu0 %v6119_v63  ;;  %5360 = vmatprep.mubr.bf16.mxu1 %v6120_v0 }
  0xce   :  { %5616 = vmatprep.mubr.bf16.mxu0 %v6121_v1 }
  0xcf   :  { %5375 = vmatpush3.bf16.msra.mxu1 %v6118_v62  ;;  %v6182_v62 = vld [vmem:[%s7118_s0 + $0x1f8] sm:$0xff]  }
  0xd0   :  { %5631 = vmatpush3.bf16.msra.mxu0 %v6119_v63  ;;  %5376 = vmatprep.subr.bf16.mxu1 %v6123_v3  ;;  %v6183_v63 = vld [vmem:[%s7118_s0 + $0x3f8] sm:$0xff]  }
  0xd1   :  { %5632 = vmatprep.subr.bf16.mxu0 %v6125_v4 }
  0xd2   :  { %5361 = vmatmul.mubr.bf16.gmra.mrb[8].mxu1 %v6122_v2 }
  0xd3   :  { %5617 = vmatmul.mubr.bf16.gmra.mrb[8].mxu0 %v6124_v5  ;;  %5377 = vmatpush3.bf16.msra.mxu1 %v6123_v3 }
  0xd4   :  { %5633 = vmatpush3.bf16.msra.mxu0 %v6125_v4  ;;  %5378 = vmatprep.subr.bf16.mxu1 %v6126_v6  ;;  %v6979_v4 = vld [vmem:[%s7119_s2] ss:$0 sm:$0xff] }
  0xd5   :  { %5634 = vmatprep.subr.bf16.mxu0 %v6127_v7  ;;  %5364 = vmatprep.mubr.bf16.mxu1 %v6128_v8 }
  0xd6   :  { %5620 = vmatprep.mubr.bf16.mxu0 %v6129_v9 }
  0xd7   :  { %5379 = vmatpush3.bf16.msra.mxu1 %v6126_v6 }
  0xd8   :  { %5635 = vmatpush3.bf16.msra.mxu0 %v6127_v7  ;;  %5380 = vmatprep.subr.bf16.mxu1 %v6131_v11 }
  0xd9   :  { %5636 = vmatprep.subr.bf16.mxu0 %v6133_v12 }
  0xda   :  { %5365 = vmatmul.mubr.bf16.gmra.mrb[12].mxu1 %v6130_v10 }
  0xdb   :  { %5621 = vmatmul.mubr.bf16.gmra.mrb[12].mxu0 %v6132_v13  ;;  %5381 = vmatpush3.bf16.msra.mxu1 %v6131_v11 }
  0xdc   :  { %5637 = vmatpush3.bf16.msra.mxu0 %v6133_v12  ;;  %5382 = vmatprep.subr.bf16.mxu1 %v6134_v14 }
  0xdd   :  { %5638 = vmatprep.subr.bf16.mxu0 %v6135_v15  ;;  %5384 = vmatprep.mubr.bf16.mxu1 %v6136_v16 }
  0xde   :  { %5640 = vmatprep.mubr.bf16.mxu0 %v6137_v17 }
  0xdf   :  { %5383 = vmatpush3.bf16.msra.mxu1 %v6134_v14 }
  0xe0   :  { %5639 = vmatpush3.bf16.msra.mxu0 %v6135_v15  ;;  %5400 = vmatprep.subr.bf16.mxu1 %v6139_v19 }
  0xe1   :  { %5656 = vmatprep.subr.bf16.mxu0 %v6141_v20 }
  0xe2   :  { %5385 = vmatmul.mubr.bf16.vlgmr.msra.gmra.mrb[0].mxu1 %v6138_v18 }
  0xe3   :  { %5641 = vmatmul.mubr.bf16.vlgmr.msra.gmra.mrb[0].mxu0 %v6140_v21  ;;  %5401 = vmatpush3.bf16.msra.mxu1 %v6139_v19 }
  0xe4   :  { %5657 = vmatpush3.bf16.msra.mxu0 %v6141_v20  ;;  %5402 = vmatprep.subr.bf16.mxu1 %v6142_v22 }
  0xe5   :  { %5658 = vmatprep.subr.bf16.mxu0 %v6143_v23  ;;  %5388 = vmatprep.mubr.bf16.mxu1 %v6144_v24 }
  0xe6   :  { %5644 = vmatprep.mubr.bf16.mxu0 %v6145_v25 }
  0xe7   :  { %5403 = vmatpush3.bf16.msra.mxu1 %v6142_v22 }
  0xe8   :  { %5659 = vmatpush3.bf16.msra.mxu0 %v6143_v23  ;;  %5404 = vmatprep.subr.bf16.mxu1 %v6147_v27 }
  0xe9   :  { %5660 = vmatprep.subr.bf16.mxu0 %v6149_v28 }
  0xea   :  { %5389 = vmatmul.mubr.bf16.gmra.mrb[4].mxu1 %v6146_v26 }
  0xeb   :  { %5645 = vmatmul.mubr.bf16.gmra.mrb[4].mxu0 %v6148_v29  ;;  %5405 = vmatpush3.bf16.msra.mxu1 %v6147_v27 }
  0xec   :  { %5661 = vmatpush3.bf16.msra.mxu0 %v6149_v28  ;;  %5406 = vmatprep.subr.bf16.mxu1 %v6150_v30 }
  0xed   :  { %5662 = vmatprep.subr.bf16.mxu0 %v6151_v31  ;;  %5392 = vmatprep.mubr.bf16.mxu1 %v6152_v32 }
  0xee   :  { %5648 = vmatprep.mubr.bf16.mxu0 %v6153_v33 }
  0xef   :  { %5407 = vmatpush3.bf16.msra.mxu1 %v6150_v30 }
  0xf0   :  { %5663 = vmatpush3.bf16.msra.mxu0 %v6151_v31  ;;  %5408 = vmatprep.subr.bf16.mxu1 %v6155_v35 }
  0xf1   :  { %5664 = vmatprep.subr.bf16.mxu0 %v6157_v36 }
  0xf2   :  { %5393 = vmatmul.mubr.bf16.gmra.mrb[8].mxu1 %v6154_v34 }
  0xf3   :  { %5649 = vmatmul.mubr.bf16.gmra.mrb[8].mxu0 %v6156_v37  ;;  %5409 = vmatpush3.bf16.msra.mxu1 %v6155_v35 }
  0xf4   :  { %5665 = vmatpush3.bf16.msra.mxu0 %v6157_v36  ;;  %5410 = vmatprep.subr.bf16.mxu1 %v6158_v38 }
  0xf5   :  { %5666 = vmatprep.subr.bf16.mxu0 %v6159_v39  ;;  %5396 = vmatprep.mubr.bf16.mxu1 %v6160_v40 }
  0xf6   :  { %5652 = vmatprep.mubr.bf16.mxu0 %v6161_v41 }
  0xf7   :  { %5411 = vmatpush3.bf16.msra.mxu1 %v6158_v38 }
  0xf8   :  { %5667 = vmatpush3.bf16.msra.mxu0 %v6159_v39  ;;  %5412 = vmatprep.subr.bf16.mxu1 %v6163_v43 }
  0xf9   :  { %5668 = vmatprep.subr.bf16.mxu0 %v6165_v44 }
  0xfa   :  { %5397 = vmatmul.mubr.bf16.gmra.mrb[12].mxu1 %v6162_v42 }
  0xfb   :  { %5653 = vmatmul.mubr.bf16.gmra.mrb[12].mxu0 %v6164_v45  ;;  %5413 = vmatpush3.bf16.msra.mxu1 %v6163_v43 }
  0xfc   :  { %5669 = vmatpush3.bf16.msra.mxu0 %v6165_v44  ;;  %5414 = vmatprep.subr.bf16.mxu1 %v6166_v46 }
  0xfd   :  { %5670 = vmatprep.subr.bf16.mxu0 %v6167_v47  ;;  %5416 = vmatprep.mubr.bf16.mxu1 %v6168_v48 }
  0xfe   :  { %5672 = vmatprep.mubr.bf16.mxu0 %v6169_v49 }
  0xff   :  { %5415 = vmatpush3.bf16.msra.mxu1 %v6166_v46 }
 0x100   :  { %5671 = vmatpush3.bf16.msra.mxu0 %v6167_v47 }
 0x102   :  { %5417 = vmatmul.mubr.bf16.vlgmr.msra.gmra.mrb[0].mxu1 %v6170_v50 }
 0x103   :  { %5673 = vmatmul.mubr.bf16.vlgmr.msra.gmra.mrb[0].mxu0 %v6171_v51  ;;  %5420 = vmatprep.mubr.bf16.mxu1 %v6172_v52 }
 0x104   :  { %5676 = vmatprep.mubr.bf16.mxu0 %v6173_v53 }
 0x10a   :  { %5421 = vmatmul.mubr.bf16.gmra.mrb[4].mxu1 %v6174_v54 }
 0x10b   :  { %5677 = vmatmul.mubr.bf16.gmra.mrb[4].mxu0 %v6175_v55  ;;  %5424 = vmatprep.mubr.bf16.mxu1 %v6176_v56 }
 0x10c   :  { %5680 = vmatprep.mubr.bf16.mxu0 %v6177_v57 }
 0x112   :  { %5425 = vmatmul.mubr.bf16.gmra.mrb[8].mxu1 %v6178_v58 }
 0x113   :  { %5681 = vmatmul.mubr.bf16.gmra.mrb[8].mxu0 %v6179_v59  ;;  %5428 = vmatprep.mubr.bf16.mxu1 %v6180_v60 }
 0x114   :  { %5684 = vmatprep.mubr.bf16.mxu0 %v6181_v61 }
 0x11a   :  { %5429 = vmatmul.mubr.bf16.gmra.mrb[12].mxu1 %v6182_v62 }
 0x11b   :  { %5685 = vmatmul.mubr.bf16.gmra.mrb[12].mxu0 %v6183_v63 }
 0x1d5   :  { %v5418_v0 = vpop.f32.mrb[0].mxu1 }
 0x1d6   :  { %v5674_v1 = vpop.f32.mrb[0].mxu0  ;;  %v1846_v2 = vpop.f32.mrb[1].mxu1 }
 0x1d7   :  { %v5688_v3 = vadd.f32 %v5674_v1, %v5418_v0  ;;  %v3790_v5 = vpop.f32.mrb[1].mxu0  ;;  %v5419_v6 = vpop.f32.mrb[2].mxu1 }
 0x1d8   :  { %v5689_v7 = vadd.f32 %v3790_v5, %v1846_v2  ;;  %v5675_v8 = vpop.f32.mrb[2].mxu0  ;;  %v1849_v9 = vpop.f32.mrb[3].mxu1 }
 0x1d9   :  { %v5690_v10 = vadd.f32 %v5675_v8, %v5419_v6  ;;  %v3793_v11 = vpop.f32.mrb[3].mxu0  ;;  %v6985_v14 = vadd.f32 %v5688_v3, %v6979_v4 }
 0x1da   :  { %v6982_v12 = vadd.f32 %v5689_v7, %v6979_v4  ;;  %v5691_v13 = vadd.f32 %v3793_v11, %v1849_v9 }
 0x1db   :  { %v6991_v16 = vadd.f32 %v5690_v10, %v6979_v4  ;;  %v3922_v26 = vmul.f32 %v6985_v14, %v6985_v14 }
 0x1dc   :  { %v6988_v15 = vadd.f32 %v5691_v13, %v6979_v4  ;;  %v3920_v18 = vmul.f32 %v6982_v12, %v6982_v12 }
 0x1dd   :  { %v5422_v17 = vpop.f32.mrb[4].mxu1  ;;  %v3923_v32 = vmul.f32 %v6991_v16, %v6991_v16 }
 0x1de   :  { %v3892_v19 = vadd.f32 %v6988_v15, %v6982_v12  ;;  %v3921_v20 = vmul.f32 %v6988_v15, %v6988_v15  ;;  %v5678_v21 = vpop.f32.mrb[4].mxu0  ;;  %v1862_v22 = vpop.f32.mrb[5].mxu1 }
 0x1df   :  { %v5692_v23 = vadd.f32 %v5678_v21, %v5422_v17  ;;  %v3806_v24 = vpop.f32.mrb[5].mxu0  ;;  %v5423_v25 = vpop.f32.mrb[6].mxu1 }
 0x1e0   :  { %v3893_v27 = vadd.f32 %v3892_v19, %v6985_v14  ;;  %v3936_v28 = vadd.f32 %v3921_v20, %v3920_v18  ;;  %v5693_v29 = vadd.f32 %v3806_v24, %v1862_v22  ;;  %v5679_v30 = vpop.f32.mrb[6].mxu0  ;;  %v1865_v31 = vpop.f32.mrb[7].mxu1 }
 0x1e1   :  { %v5694_v33 = vadd.f32 %v5679_v30, %v5423_v25  ;;  %v3809_v34 = vpop.f32.mrb[7].mxu0  ;;  %v7009_v39 = vadd.f32 %v5692_v23, %v6979_v4 }
 0x1e2   :  { %v3937_v35 = vadd.f32 %v3936_v28, %v3922_v26  ;;  %v7005_v36 = vadd.f32 %v5693_v29, %v6979_v4  ;;  %v3894_v37 = vadd.f32 %v3893_v27, %v6991_v16  ;;  %v5695_v38 = vadd.f32 %v3809_v34, %v1865_v31 }
 0x1e3   :  { %v7018_v44 = vadd.f32 %v5694_v33, %v6979_v4  ;;  %v3926_v54 = vmul.f32 %v7009_v39, %v7009_v39 }
 0x1e4   :  { %v3895_v40 = vadd.f32 %v3894_v37, %v7005_v36  ;;  %v3924_v41 = vmul.f32 %v7005_v36, %v7005_v36  ;;  %v3938_v42 = vadd.f32 %v3937_v35, %v3923_v32  ;;  %v7015_v43 = vadd.f32 %v5695_v38, %v6979_v4 }
 0x1e5   :  { %v5426_v45 = vpop.f32.mrb[8].mxu1  ;;  %v3927_v60 = vmul.f32 %v7018_v44, %v7018_v44 }
 0x1e6   :  { %v3939_v46 = vadd.f32 %v3938_v42, %v3924_v41  ;;  %v3896_v47 = vadd.f32 %v3895_v40, %v7015_v43  ;;  %v3925_v48 = vmul.f32 %v7015_v43, %v7015_v43  ;;  %v5682_v49 = vpop.f32.mrb[8].mxu0  ;;  %v1878_v50 = vpop.f32.mrb[9].mxu1 }
 0x1e7   :  { %v5696_v51 = vadd.f32 %v5682_v49, %v5426_v45  ;;  %v3822_v52 = vpop.f32.mrb[9].mxu0  ;;  %v5427_v53 = vpop.f32.mrb[10].mxu1 }
 0x1e8   :  { %v3897_v55 = vadd.f32 %v3896_v47, %v7009_v39  ;;  %v3940_v56 = vadd.f32 %v3939_v46, %v3925_v48  ;;  %v5697_v57 = vadd.f32 %v3822_v52, %v1878_v50  ;;  %v5683_v58 = vpop.f32.mrb[10].mxu0  ;;  %v1881_v59 = vpop.f32.mrb[11].mxu1 }
 0x1e9   :  { %v5698_v61 = vadd.f32 %v5683_v58, %v5427_v53  ;;  %v3825_v62 = vpop.f32.mrb[11].mxu0  ;;  %v7033_v3 = vadd.f32 %v5696_v51, %v6979_v4 }
 0x1ea   :  { %v3898_v63 = vadd.f32 %v3897_v55, %v7018_v44  ;;  %v3941_v0 = vadd.f32 %v3940_v56, %v3926_v54  ;;  %v7030_v1 = vadd.f32 %v5697_v57, %v6979_v4  ;;  %v5699_v2 = vadd.f32 %v3825_v62, %v1881_v59 }
 0x1eb   :  { %v7041_v9 = vadd.f32 %v5698_v61, %v6979_v4  ;;  %v3930_v21 = vmul.f32 %v7033_v3, %v7033_v3 }
 0x1ec   :  { %v3899_v5 = vrot.slane %v3898_v63, 4  ;;  %v3942_v6 = vadd.f32 %v3941_v0, %v3927_v60  ;;  %v7036_v7 = vadd.f32 %v5699_v2, %v6979_v4  ;;  %v3928_v8 = vmul.f32 %v7030_v1, %v7030_v1 }
 0x1ed   :  { %v5430_v10 = vpop.f32.mrb[12].mxu1  ;;  %v3931_v31 = vmul.f32 %v7041_v9, %v7041_v9 }
 0x1ee   :  { %v3900_v11 = vadd.f32 %v3899_v5, %v3898_v63  ;;  %v3943_v13 = vrot.slane %v3942_v6, 4  ;;  %v3905_v17 = vadd.f32 %v7036_v7, %v7030_v1  ;;  %v3929_v18 = vmul.f32 %v7036_v7, %v7036_v7  ;;  %v5686_v19 = vpop.f32.mrb[12].mxu0  ;;  %v1894_v20 = vpop.f32.mrb[13].mxu1 }
 0x1ef   :  { %v5700_v22 = vadd.f32 %v5686_v19, %v5430_v10  ;;  %v3838_v23 = vpop.f32.mrb[13].mxu0  ;;  %v5431_v24 = vpop.f32.mrb[14].mxu1 }
 0x1f0   :  { %v3901_v25 = vrot.slane %v3900_v11, 2  ;;  %v3944_v26 = vadd.f32 %v3943_v13, %v3942_v6  ;;  %v3906_v27 = vadd.f32 %v3905_v17, %v7033_v3  ;;  %v3949_v28 = vadd.f32 %v3929_v18, %v3928_v8  ;;  %v5687_v29 = vpop.f32.mrb[14].mxu0  ;;  %v1897_v30 = vpop.f32.mrb[15].mxu1 }
 0x1f1   :  { %v5701_v32 = vadd.f32 %v3838_v23, %v1894_v20  ;;  %v5702_v33 = vadd.f32 %v5687_v29, %v5431_v24  ;;  %v3841_v34 = vpop.f32.mrb[15].mxu0  ;;  %v7057_v48 = vadd.f32 %v5700_v22, %v6979_v4 }
 0x1f2   :  { %v3902_v35 = vadd.f32 %v3901_v25, %v3900_v11  ;;  %v3945_v37 = vrot.slane %v3944_v26, 2  ;;  %v3950_v38 = vadd.f32 %v3949_v28, %v3930_v21  ;;  %v3907_v40 = vadd.f32 %v3906_v27, %v7041_v9 }
 0x1f3   :  { %v7054_v41 = vadd.f32 %v5701_v32, %v6979_v4  ;;  %v5703_v42 = vadd.f32 %v3841_v34, %v1897_v30  ;;  %v3934_v59 = vmul.f32 %v7057_v48, %v7057_v48  ;;  %v7071_v60 = vadd.f32 %v5702_v33, %v6979_v4 }
 0x1f4   :  { %v3903_v45 = vrot.slane %v3902_v35, 1  ;;  %v3946_v46 = vadd.f32 %v3945_v37, %v3944_v26  ;;  %v3951_v47 = vadd.f32 %v3950_v38, %v3931_v31 }
 0x1f5   :  { %v3908_v49 = vadd.f32 %v3907_v40, %v7054_v41  ;;  %v3932_v50 = vmul.f32 %v7054_v41, %v7054_v41  ;;  %v7063_v51 = vadd.f32 %v5703_v42, %v6979_v4 }
 0x1f6   :  { %v3904_v52 = vadd.f32 %v3903_v45, %v3902_v35  ;;  %v3947_v53 = vrot.slane %v3946_v46, 1 }
 0x1f7   :  { %v3952_v54 = vadd.f32 %v3951_v47, %v3932_v50  ;;  %v3909_v55 = vadd.f32 %v3908_v49, %v7063_v51  ;;  %v3933_v56 = vmul.f32 %v7063_v51, %v7063_v51 }
 0x1f8   :  { %v3918_v57 = vmul.f32 0.015625, %v3904_v52  ;;  %v3948_v58 = vadd.f32 %v3947_v53, %v3946_v46 }
 0x1f9   :  { %v3910_v61 = vadd.f32 %v3909_v55, %v7057_v48  ;;  %v3953_v62 = vadd.f32 %v3952_v54, %v3933_v56 }
 0x1fa   :  { %v3962_v63 = vmul.f32 0.015625, %v3948_v58  ;;  %v3964_v0 = vmul.f32 %v3918_v57, %v3918_v57  ;;  %v3968_v2 = vsub.f32 %v6982_v12, %v3918_v57  ;;  %v3969_v5 = vsub.f32 %v6988_v15, %v3918_v57 }
 0x1fb   :  { %v3970_v6 = vsub.f32 %v6985_v14, %v3918_v57  ;;  %v3971_v8 = vsub.f32 %v6991_v16, %v3918_v57  ;;  %v3972_v10 = vsub.f32 %v7005_v36, %v3918_v57  ;;  %v3973_v11 = vsub.f32 %v7015_v43, %v3918_v57 }
 0x1fc   :  { %v3966_v13 = vsub.f32 %v3962_v63, %v3964_v0  ;;  %v3974_v4 = vsub.f32 %v7009_v39, %v3918_v57  ;;  %v3975_v17 = vsub.f32 %v7018_v44, %v3918_v57  ;;  %v3911_v18 = vadd.f32 %v3910_v61, %v7071_v60 }
 0x1fd   :  { %v3935_v12 = vmul.f32 %v7071_v60, %v7071_v60  ;;  %v3954_v19 = vadd.f32 %v3953_v62, %v3934_v59 }
 0x1fe   :  { %v3984_v15 = vadd.f32 1e-05, %v3966_v13  ;;  %v3912_v20 = vrot.slane %v3911_v18, 4 }
 0x1ff   :  { %v3955_v14 = vadd.f32 %v3954_v19, %v3935_v12 }
 0x200   :  { %6184 = vrsqrt.f32 %v3984_v15  ;;  %v3913_v16 = vadd.f32 %v3912_v20, %v3911_v18 }
 0x201   :  { %v3956_v21 = vrot.slane %v3955_v14, 4 }
 0x202   :  { %v3914_v36 = vrot.slane %v3913_v16, 2 }
 0x203   :  { %v3957_v22 = vadd.f32 %v3956_v21, %v3955_v14 }
 0x204   :  { %v3915_v43 = vadd.f32 %v3914_v36, %v3913_v16 }
 0x205   :  { %v3958_v23 = vrot.slane %v3957_v22, 2 }
 0x206   :  { %v3916_v24 = vrot.slane %v3915_v43, 1 }
 0x207   :  { %v3959_v39 = vadd.f32 %v3958_v23, %v3957_v22 }
 0x208   :  { %v3917_v25 = vadd.f32 %v3916_v24, %v3915_v43 }
 0x209   :  { %v3960_v27 = vrot.slane %v3959_v39, 1 }
 0x20a   :  { %v6185_v44 = vpop.eup %6184  ;;  %v3919_v26 = vmul.f32 0.015625, %v3917_v25 }
 0x20b   :  { %v3988_v28 = vmul.f32 %v6185_v44, %v3968_v2  ;;  %v3989_v29 = vmul.f32 %v6185_v44, %v3969_v5  ;;  %v3990_v30 = vmul.f32 %v6185_v44, %v3970_v6  ;;  %v3991_v31 = vmul.f32 %v6185_v44, %v3971_v8 }
 0x20c   :  { %v3992_v32 = vmul.f32 %v6185_v44, %v3972_v10  ;;  %v3993_v33 = vmul.f32 %v6185_v44, %v3973_v11  ;;  %v3994_v34 = vmul.f32 %v6185_v44, %v3974_v4  ;;  %v3995_v35 = vmul.f32 %v6185_v44, %v3975_v17 }
 0x20d   :  { %v4004_v37 = vmax.f32 %v3988_v28, 0.0  ;;  %v4005_v38 = vmax.f32 %v3989_v29, 0.0  ;;  %v4006_v40 = vmax.f32 %v3990_v30, 0.0  ;;  %v4007_v42 = vmax.f32 %v3991_v31, 0.0 }
 0x20e   :  { %v4008_v45 = vmax.f32 %v3992_v32, 0.0  ;;  %v4009_v46 = vmax.f32 %v3993_v33, 0.0  ;;  %v4010_v47 = vmax.f32 %v3994_v34, 0.0  ;;  %v4011_v49 = vmax.f32 %v3995_v35, 0.0 }
 0x20f   :  { %v4876_v50 = vpack.c.bf16 %v4005_v38, %v4004_v37  ;;  %v4881_v52 = vpack.c.bf16 %v4007_v42, %v4006_v40  ;;  %v3961_v53 = vadd.f32 %v3960_v27, %v3959_v39  ;;  %v3965_v54 = vmul.f32 %v3919_v26, %v3919_v26 }
 0x210   :  { %v4886_v55 = vpack.c.bf16 %v4009_v46, %v4008_v45  ;;  %v4891_v56 = vpack.c.bf16 %v4011_v49, %v4010_v47  ;;  %v3976_v57 = vsub.f32 %v7030_v1, %v3919_v26  ;;  %v3977_v58 = vsub.f32 %v7036_v7, %v3919_v26 }
 0x211   :  { %4877 = vst [vmem:[%s7120_s3] sm:$0xff] %v4876_v50   ;;  %4913 = vst [vmem:[%s7120_s3 + $0x8] sm:$0xff] %v4881_v52   ;;  %v3963_v59 = vmul.f32 0.015625, %v3961_v53  ;;  %v3978_v61 = vsub.f32 %v7033_v3, %v3919_v26  ;;  %v3979_v62 = vsub.f32 %v7041_v9, %v3919_v26  ;;  %v3980_v63 = vsub.f32 %v7054_v41, %v3919_v26 }
 0x212   :  { %4914 = vst [vmem:[%s7120_s3 + $0x10] sm:$0xff] %v4886_v55   ;;  %4915 = vst [vmem:[%s7120_s3 + $0x18] sm:$0xff] %v4891_v56   ;;  %v3981_v1 = vsub.f32 %v7063_v51, %v3919_v26  ;;  %v3982_v7 = vsub.f32 %v7057_v48, %v3919_v26  ;;  %v3983_v0 = vsub.f32 %v7071_v60, %v3919_v26 }
 0x213   :  { %v3967_v2 = vsub.f32 %v3963_v59, %v3965_v54 }
 0x215   :  { %v3985_v3 = vadd.f32 1e-05, %v3967_v2 }
 0x217   :  { %6186 = vrsqrt.f32 %v3985_v3 }
 0x221   :  { %v6187_v9 = vpop.eup %6186 }
 0x222   :  { %v3996_v5 = vmul.f32 %v6187_v9, %v3976_v57  ;;  %v3997_v41 = vmul.f32 %v6187_v9, %v3977_v58  ;;  %v3998_v6 = vmul.f32 %v6187_v9, %v3978_v61  ;;  %v3999_v8 = vmul.f32 %v6187_v9, %v3979_v62 }
 0x223   :  { %v4000_v10 = vmul.f32 %v6187_v9, %v3980_v63  ;;  %v4001_v11 = vmul.f32 %v6187_v9, %v3981_v1  ;;  %v4002_v13 = vmul.f32 %v6187_v9, %v3982_v7  ;;  %v4003_v4 = vmul.f32 %v6187_v9, %v3983_v0 }
 0x224   :  { %v4012_v17 = vmax.f32 %v3996_v5, 0.0  ;;  %v4013_v18 = vmax.f32 %v3997_v41, 0.0  ;;  %v4014_v12 = vmax.f32 %v3998_v6, 0.0  ;;  %v4015_v51 = vmax.f32 %v3999_v8, 0.0 }
 0x225   :  { %v4016_v19 = vmax.f32 %v4000_v10, 0.0  ;;  %v4017_v48 = vmax.f32 %v4001_v11, 0.0  ;;  %v4018_v15 = vmax.f32 %v4002_v13, 0.0  ;;  %v4019_v60 = vmax.f32 %v4003_v4, 0.0 }
 0x226   :  { %v4896_v20 = vpack.c.bf16 %v4013_v18, %v4012_v17  ;;  %v4901_v14 = vpack.c.bf16 %v4015_v51, %v4014_v12 }
 0x227   :  { %v4906_v16 = vpack.c.bf16 %v4017_v48, %v4016_v19  ;;  %v4911_v21 = vpack.c.bf16 %v4019_v60, %v4018_v15 }
 0x228   :  { %4916 = vst [vmem:[%s7120_s3 + $0x20] sm:$0xff] %v4896_v20   ;;  %4917 = vst [vmem:[%s7120_s3 + $0x28] sm:$0xff] %v4901_v14  }
 0x229   :  { %4918 = vst [vmem:[%s7120_s3 + $0x30] sm:$0xff] %v4906_v16   ;;  %4919 = vst [vmem:[%s7120_s3 + $0x38] sm:$0xff] %v4911_v21  }

// kernel: content_discriminator_forward.7
= control target key start
LH: loop header
LB: loop body
LE: loop exit
PB: predicated region body
PF: predicated region fallthrough
CT: control target
= control target key end

     0   :  { %v1965_v22 = vmov 1966171168   ;;  %v294_v24 = vlaneseq  ;;  %vm1507_vm0 = vcmask 1041408   ;;  %vm1519_vm1 = vcmask 1024   ;;  %s2432_s1 = inlined_call_operand.vmem [shape: bf16[2048,128], index: 1, kind: input, shape index: {}]   ;;  %s2433_s0 = inlined_call_operand.vmem [shape: bf16[2,2048], index: 0, kind: input, shape index: {}]   ;;  %s2434_s2 = inlined_call_operand.vmem [shape: f32[1,128], index: 2, kind: input, shape index: {}]   ;;  %s2435_s4 = inlined_call_operand.<no memory space> [shape: f32[1,1], index: 4, kind: input, shape index: {}]   ;;  %s2436_s3 = inlined_call_operand.vmem [shape: f32[1,128], index: 3, kind: input, shape index: {}]   ;;  %s2437_s5 = inlined_call_operand.vmem [shape: f32[2,1], index: 5, kind: output, shape index: {}]  }
   0x1   :  { %v1833_v0 = vld [vmem:[%s2432_s1 + $0x40] sm:$0xff]   ;;  %v1837_v4 = vld [vmem:[%s2432_s1 + $0x48] sm:$0xff]   ;;  %v1841_v8 = vld [vmem:[%s2432_s1 + $0x50] sm:$0xff]   ;;  %v292_v23 = vunpack.c.l.s4 %v1965_v22 }
   0x2   :  { %v1834_v1 = vld [vmem:[%s2432_s1 + $0xc0] sm:$0xff]   ;;  %1656 = vmatprep.subr.bf16.mxu0 %v1833_v0  ;;  %v1838_v5 = vld [vmem:[%s2432_s1 + $0xc8] sm:$0xff]   ;;  %v1842_v9 = vld [vmem:[%s2432_s1 + $0xd0] sm:$0xff]   ;;  %v295_v30 = vshrl.u32 %v294_v24, 7 }
   0x3   :  { %v1835_v2 = vld [vmem:[%s2432_s1] sm:$0xff]   ;;  %1678 = vmatprep.subr.bf16.mxu1 %v1834_v1  ;;  %v1839_v6 = vld [vmem:[%s2432_s1 + $0x8] sm:$0xff]   ;;  %v1843_v10 = vld [vmem:[%s2432_s1 + $0x10] sm:$0xff]   ;;  %v293_v29 = vunpack.c.0.s8 %v292_v23 }
   0x4   :  { %v1836_v3 = vld [vmem:[%s2432_s1 + $0x80] sm:$0xff]   ;;  %1657 = vmatpush3.bf16.msra.mxu0 %v1835_v2  ;;  %v1840_v7 = vld [vmem:[%s2432_s1 + $0x88] sm:$0xff]   ;;  %v1844_v11 = vld [vmem:[%s2432_s1 + $0x90] sm:$0xff]  }
   0x5   :  { %1679 = vmatpush3.bf16.msra.mxu1 %v1836_v3  ;;  %1658 = vmatprep.subr.bf16.mxu0 %v1837_v4  ;;  %v1845_v12 = vld [vmem:[%s2432_s1 + $0x58] sm:$0xff]   ;;  %v1849_v16 = vld [vmem:[%s2432_s1 + $0x60] sm:$0xff]   ;;  %v1853_v20 = vld [vmem:[%s2432_s1 + $0x68] sm:$0xff]   ;;  %v2086_v35 = vsub.s32 %v293_v29, %v295_v30 }
   0x6   :  { %1680 = vmatprep.subr.bf16.mxu1 %v1838_v5  ;;  %v1846_v13 = vld [vmem:[%s2432_s1 + $0xd8] sm:$0xff]   ;;  %v1850_v17 = vld [vmem:[%s2432_s1 + $0xe0] sm:$0xff]   ;;  %v1854_v21 = vld [vmem:[%s2432_s1 + $0xe8] sm:$0xff]  }
   0x7   :  { %v1847_v14 = vld [vmem:[%s2432_s1 + $0x18] sm:$0xff]   ;;  %v1851_v18 = vld [vmem:[%s2432_s1 + $0x20] sm:$0xff]   ;;  %v1855_v25 = vld [vmem:[%s2432_s1 + $0x28] sm:$0xff]  }
   0x8   :  { %1659 = vmatpush3.bf16.msra.mxu0 %v1839_v6  ;;  %v1848_v15 = vld [vmem:[%s2432_s1 + $0x98] sm:$0xff]   ;;  %v1852_v19 = vld [vmem:[%s2432_s1 + $0xa0] sm:$0xff]   ;;  %v1856_v26 = vld [vmem:[%s2432_s1 + $0xa8] sm:$0xff]  }
   0x9   :  { %1681 = vmatpush3.bf16.msra.mxu1 %v1840_v7  ;;  %1660 = vmatprep.subr.bf16.mxu0 %v1841_v8  ;;  %v1857_v27 = vld [vmem:[%s2432_s1 + $0x70] sm:$0xff]   ;;  %v1861_v33 = vld [vmem:[%s2432_s1 + $0x78] sm:$0xff]   ;;  %v23_v38 = vld [vmem:[%s2433_s0] sm:$0xff] }
   0xa   :  { %1682 = vmatprep.subr.bf16.mxu1 %v1842_v9  ;;  %v1858_v28 = vld [vmem:[%s2432_s1 + $0xf0] sm:$0xff]   ;;  %v1862_v34 = vld [vmem:[%s2432_s1 + $0xf8] sm:$0xff]   ;;  %v290_v39 = vcombine.high %v23_v38, %v23_v38  ;;  %v297_v40 = vrot.slane %v23_v38, %v2086_v35  ;;  %v1867_v41 = vld [vmem:[%s2432_s1 + $0x140] sm:$0xff]  }
   0xb   :  { %v1859_v31 = vld [vmem:[%s2432_s1 + $0x30] sm:$0xff]   ;;  %v1863_v36 = vld [vmem:[%s2432_s1 + $0x38] sm:$0xff]   ;;  %v1868_v42 = vld [vmem:[%s2432_s1 + $0x1c0] sm:$0xff]  }
   0xc   :  { %1661 = vmatpush3.bf16.msra.mxu0 %v1843_v10  ;;  %v1860_v32 = vld [vmem:[%s2432_s1 + $0xb0] sm:$0xff]   ;;  %v1864_v37 = vld [vmem:[%s2432_s1 + $0xb8] sm:$0xff]   ;;  %v305_v43 = vcombine.high %v297_v40, %v297_v40  ;;  %v313_v44 = vrot.slane %v297_v40, %v2086_v35  ;;  %v2106_v45 = vrot.slane %v290_v39, %v2086_v35  ;;  %v1869_v47 = vld [vmem:[%s2432_s1 + $0x100] sm:$0xff]  }
   0xd   :  { %1683 = vmatpush3.bf16.msra.mxu1 %v1844_v11  ;;  %1662 = vmatprep.subr.bf16.mxu0 %v1845_v12  ;;  %v1871_v50 = vld [vmem:[%s2432_s1 + $0x148] sm:$0xff]   ;;  %v1870_v52 = vld [vmem:[%s2432_s1 + $0x180] sm:$0xff]   ;;  %v1875_v57 = vld [vmem:[%s2432_s1 + $0x150] sm:$0xff]  }
   0xe   :  { %1684 = vmatprep.subr.bf16.mxu1 %v1846_v13  ;;  %v327_v46 = vrot.slane %v305_v43, %v2086_v35  ;;  %v306_v48 = vcombine.high %v2106_v45, %v2106_v45  ;;  %v335_v49 = vcombine.high %v313_v44, %v313_v44  ;;  %v1872_v54 = vld [vmem:[%s2432_s1 + $0x1c8] sm:$0xff]   ;;  %v1876_v59 = vld [vmem:[%s2432_s1 + $0x1d0] sm:$0xff]   ;;  %v1879_v61 = vld [vmem:[%s2432_s1 + $0x158] sm:$0xff]  }
   0xf   :  { %v1873_v55 = vld [vmem:[%s2432_s1 + $0x108] sm:$0xff]   ;;  %v1877_v60 = vld [vmem:[%s2432_s1 + $0x110] sm:$0xff]   ;;  %v1880_v63 = vld [vmem:[%s2432_s1 + $0x1d8] sm:$0xff]  }
  0x10   :  { %1663 = vmatpush3.bf16.msra.mxu0 %v1847_v14  ;;  %1204 = vmatprep.mubr.bf16.mxu0 %v327_v46  ;;  %v337_v51 = vcombine.high %v327_v46, %v327_v46  ;;  %v334_v53 = vrot.slane %v306_v48, %v2086_v35  ;;  %v1874_v58 = vld [vmem:[%s2432_s1 + $0x188] sm:$0xff]   ;;  %v1878_v62 = vld [vmem:[%s2432_s1 + $0x190] sm:$0xff]   ;;  %v1881_v0 = vld [vmem:[%s2432_s1 + $0x118] sm:$0xff]  }
  0x11   :  { %1685 = vmatpush3.bf16.msra.mxu1 %v1848_v15  ;;  %1664 = vmatprep.subr.bf16.mxu0 %v1849_v16  ;;  %v1883_v1 = vld [vmem:[%s2432_s1 + $0x160] sm:$0xff]   ;;  %v1882_v2 = vld [vmem:[%s2432_s1 + $0x198] sm:$0xff]   ;;  %v2166_v5 = vld [vmem:[%s2433_s0 + $0x8] sm:$0xff] }
  0x12   :  { %1686 = vmatprep.subr.bf16.mxu1 %v1850_v17  ;;  %1244 = vmatprep.mubr.bf16.mxu1 %v337_v51  ;;  %v338_v56 = vcombine.high %v334_v53, %v334_v53  ;;  %v1884_v3 = vld [vmem:[%s2432_s1 + $0x1e0] sm:$0xff]   ;;  %v1887_v6 = vld [vmem:[%s2432_s1 + $0x168] sm:$0xff]   ;;  %v1891_v10 = vld [vmem:[%s2432_s1 + $0x170] sm:$0xff]   ;;  %v2188_v12 = vrot.slane %v2166_v5, %v2086_v35  ;;  %v339_v46 = vcombine.high %v2166_v5, %v2166_v5 }
  0x13   :  { %v1885_v4 = vld [vmem:[%s2432_s1 + $0x120] sm:$0xff]   ;;  %v1888_v8 = vld [vmem:[%s2432_s1 + $0x1e8] sm:$0xff]   ;;  %v1892_v13 = vld [vmem:[%s2432_s1 + $0x1f0] sm:$0xff]  }
  0x14   :  { %1665 = vmatpush3.bf16.msra.mxu0 %v1851_v18  ;;  %v1886_v7 = vld [vmem:[%s2432_s1 + $0x1a0] sm:$0xff]   ;;  %v1889_v9 = vld [vmem:[%s2432_s1 + $0x128] sm:$0xff]   ;;  %v1893_v14 = vld [vmem:[%s2432_s1 + $0x130] sm:$0xff]   ;;  %v354_v17 = vcombine.high %v2188_v12, %v2188_v12 }
  0x15   :  { %1687 = vmatpush3.bf16.msra.mxu1 %v1852_v19  ;;  %1666 = vmatprep.subr.bf16.mxu0 %v1853_v20  ;;  %v1890_v11 = vld [vmem:[%s2432_s1 + $0x1a8] sm:$0xff]   ;;  %v1895_v15 = vld [vmem:[%s2432_s1 + $0x178] sm:$0xff]   ;;  %v1894_v16 = vld [vmem:[%s2432_s1 + $0x1b0] sm:$0xff]   ;;  %v320_v20 = vrot.slane %v2106_v45, %v2086_v35 }
  0x16   :  { %1688 = vmatprep.subr.bf16.mxu1 %v1854_v21  ;;  %v1896_v18 = vld [vmem:[%s2432_s1 + $0x1f8] sm:$0xff]   ;;  %v1899_v21 = vld [vmem:[%s2432_s1 + $0x240] sm:$0xff]   ;;  %v376_v23 = vrot.slane %v354_v17, %v2086_v35  ;;  %v1904_v30 = vld [vmem:[%s2432_s1 + $0x2c8] sm:$0xff]  }
  0x17   :  { %v1897_v19 = vld [vmem:[%s2432_s1 + $0x138] sm:$0xff]   ;;  %v1900_v24 = vld [vmem:[%s2432_s1 + $0x2c0] sm:$0xff]   ;;  %v1910_v38 = vld [vmem:[%s2432_s1 + $0x290] sm:$0xff]  }
  0x18   :  { %1667 = vmatpush3.bf16.msra.mxu0 %v1855_v25  ;;  %v1898_v22 = vld [vmem:[%s2432_s1 + $0x1b8] sm:$0xff]   ;;  %v1901_v25 = vld [vmem:[%s2432_s1 + $0x200] sm:$0xff]   ;;  %v386_v29 = vcombine.high %v376_v23, %v376_v23  ;;  %v1919_v45 = vld [vmem:[%s2432_s1 + $0x268] sm:$0xff]  }
  0x19   :  { %1689 = vmatpush3.bf16.msra.mxu1 %v1856_v26  ;;  %1668 = vmatprep.subr.bf16.mxu0 %v1857_v27  ;;  %v336_v26 = vcombine.high %v320_v20, %v320_v20  ;;  %v1903_v27 = vld [vmem:[%s2432_s1 + $0x248] sm:$0xff]   ;;  %v1912_v39 = vld [vmem:[%s2432_s1 + $0x2d8] sm:$0xff]   ;;  %v1916_v43 = vld [vmem:[%s2432_s1 + $0x2e0] sm:$0xff]  }
  0x1a   :  { %1690 = vmatprep.subr.bf16.mxu1 %v1858_v28  ;;  %v1902_v28 = vld [vmem:[%s2432_s1 + $0x280] sm:$0xff]   ;;  %v1913_v40 = vld [vmem:[%s2432_s1 + $0x218] sm:$0xff]   ;;  %v1920_v48 = vld [vmem:[%s2432_s1 + $0x2e8] sm:$0xff]  }
  0x1b   :  { %v1922_v51 = vld [vmem:[%s2432_s1 + $0x2a8] sm:$0xff]   ;;  %v1946_v17 = vld [vmem:[%s2432_s1 + $0x398] sm:$0xff]  }
  0x1c   :  { %1669 = vmatpush3.bf16.msra.mxu0 %v1859_v31  ;;  %v1905_v31 = vld [vmem:[%s2432_s1 + $0x208] sm:$0xff]  }
  0x1d   :  { %1691 = vmatpush3.bf16.msra.mxu1 %v1860_v32  ;;  %1670 = vmatprep.subr.bf16.mxu0 %v1861_v33  ;;  %v1907_v32 = vld [vmem:[%s2432_s1 + $0x250] sm:$0xff]   ;;  %v1906_v33 = vld [vmem:[%s2432_s1 + $0x288] sm:$0xff]  }
  0x1e   :  { %1692 = vmatprep.subr.bf16.mxu1 %v1862_v34  ;;  %v1908_v34 = vld [vmem:[%s2432_s1 + $0x2d0] sm:$0xff]  }
  0x20   :  { %1671 = vmatpush3.bf16.msra.mxu0 %v1863_v36  ;;  %v1909_v36 = vld [vmem:[%s2432_s1 + $0x210] sm:$0xff]  }
  0x21   :  { %1693 = vmatpush3.bf16.msra.mxu1 %v1864_v37  ;;  %1700 = vmatprep.subr.bf16.mxu0 %v1867_v41  ;;  %v1911_v37 = vld [vmem:[%s2432_s1 + $0x258] sm:$0xff]   ;;  %v1915_v41 = vld [vmem:[%s2432_s1 + $0x260] sm:$0xff]  }
  0x22   :  { %1722 = vmatprep.subr.bf16.mxu1 %v1868_v42  ;;  %v1914_v42 = vld [vmem:[%s2432_s1 + $0x298] sm:$0xff]  }
  0x23   :  { %1205 = vmatmul.mubr.bf16.vlgmr.msra.gmra.mrb[0].mxu0 %v313_v44  ;;  %v1917_v44 = vld [vmem:[%s2432_s1 + $0x220] sm:$0xff]  }
  0x24   :  { %1701 = vmatpush3.bf16.msra.mxu0 %v1869_v47  ;;  %1245 = vmatmul.mubr.bf16.vlgmr.msra.gmra.mrb[0].mxu1 %v335_v49  ;;  %v1918_v47 = vld [vmem:[%s2432_s1 + $0x2a0] sm:$0xff]   ;;  %v1921_v49 = vld [vmem:[%s2432_s1 + $0x228] sm:$0xff]  }
  0x25   :  { %1702 = vmatprep.subr.bf16.mxu0 %v1871_v50  ;;  %1723 = vmatpush3.bf16.msra.mxu1 %v1870_v52  ;;  %v1923_v50 = vld [vmem:[%s2432_s1 + $0x270] sm:$0xff]   ;;  %v2294_v52 = vrot.slane %v339_v46, %v2086_v35 }
  0x26   :  { %1284 = vmatprep.mubr.bf16.mxu0 %v334_v53  ;;  %1724 = vmatprep.subr.bf16.mxu1 %v1872_v54  ;;  %v1924_v53 = vld [vmem:[%s2432_s1 + $0x2f0] sm:$0xff]  }
  0x27   :  { %1324 = vmatprep.mubr.bf16.mxu1 %v338_v56  ;;  %v1925_v54 = vld [vmem:[%s2432_s1 + $0x230] sm:$0xff]  }
  0x28   :  { %1703 = vmatpush3.bf16.msra.mxu0 %v1873_v55  ;;  %v1927_v55 = vld [vmem:[%s2432_s1 + $0x278] sm:$0xff]   ;;  %v1926_v56 = vld [vmem:[%s2432_s1 + $0x2b0] sm:$0xff]  }
  0x29   :  { %1704 = vmatprep.subr.bf16.mxu0 %v1875_v57  ;;  %1725 = vmatpush3.bf16.msra.mxu1 %v1874_v58  ;;  %v355_v57 = vcombine.high %v2294_v52, %v2294_v52  ;;  %v1928_v58 = vld [vmem:[%s2432_s1 + $0x2f8] sm:$0xff]  }
  0x2a   :  { %1726 = vmatprep.subr.bf16.mxu1 %v1876_v59  ;;  %v1929_v59 = vld [vmem:[%s2432_s1 + $0x238] sm:$0xff]  }
  0x2c   :  { %1705 = vmatpush3.bf16.msra.mxu0 %v1877_v60  ;;  %v362_v60 = vrot.slane %v2188_v12, %v2086_v35  ;;  %v1943_v12 = vld [vmem:[%s2432_s1 + $0x358] sm:$0xff]  }
  0x2d   :  { %1706 = vmatprep.subr.bf16.mxu0 %v1879_v61  ;;  %1727 = vmatpush3.bf16.msra.mxu1 %v1878_v62  ;;  %v1931_v61 = vld [vmem:[%s2432_s1 + $0x340] sm:$0xff]   ;;  %v1930_v62 = vld [vmem:[%s2432_s1 + $0x2b8] sm:$0xff]  }
  0x2e   :  { %1728 = vmatprep.subr.bf16.mxu1 %v1880_v63  ;;  %v383_v63 = vrot.slane %v355_v57, %v2086_v35 }
  0x30   :  { %1707 = vmatpush3.bf16.msra.mxu0 %v1881_v0  ;;  %v1932_v0 = vld [vmem:[%s2432_s1 + $0x3c0] sm:$0xff]   ;;  %v387_v5 = vcombine.high %v383_v63, %v383_v63 }
  0x31   :  { %1708 = vmatprep.subr.bf16.mxu0 %v1883_v1  ;;  %1729 = vmatpush3.bf16.msra.mxu1 %v1882_v2  ;;  %v1933_v1 = vld [vmem:[%s2432_s1 + $0x300] sm:$0xff]   ;;  %v384_v2 = vcombine.high %v362_v60, %v362_v60 }
  0x32   :  { %1730 = vmatprep.subr.bf16.mxu1 %v1884_v3  ;;  %v1935_v3 = vld [vmem:[%s2432_s1 + $0x348] sm:$0xff]  }
  0x34   :  { %1709 = vmatpush3.bf16.msra.mxu0 %v1885_v4  ;;  %v1934_v4 = vld [vmem:[%s2432_s1 + $0x380] sm:$0xff]  }
  0x35   :  { %1710 = vmatprep.subr.bf16.mxu0 %v1887_v6  ;;  %1731 = vmatpush3.bf16.msra.mxu1 %v1886_v7  ;;  %v1936_v6 = vld [vmem:[%s2432_s1 + $0x3c8] sm:$0xff]  }
  0x36   :  { %1732 = vmatprep.subr.bf16.mxu1 %v1888_v8  ;;  %v1937_v7 = vld [vmem:[%s2432_s1 + $0x308] sm:$0xff]   ;;  %v1939_v8 = vld [vmem:[%s2432_s1 + $0x350] sm:$0xff]  }
  0x38   :  { %1711 = vmatpush3.bf16.msra.mxu0 %v1889_v9  ;;  %v1938_v9 = vld [vmem:[%s2432_s1 + $0x388] sm:$0xff]  }
  0x39   :  { %1712 = vmatprep.subr.bf16.mxu0 %v1891_v10  ;;  %1733 = vmatpush3.bf16.msra.mxu1 %v1890_v11  ;;  %v1940_v10 = vld [vmem:[%s2432_s1 + $0x3d0] sm:$0xff]  }
  0x3a   :  { %1734 = vmatprep.subr.bf16.mxu1 %v1892_v13  ;;  %v1941_v11 = vld [vmem:[%s2432_s1 + $0x310] sm:$0xff]  }
  0x3b   :  { %v1942_v13 = vld [vmem:[%s2432_s1 + $0x390] sm:$0xff]  }
  0x3c   :  { %1713 = vmatpush3.bf16.msra.mxu0 %v1893_v14  ;;  %v1944_v14 = vld [vmem:[%s2432_s1 + $0x3d8] sm:$0xff]  }
  0x3d   :  { %1714 = vmatprep.subr.bf16.mxu0 %v1895_v15  ;;  %1735 = vmatpush3.bf16.msra.mxu1 %v1894_v16  ;;  %v1945_v15 = vld [vmem:[%s2432_s1 + $0x318] sm:$0xff]   ;;  %v1947_v16 = vld [vmem:[%s2432_s1 + $0x360] sm:$0xff]  }
  0x3e   :  { %1736 = vmatprep.subr.bf16.mxu1 %v1896_v18  ;;  %v1948_v18 = vld [vmem:[%s2432_s1 + $0x3e0] sm:$0xff]  }
  0x40   :  { %1715 = vmatpush3.bf16.msra.mxu0 %v1897_v19  ;;  %v1949_v19 = vld [vmem:[%s2432_s1 + $0x320] sm:$0xff]  }
  0x41   :  { %1744 = vmatprep.subr.bf16.mxu0 %v1899_v21  ;;  %1737 = vmatpush3.bf16.msra.mxu1 %v1898_v22  ;;  %v1950_v21 = vld [vmem:[%s2432_s1 + $0x3a0] sm:$0xff]   ;;  %v1952_v22 = vld [vmem:[%s2432_s1 + $0x3e8] sm:$0xff]  }
  0x42   :  { %1766 = vmatprep.subr.bf16.mxu1 %v1900_v24  ;;  %v1955_v24 = vld [vmem:[%s2432_s1 + $0x370] sm:$0xff]  }
  0x43   :  { %1285 = vmatmul.mubr.bf16.vlgmr.msra.gmra.mrb[4].mxu0 %v320_v20  ;;  %v1951_v20 = vld [vmem:[%s2432_s1 + $0x368] sm:$0xff]  }
  0x44   :  { %1745 = vmatpush3.bf16.msra.mxu0 %v1901_v25  ;;  %1364 = vmatprep.mubr.bf16.mxu0 %v376_v23  ;;  %v1953_v23 = vld [vmem:[%s2432_s1 + $0x328] sm:$0xff]  }
  0x45   :  { %1325 = vmatmul.mubr.bf16.vlgmr.msra.gmra.mrb[4].mxu1 %v336_v26  ;;  %1746 = vmatprep.subr.bf16.mxu0 %v1903_v27  ;;  %v1954_v25 = vld [vmem:[%s2432_s1 + $0x3a8] sm:$0xff]   ;;  %v1956_v26 = vld [vmem:[%s2432_s1 + $0x3f0] sm:$0xff]  }
  0x46   :  { %1767 = vmatpush3.bf16.msra.mxu1 %v1902_v28  ;;  %1404 = vmatprep.mubr.bf16.mxu1 %v386_v29  ;;  %v1957_v27 = vld [vmem:[%s2432_s1 + $0x330] sm:$0xff]   ;;  %v1959_v28 = vld [vmem:[%s2432_s1 + $0x378] sm:$0xff]  }
  0x47   :  { %1768 = vmatprep.subr.bf16.mxu1 %v1904_v30  ;;  %v1958_v29 = vld [vmem:[%s2432_s1 + $0x3b0] sm:$0xff]   ;;  %v1960_v30 = vld [vmem:[%s2432_s1 + $0x3f8] sm:$0xff]  }
  0x48   :  { %1747 = vmatpush3.bf16.msra.mxu0 %v1905_v31  ;;  %v1961_v31 = vld [vmem:[%s2432_s1 + $0x338] sm:$0xff]  }
  0x49   :  { %1748 = vmatprep.subr.bf16.mxu0 %v1907_v32  ;;  %v369_v32 = vrot.slane %v2294_v52, %v2086_v35  ;;  %v10_v35 = vstv %s2435_s4 }
  0x4a   :  { %1769 = vmatpush3.bf16.msra.mxu1 %v1906_v33  ;;  %v1962_v33 = vld [vmem:[%s2432_s1 + $0x3b8] sm:$0xff]   ;;  %11 = vst [vmem:[#allocation2] sm:$0x1] %v10_v35 }
  0x4b   :  { %1770 = vmatprep.subr.bf16.mxu1 %v1908_v34  ;;  %v385_v34 = vcombine.high %v369_v32, %v369_v32 }
  0x4c   :  { %1749 = vmatpush3.bf16.msra.mxu0 %v1909_v36 }
  0x4d   :  { %1750 = vmatprep.subr.bf16.mxu0 %v1911_v37  ;;  %v1525_v37 = vld [vmem:[%s2434_s2] ss:$0 sm:$0xff] }
  0x4e   :  { %1771 = vmatpush3.bf16.msra.mxu1 %v1910_v38 }
  0x4f   :  { %1772 = vmatprep.subr.bf16.mxu1 %v1912_v39 }
  0x50   :  { %1751 = vmatpush3.bf16.msra.mxu0 %v1913_v40 }
  0x51   :  { %1752 = vmatprep.subr.bf16.mxu0 %v1915_v41 }
  0x52   :  { %1773 = vmatpush3.bf16.msra.mxu1 %v1914_v42 }
  0x53   :  { %1774 = vmatprep.subr.bf16.mxu1 %v1916_v43 }
  0x54   :  { %1753 = vmatpush3.bf16.msra.mxu0 %v1917_v44 }
  0x55   :  { %1754 = vmatprep.subr.bf16.mxu0 %v1919_v45 }
  0x56   :  { %1775 = vmatpush3.bf16.msra.mxu1 %v1918_v47 }
  0x57   :  { %1776 = vmatprep.subr.bf16.mxu1 %v1920_v48 }
  0x58   :  { %1755 = vmatpush3.bf16.msra.mxu0 %v1921_v49 }
  0x59   :  { %1756 = vmatprep.subr.bf16.mxu0 %v1923_v50 }
  0x5a   :  { %1777 = vmatpush3.bf16.msra.mxu1 %v1922_v51 }
  0x5b   :  { %1778 = vmatprep.subr.bf16.mxu1 %v1924_v53 }
  0x5c   :  { %1757 = vmatpush3.bf16.msra.mxu0 %v1925_v54 }
  0x5d   :  { %1758 = vmatprep.subr.bf16.mxu0 %v1927_v55 }
  0x5e   :  { %1779 = vmatpush3.bf16.msra.mxu1 %v1926_v56 }
  0x5f   :  { %1780 = vmatprep.subr.bf16.mxu1 %v1928_v58 }
  0x60   :  { %1759 = vmatpush3.bf16.msra.mxu0 %v1929_v59 }
  0x61   :  { %1788 = vmatprep.subr.bf16.mxu0 %v1931_v61 }
  0x62   :  { %1781 = vmatpush3.bf16.msra.mxu1 %v1930_v62 }
  0x63   :  { %1365 = vmatmul.mubr.bf16.vlgmr.msra.gmra.mrb[8].mxu0 %v362_v60  ;;  %1810 = vmatprep.subr.bf16.mxu1 %v1932_v0 }
  0x64   :  { %1789 = vmatpush3.bf16.msra.mxu0 %v1933_v1  ;;  %1444 = vmatprep.mubr.bf16.mxu0 %v383_v63 }
  0x65   :  { %1405 = vmatmul.mubr.bf16.vlgmr.msra.gmra.mrb[8].mxu1 %v384_v2  ;;  %1790 = vmatprep.subr.bf16.mxu0 %v1935_v3 }
  0x66   :  { %1811 = vmatpush3.bf16.msra.mxu1 %v1934_v4  ;;  %1484 = vmatprep.mubr.bf16.mxu1 %v387_v5 }
  0x67   :  { %1812 = vmatprep.subr.bf16.mxu1 %v1936_v6 }
  0x68   :  { %1791 = vmatpush3.bf16.msra.mxu0 %v1937_v7 }
  0x69   :  { %1792 = vmatprep.subr.bf16.mxu0 %v1939_v8 }
  0x6a   :  { %1813 = vmatpush3.bf16.msra.mxu1 %v1938_v9 }
  0x6b   :  { %1814 = vmatprep.subr.bf16.mxu1 %v1940_v10 }
  0x6c   :  { %1793 = vmatpush3.bf16.msra.mxu0 %v1941_v11 }
  0x6d   :  { %1794 = vmatprep.subr.bf16.mxu0 %v1943_v12 }
  0x6e   :  { %1815 = vmatpush3.bf16.msra.mxu1 %v1942_v13 }
  0x6f   :  { %1816 = vmatprep.subr.bf16.mxu1 %v1944_v14 }
  0x70   :  { %1795 = vmatpush3.bf16.msra.mxu0 %v1945_v15 }
  0x71   :  { %1796 = vmatprep.subr.bf16.mxu0 %v1947_v16 }
  0x72   :  { %1817 = vmatpush3.bf16.msra.mxu1 %v1946_v17 }
  0x73   :  { %1818 = vmatprep.subr.bf16.mxu1 %v1948_v18 }
  0x74   :  { %1797 = vmatpush3.bf16.msra.mxu0 %v1949_v19 }
  0x75   :  { %1798 = vmatprep.subr.bf16.mxu0 %v1951_v20 }
  0x76   :  { %1819 = vmatpush3.bf16.msra.mxu1 %v1950_v21 }
  0x77   :  { %1820 = vmatprep.subr.bf16.mxu1 %v1952_v22 }
  0x78   :  { %1799 = vmatpush3.bf16.msra.mxu0 %v1953_v23 }
  0x79   :  { %1800 = vmatprep.subr.bf16.mxu0 %v1955_v24 }
  0x7a   :  { %1821 = vmatpush3.bf16.msra.mxu1 %v1954_v25 }
  0x7b   :  { %1822 = vmatprep.subr.bf16.mxu1 %v1956_v26 }
  0x7c   :  { %1801 = vmatpush3.bf16.msra.mxu0 %v1957_v27  ;;  %v1654_v27 = vld [vmem:[%s2436_s3] ss:$0 sm:$0xff] }
  0x7d   :  { %1802 = vmatprep.subr.bf16.mxu0 %v1959_v28 }
  0x7e   :  { %1823 = vmatpush3.bf16.msra.mxu1 %v1958_v29 }
  0x7f   :  { %1824 = vmatprep.subr.bf16.mxu1 %v1960_v30 }
  0x80   :  { %1803 = vmatpush3.bf16.msra.mxu0 %v1961_v31  ;;  %v1655_v31 = vld [vmem:[#allocation2] ss:$0 sm:$0xff] }
  0x82   :  { %1825 = vmatpush3.bf16.msra.mxu1 %v1962_v33 }
  0x83   :  { %1445 = vmatmul.mubr.bf16.vlgmr.msra.gmra.mrb[12].mxu0 %v369_v32 }
  0x85   :  { %1485 = vmatmul.mubr.bf16.vlgmr.msra.gmra.mrb[12].mxu1 %v385_v34 }
  0xf6   :  { %v1672_v36 = vpop.f32.mrb[0].mxu0 }
  0xf7   :  { %v1673_v38 = vpop.f32.mrb[1].mxu0  ;;  %v1694_v39 = vpop.f32.mrb[0].mxu1 }
  0xf8   :  { %v1674_v40 = vadd.f32 %v1673_v38, %v1672_v36  ;;  %v1675_v41 = vpop.f32.mrb[2].mxu0  ;;  %v1695_v42 = vpop.f32.mrb[1].mxu1 }
  0xf9   :  { %v1676_v43 = vpop.f32.mrb[3].mxu0  ;;  %v1696_v45 = vadd.f32 %v1695_v42, %v1694_v39  ;;  %v1697_v46 = vpop.f32.mrb[2].mxu1 }
  0xfa   :  { %v1207_v44 = vadd.f32 %v1674_v40, %v1525_v37  ;;  %v1698_v47 = vpop.f32.mrb[3].mxu1 }
  0xfc   :  { %v1247_v48 = vadd.f32 %v1696_v45, %v1207_v44 }
 0x116   :  { %v1716_v49 = vpop.f32.mrb[4].mxu0 }
 0x117   :  { %v1717_v50 = vpop.f32.mrb[5].mxu0 }
 0x118   :  { %v1738_v51 = vpop.f32.mrb[4].mxu1  ;;  %v1718_v52 = vadd.f32 %v1717_v50, %v1716_v49  ;;  %v1719_v53 = vpop.f32.mrb[6].mxu0 }
 0x119   :  { %v1739_v54 = vpop.f32.mrb[5].mxu1  ;;  %v1720_v55 = vpop.f32.mrb[7].mxu0 }
 0x11a   :  { %v1287_v56 = vadd.f32 %v1718_v52, %v1247_v48  ;;  %v1740_v57 = vadd.f32 %v1739_v54, %v1738_v51  ;;  %v1741_v58 = vpop.f32.mrb[6].mxu1 }
 0x11b   :  { %v1742_v59 = vpop.f32.mrb[7].mxu1 }
 0x11c   :  { %v1327_v60 = vadd.f32 %v1740_v57, %v1287_v56 }
 0x136   :  { %v1760_v61 = vpop.f32.mrb[8].mxu0 }
 0x137   :  { %v1761_v62 = vpop.f32.mrb[9].mxu0 }
 0x138   :  { %v1782_v63 = vpop.f32.mrb[8].mxu1  ;;  %v1762_v0 = vadd.f32 %v1761_v62, %v1760_v61  ;;  %v1763_v1 = vpop.f32.mrb[10].mxu0 }
 0x139   :  { %v1783_v2 = vpop.f32.mrb[9].mxu1  ;;  %v1764_v3 = vpop.f32.mrb[11].mxu0 }
 0x13a   :  { %v1367_v4 = vadd.f32 %v1762_v0, %v1327_v60  ;;  %v1784_v5 = vadd.f32 %v1783_v2, %v1782_v63  ;;  %v1785_v6 = vpop.f32.mrb[10].mxu1 }
 0x13b   :  { %v1786_v7 = vpop.f32.mrb[11].mxu1 }
 0x13c   :  { %v1407_v8 = vadd.f32 %v1784_v5, %v1367_v4 }
 0x156   :  { %v1804_v9 = vpop.f32.mrb[12].mxu0 }
 0x157   :  { %v1805_v10 = vpop.f32.mrb[13].mxu0 }
 0x158   :  { %v1826_v11 = vpop.f32.mrb[12].mxu1  ;;  %v1806_v12 = vadd.f32 %v1805_v10, %v1804_v9  ;;  %v1807_v13 = vpop.f32.mrb[14].mxu0 }
 0x159   :  { %v1827_v14 = vpop.f32.mrb[13].mxu1  ;;  %v1808_v15 = vpop.f32.mrb[15].mxu0 }
 0x15a   :  { %v1447_v16 = vadd.f32 %v1806_v12, %v1407_v8  ;;  %v1828_v17 = vadd.f32 %v1827_v14, %v1826_v11  ;;  %v1829_v18 = vpop.f32.mrb[14].mxu1 }
 0x15b   :  { %v1830_v19 = vpop.f32.mrb[15].mxu1 }
 0x15c   :  { %v1487_v20 = vadd.f32 %v1828_v17, %v1447_v16 }
 0x15e   :  { %v1492_v21 = vmul.f32 %v1487_v20, %v1487_v20  ;;  %v1494_v24 = vsub.f32 %v1487_v20, %v1487_v20 }
 0x160   :  { %v1493_v22 = vsub.f32 %v1492_v21, %v1492_v21 }
 0x162   :  { %v1495_v23 = vadd.f32 1e-05, %v1493_v22 }
 0x164   :  { %1963 = vrsqrt.f32 %v1495_v23 }
 0x16e   :  { %v1964_v25 = vpop.eup %1963 }
 0x16f   :  { %v1497_v26 = vmul.f32 %v1964_v25, %v1494_v24 }
 0x171   :  { %v1498_v28 = vmax.f32 %v1497_v26, 0.0 }
 0x173   :  { %v1506_v29 = vmul.f32 %v1654_v27, %v1498_v28 }
 0x175   :  { %v1508_v30 = vsel %vm1507_vm0, %v1506_v29, 0.0 }
 0x176   :  { %1509 = vadd.xlane.f32.xlu0 %v1508_v30 }
 0x203   :  { %v1510_v32 = vpop.xlane.xlu0 %1509 }
 0x204   :  { %v1518_v33 = vadd.f32 %v1655_v31, %v1510_v32 }
 0x206   :  { %1520 = vst.msk [vmem:[%s2437_s5] sm:$0x3] %vm1519_vm1, %v1518_v33 }

// kernel: content_discriminator_forward.6
= control target key start
LH: loop header
LB: loop body
LE: loop exit
PB: predicated region body
PF: predicated region fallthrough
CT: control target
= control target key end

     0   :  { %s3949_s1 = inlined_call_operand.vmem [shape: bf16[16,128,128], index: 1, kind: input, shape index: {}]   ;;  %s3950_s0 = inlined_call_operand.vmem [shape: bf16[16,32,128], index: 0, kind: input, shape index: {}]   ;;  %s3951_s2 = inlined_call_operand.vmem [shape: f32[1,128], index: 2, kind: input, shape index: {}]   ;;  %s3952_s3 = inlined_call_operand.vmem [shape: bf16[2,16,128], index: 3, kind: output, shape index: {}]  }
   0x1   :  { %v3276_v0 = vld [vmem:[%s3949_s1 + $0x40] sm:$0xff]   ;;  %v3278_v2 = vld [vmem:[%s3949_s1 + $0x48] sm:$0xff]   ;;  %v3280_v4 = vld [vmem:[%s3949_s1 + $0x50] sm:$0xff]  }
   0x2   :  { %v3277_v1 = vld [vmem:[%s3949_s1 + $0x200] sm:$0xff]   ;;  %2896 = vmatprep.subr.bf16.mxu1 %v3276_v0  ;;  %v3279_v3 = vld [vmem:[%s3949_s1 + $0x208] sm:$0xff]   ;;  %v3281_v5 = vld [vmem:[%s3949_s1 + $0x210] sm:$0xff]  }
   0x3   :  { %3056 = vmatprep.subr.bf16.mxu0 %v3277_v1  ;;  %2897 = vmatpush3.bf16.msra.mxu1 %v3276_v0  ;;  %v3282_v6 = vld [vmem:[%s3949_s1 + $0x58] sm:$0xff]   ;;  %v3284_v8 = vld [vmem:[%s3949_s1 + $0x60] sm:$0xff]   ;;  %v3286_v10 = vld [vmem:[%s3949_s1 + $0x68] sm:$0xff]  }
   0x4   :  { %3057 = vmatpush3.bf16.msra.mxu0 %v3277_v1  ;;  %2898 = vmatprep.subr.bf16.mxu1 %v3278_v2  ;;  %v3283_v7 = vld [vmem:[%s3949_s1 + $0x218] sm:$0xff]   ;;  %v3285_v9 = vld [vmem:[%s3949_s1 + $0x220] sm:$0xff]   ;;  %v3292_v11 = vld [vmem:[%s3950_s0 + $0x10] sm:$0xff]  }
   0x5   :  { %3058 = vmatprep.subr.bf16.mxu0 %v3279_v3  ;;  %v3287_v12 = vld [vmem:[%s3949_s1 + $0x228] sm:$0xff]   ;;  %2912 = vmatprep.mubr.bf16.mxu1 %v3292_v11  ;;  %v3294_v13 = vld [vmem:[%s3950_s0 + $0x80] sm:$0xff]   ;;  %v3288_v14 = vld [vmem:[%s3949_s1 + $0x70] sm:$0xff]  }
   0x6   :  { %v3289_v15 = vld [vmem:[%s3949_s1 + $0x230] sm:$0xff]   ;;  %3072 = vmatprep.mubr.bf16.mxu0 %v3294_v13  ;;  %v3290_v16 = vld [vmem:[%s3949_s1 + $0x78] sm:$0xff]   ;;  %v3293_v18 = vld [vmem:[%s3949_s1] sm:$0xff]  }
   0x7   :  { %2899 = vmatpush3.bf16.msra.mxu1 %v3278_v2  ;;  %v3291_v17 = vld [vmem:[%s3949_s1 + $0x238] sm:$0xff]   ;;  %v3295_v19 = vld [vmem:[%s3949_s1 + $0x240] sm:$0xff]   ;;  %v3297_v21 = vld [vmem:[%s3950_s0 + $0x88] sm:$0xff]  }
   0x8   :  { %3059 = vmatpush3.bf16.msra.mxu0 %v3279_v3  ;;  %2900 = vmatprep.subr.bf16.mxu1 %v3280_v4  ;;  %v3296_v20 = vld [vmem:[%s3950_s0 + $0x18] sm:$0xff]   ;;  %v3298_v22 = vld [vmem:[%s3949_s1 + $0x8] sm:$0xff]   ;;  %v3300_v24 = vld [vmem:[%s3949_s1 + $0x10] sm:$0xff]  }
   0x9   :  { %3060 = vmatprep.subr.bf16.mxu0 %v3281_v5  ;;  %v3299_v23 = vld [vmem:[%s3949_s1 + $0x248] sm:$0xff]   ;;  %v3312_v25 = vld [vmem:[%s3950_s0] sm:$0xff]   ;;  %v3301_v26 = vld [vmem:[%s3949_s1 + $0x250] sm:$0xff]  }
   0xa   :  { %v3314_v27 = vld [vmem:[%s3950_s0 + $0x90] sm:$0xff]   ;;  %v3302_v28 = vld [vmem:[%s3949_s1 + $0x18] sm:$0xff]   ;;  %v3304_v30 = vld [vmem:[%s3949_s1 + $0x20] sm:$0xff]  }
   0xb   :  { %2901 = vmatpush3.bf16.msra.mxu1 %v3280_v4  ;;  %v3303_v29 = vld [vmem:[%s3949_s1 + $0x258] sm:$0xff]   ;;  %v3305_v31 = vld [vmem:[%s3949_s1 + $0x260] sm:$0xff]   ;;  %v3306_v32 = vld [vmem:[%s3949_s1 + $0x28] sm:$0xff]  }
   0xc   :  { %3061 = vmatpush3.bf16.msra.mxu0 %v3281_v5  ;;  %2902 = vmatprep.subr.bf16.mxu1 %v3282_v6  ;;  %v3307_v33 = vld [vmem:[%s3949_s1 + $0x268] sm:$0xff]   ;;  %v3308_v34 = vld [vmem:[%s3949_s1 + $0x30] sm:$0xff]   ;;  %v3310_v36 = vld [vmem:[%s3949_s1 + $0x38] sm:$0xff]  }
   0xd   :  { %3062 = vmatprep.subr.bf16.mxu0 %v3283_v7  ;;  %v3309_v35 = vld [vmem:[%s3949_s1 + $0x270] sm:$0xff]   ;;  %v3311_v37 = vld [vmem:[%s3949_s1 + $0x278] sm:$0xff]   ;;  %v3313_v38 = vld [vmem:[%s3949_s1 + $0x80] sm:$0xff]  }
   0xe   :  { %v3315_v39 = vld [vmem:[%s3949_s1 + $0x280] sm:$0xff]   ;;  %v3316_v40 = vld [vmem:[%s3950_s0 + $0x8] sm:$0xff]   ;;  %v3317_v41 = vld [vmem:[%s3950_s0 + $0x98] sm:$0xff]  }
   0xf   :  { %2903 = vmatpush3.bf16.msra.mxu1 %v3282_v6  ;;  %v3318_v42 = vld [vmem:[%s3949_s1 + $0x88] sm:$0xff]   ;;  %v3332_v44 = vld [vmem:[%s3950_s0 + $0x20] sm:$0xff]   ;;  %v3320_v46 = vld [vmem:[%s3949_s1 + $0x90] sm:$0xff]  }
  0x10   :  { %3063 = vmatpush3.bf16.msra.mxu0 %v3283_v7  ;;  %2904 = vmatprep.subr.bf16.mxu1 %v3284_v8  ;;  %v3319_v43 = vld [vmem:[%s3949_s1 + $0x288] sm:$0xff]   ;;  %v3334_v45 = vld [vmem:[%s3950_s0 + $0xa0] sm:$0xff]   ;;  %v3321_v47 = vld [vmem:[%s3949_s1 + $0x290] sm:$0xff]  }
  0x11   :  { %3064 = vmatprep.subr.bf16.mxu0 %v3285_v9  ;;  %v3322_v48 = vld [vmem:[%s3949_s1 + $0x98] sm:$0xff]   ;;  %v3324_v50 = vld [vmem:[%s3949_s1 + $0xa0] sm:$0xff]   ;;  %v3326_v52 = vld [vmem:[%s3949_s1 + $0xa8] sm:$0xff]  }
  0x12   :  { %v3323_v49 = vld [vmem:[%s3949_s1 + $0x298] sm:$0xff]   ;;  %v3325_v51 = vld [vmem:[%s3949_s1 + $0x2a0] sm:$0xff]   ;;  %v3327_v53 = vld [vmem:[%s3949_s1 + $0x2a8] sm:$0xff]  }
  0x13   :  { %2905 = vmatpush3.bf16.msra.mxu1 %v3284_v8  ;;  %v3328_v54 = vld [vmem:[%s3949_s1 + $0xb0] sm:$0xff]   ;;  %v3330_v56 = vld [vmem:[%s3949_s1 + $0xb8] sm:$0xff]   ;;  %v3333_v58 = vld [vmem:[%s3949_s1 + $0xc0] sm:$0xff]  }
  0x14   :  { %3065 = vmatpush3.bf16.msra.mxu0 %v3285_v9  ;;  %2906 = vmatprep.subr.bf16.mxu1 %v3286_v10  ;;  %v3329_v55 = vld [vmem:[%s3949_s1 + $0x2b0] sm:$0xff]   ;;  %v3331_v57 = vld [vmem:[%s3949_s1 + $0x2b8] sm:$0xff]   ;;  %v3335_v59 = vld [vmem:[%s3949_s1 + $0x2c0] sm:$0xff]  }
  0x15   :  { %3066 = vmatprep.subr.bf16.mxu0 %v3287_v12  ;;  %v3336_v60 = vld [vmem:[%s3950_s0 + $0x28] sm:$0xff]   ;;  %v3352_v0 = vld [vmem:[%s3950_s0 + $0x30] sm:$0xff]   ;;  %v3342_v4 = vld [vmem:[%s3949_s1 + $0xd8] sm:$0xff]  }
  0x16   :  { %v3337_v61 = vld [vmem:[%s3950_s0 + $0xa8] sm:$0xff]   ;;  %v3354_v1 = vld [vmem:[%s3950_s0 + $0xb0] sm:$0xff]   ;;  %v3343_v5 = vld [vmem:[%s3949_s1 + $0x2d8] sm:$0xff]  }
  0x17   :  { %2907 = vmatpush3.bf16.msra.mxu1 %v3286_v10  ;;  %v3338_v62 = vld [vmem:[%s3949_s1 + $0xc8] sm:$0xff]   ;;  %v3340_v2 = vld [vmem:[%s3949_s1 + $0xd0] sm:$0xff]   ;;  %v3344_v6 = vld [vmem:[%s3949_s1 + $0xe0] sm:$0xff]  }
  0x18   :  { %3067 = vmatpush3.bf16.msra.mxu0 %v3287_v12  ;;  %2908 = vmatprep.subr.bf16.mxu1 %v3288_v14  ;;  %v3339_v63 = vld [vmem:[%s3949_s1 + $0x2c8] sm:$0xff]   ;;  %v3341_v3 = vld [vmem:[%s3949_s1 + $0x2d0] sm:$0xff]   ;;  %v3345_v7 = vld [vmem:[%s3949_s1 + $0x2e0] sm:$0xff]  }
  0x19   :  { %3068 = vmatprep.subr.bf16.mxu0 %v3289_v15  ;;  %v3346_v8 = vld [vmem:[%s3949_s1 + $0xe8] sm:$0xff]   ;;  %v3348_v10 = vld [vmem:[%s3949_s1 + $0xf0] sm:$0xff]   ;;  %v3350_v12 = vld [vmem:[%s3949_s1 + $0xf8] sm:$0xff]  }
  0x1a   :  { %v3347_v9 = vld [vmem:[%s3949_s1 + $0x2e8] sm:$0xff]   ;;  %v3349_v11 = vld [vmem:[%s3949_s1 + $0x2f0] sm:$0xff]   ;;  %v3351_v13 = vld [vmem:[%s3949_s1 + $0x2f8] sm:$0xff]  }
  0x1b   :  { %2909 = vmatpush3.bf16.msra.mxu1 %v3288_v14  ;;  %v3353_v14 = vld [vmem:[%s3949_s1 + $0x100] sm:$0xff]  }
  0x1c   :  { %3069 = vmatpush3.bf16.msra.mxu0 %v3289_v15  ;;  %2910 = vmatprep.subr.bf16.mxu1 %v3290_v16  ;;  %v3355_v15 = vld [vmem:[%s3949_s1 + $0x300] sm:$0xff]  }
  0x1d   :  { %3070 = vmatprep.subr.bf16.mxu0 %v3291_v17 }
  0x1f   :  { %2911 = vmatpush3.bf16.msra.mxu1 %v3290_v16  ;;  %v3356_v16 = vld [vmem:[%s3950_s0 + $0x38] sm:$0xff]  }
  0x20   :  { %3071 = vmatpush3.bf16.msra.mxu0 %v3291_v17  ;;  %2916 = vmatprep.subr.bf16.mxu1 %v3293_v18  ;;  %v3357_v17 = vld [vmem:[%s3950_s0 + $0xb8] sm:$0xff]  }
  0x21   :  { %3076 = vmatprep.subr.bf16.mxu0 %v3295_v19 }
  0x22   :  { %2913 = vmatmul.mubr.bf16.vlgmr.msra.gmra.mrb[0].mxu1 %v3296_v20  ;;  %v3372_v20 = vld [vmem:[%s3950_s0 + $0x40] sm:$0xff]  }
  0x23   :  { %2917 = vmatpush3.bf16.msra.mxu1 %v3293_v18  ;;  %3073 = vmatmul.mubr.bf16.vlgmr.msra.gmra.mrb[0].mxu0 %v3297_v21  ;;  %v3358_v18 = vld [vmem:[%s3949_s1 + $0x108] sm:$0xff]   ;;  %v3374_v21 = vld [vmem:[%s3950_s0 + $0xc0] sm:$0xff]  }
  0x24   :  { %3077 = vmatpush3.bf16.msra.mxu0 %v3295_v19  ;;  %2918 = vmatprep.subr.bf16.mxu1 %v3298_v22  ;;  %v3359_v19 = vld [vmem:[%s3949_s1 + $0x308] sm:$0xff]  }
  0x25   :  { %3078 = vmatprep.subr.bf16.mxu0 %v3299_v23  ;;  %2932 = vmatprep.mubr.bf16.mxu1 %v3312_v25  ;;  %v3363_v25 = vld [vmem:[%s3949_s1 + $0x318] sm:$0xff]  }
  0x26   :  { %3092 = vmatprep.mubr.bf16.mxu0 %v3314_v27  ;;  %v3365_v27 = vld [vmem:[%s3949_s1 + $0x320] sm:$0xff]  }
  0x27   :  { %2919 = vmatpush3.bf16.msra.mxu1 %v3298_v22  ;;  %v3360_v22 = vld [vmem:[%s3949_s1 + $0x110] sm:$0xff]  }
  0x28   :  { %3079 = vmatpush3.bf16.msra.mxu0 %v3299_v23  ;;  %2920 = vmatprep.subr.bf16.mxu1 %v3300_v24  ;;  %v3361_v23 = vld [vmem:[%s3949_s1 + $0x310] sm:$0xff]  }
  0x29   :  { %3080 = vmatprep.subr.bf16.mxu0 %v3301_v26 }
  0x2b   :  { %2921 = vmatpush3.bf16.msra.mxu1 %v3300_v24  ;;  %v3362_v24 = vld [vmem:[%s3949_s1 + $0x118] sm:$0xff]  }
  0x2c   :  { %3081 = vmatpush3.bf16.msra.mxu0 %v3301_v26  ;;  %2922 = vmatprep.subr.bf16.mxu1 %v3302_v28  ;;  %v3364_v26 = vld [vmem:[%s3949_s1 + $0x120] sm:$0xff]  }
  0x2d   :  { %3082 = vmatprep.subr.bf16.mxu0 %v3303_v29 }
  0x2f   :  { %2923 = vmatpush3.bf16.msra.mxu1 %v3302_v28  ;;  %v3366_v28 = vld [vmem:[%s3949_s1 + $0x128] sm:$0xff]  }
  0x30   :  { %3083 = vmatpush3.bf16.msra.mxu0 %v3303_v29  ;;  %2924 = vmatprep.subr.bf16.mxu1 %v3304_v30  ;;  %v3367_v29 = vld [vmem:[%s3949_s1 + $0x328] sm:$0xff]  }
  0x31   :  { %3084 = vmatprep.subr.bf16.mxu0 %v3305_v31 }
  0x33   :  { %2925 = vmatpush3.bf16.msra.mxu1 %v3304_v30  ;;  %v3368_v30 = vld [vmem:[%s3949_s1 + $0x130] sm:$0xff]  }
  0x34   :  { %3085 = vmatpush3.bf16.msra.mxu0 %v3305_v31  ;;  %2926 = vmatprep.subr.bf16.mxu1 %v3306_v32  ;;  %v3369_v31 = vld [vmem:[%s3949_s1 + $0x330] sm:$0xff]  }
  0x35   :  { %3086 = vmatprep.subr.bf16.mxu0 %v3307_v33 }
  0x37   :  { %2927 = vmatpush3.bf16.msra.mxu1 %v3306_v32  ;;  %v3370_v32 = vld [vmem:[%s3949_s1 + $0x138] sm:$0xff]  }
  0x38   :  { %3087 = vmatpush3.bf16.msra.mxu0 %v3307_v33  ;;  %2928 = vmatprep.subr.bf16.mxu1 %v3308_v34  ;;  %v3371_v33 = vld [vmem:[%s3949_s1 + $0x338] sm:$0xff]  }
  0x39   :  { %3088 = vmatprep.subr.bf16.mxu0 %v3309_v35 }
  0x3b   :  { %2929 = vmatpush3.bf16.msra.mxu1 %v3308_v34  ;;  %v3373_v34 = vld [vmem:[%s3949_s1 + $0x140] sm:$0xff]  }
  0x3c   :  { %3089 = vmatpush3.bf16.msra.mxu0 %v3309_v35  ;;  %2930 = vmatprep.subr.bf16.mxu1 %v3310_v36  ;;  %v3375_v35 = vld [vmem:[%s3949_s1 + $0x340] sm:$0xff]  }
  0x3d   :  { %3090 = vmatprep.subr.bf16.mxu0 %v3311_v37 }
  0x3f   :  { %2931 = vmatpush3.bf16.msra.mxu1 %v3310_v36  ;;  %v3376_v36 = vld [vmem:[%s3950_s0 + $0x48] sm:$0xff]  }
  0x40   :  { %3091 = vmatpush3.bf16.msra.mxu0 %v3311_v37  ;;  %2936 = vmatprep.subr.bf16.mxu1 %v3313_v38  ;;  %v3377_v37 = vld [vmem:[%s3950_s0 + $0xc8] sm:$0xff]  }
  0x41   :  { %3096 = vmatprep.subr.bf16.mxu0 %v3315_v39 }
  0x42   :  { %2933 = vmatmul.mubr.bf16.vlgmr.msra.gmra.mrb[0].mxu1 %v3316_v40  ;;  %v3392_v40 = vld [vmem:[%s3950_s0 + $0x50] sm:$0xff]  }
  0x43   :  { %2937 = vmatpush3.bf16.msra.mxu1 %v3313_v38  ;;  %3093 = vmatmul.mubr.bf16.vlgmr.msra.gmra.mrb[0].mxu0 %v3317_v41  ;;  %v3378_v38 = vld [vmem:[%s3949_s1 + $0x148] sm:$0xff]   ;;  %v3394_v41 = vld [vmem:[%s3950_s0 + $0xd0] sm:$0xff]  }
  0x44   :  { %3097 = vmatpush3.bf16.msra.mxu0 %v3315_v39  ;;  %2938 = vmatprep.subr.bf16.mxu1 %v3318_v42  ;;  %v3379_v39 = vld [vmem:[%s3949_s1 + $0x348] sm:$0xff]  }
  0x45   :  { %3098 = vmatprep.subr.bf16.mxu0 %v3319_v43  ;;  %2952 = vmatprep.mubr.bf16.mxu1 %v3332_v44  ;;  %v3382_v44 = vld [vmem:[%s3949_s1 + $0x158] sm:$0xff]  }
  0x46   :  { %3112 = vmatprep.mubr.bf16.mxu0 %v3334_v45  ;;  %v3383_v45 = vld [vmem:[%s3949_s1 + $0x358] sm:$0xff]  }
  0x47   :  { %2939 = vmatpush3.bf16.msra.mxu1 %v3318_v42  ;;  %v3380_v42 = vld [vmem:[%s3949_s1 + $0x150] sm:$0xff]  }
  0x48   :  { %3099 = vmatpush3.bf16.msra.mxu0 %v3319_v43  ;;  %2940 = vmatprep.subr.bf16.mxu1 %v3320_v46  ;;  %v3381_v43 = vld [vmem:[%s3949_s1 + $0x350] sm:$0xff]  }
  0x49   :  { %3100 = vmatprep.subr.bf16.mxu0 %v3321_v47 }
  0x4b   :  { %2941 = vmatpush3.bf16.msra.mxu1 %v3320_v46  ;;  %v3384_v46 = vld [vmem:[%s3949_s1 + $0x160] sm:$0xff]  }
  0x4c   :  { %3101 = vmatpush3.bf16.msra.mxu0 %v3321_v47  ;;  %2942 = vmatprep.subr.bf16.mxu1 %v3322_v48  ;;  %v3385_v47 = vld [vmem:[%s3949_s1 + $0x360] sm:$0xff]  }
  0x4d   :  { %3102 = vmatprep.subr.bf16.mxu0 %v3323_v49 }
  0x4f   :  { %2943 = vmatpush3.bf16.msra.mxu1 %v3322_v48  ;;  %v3386_v48 = vld [vmem:[%s3949_s1 + $0x168] sm:$0xff]  }
  0x50   :  { %3103 = vmatpush3.bf16.msra.mxu0 %v3323_v49  ;;  %2944 = vmatprep.subr.bf16.mxu1 %v3324_v50  ;;  %v3387_v49 = vld [vmem:[%s3949_s1 + $0x368] sm:$0xff]  }
  0x51   :  { %3104 = vmatprep.subr.bf16.mxu0 %v3325_v51 }
  0x53   :  { %2945 = vmatpush3.bf16.msra.mxu1 %v3324_v50  ;;  %v3388_v50 = vld [vmem:[%s3949_s1 + $0x170] sm:$0xff]  }
  0x54   :  { %3105 = vmatpush3.bf16.msra.mxu0 %v3325_v51  ;;  %2946 = vmatprep.subr.bf16.mxu1 %v3326_v52  ;;  %v3389_v51 = vld [vmem:[%s3949_s1 + $0x370] sm:$0xff]  }
  0x55   :  { %3106 = vmatprep.subr.bf16.mxu0 %v3327_v53 }
  0x57   :  { %2947 = vmatpush3.bf16.msra.mxu1 %v3326_v52  ;;  %v3390_v52 = vld [vmem:[%s3949_s1 + $0x178] sm:$0xff]  }
  0x58   :  { %3107 = vmatpush3.bf16.msra.mxu0 %v3327_v53  ;;  %2948 = vmatprep.subr.bf16.mxu1 %v3328_v54  ;;  %v3391_v53 = vld [vmem:[%s3949_s1 + $0x378] sm:$0xff]  }
  0x59   :  { %3108 = vmatprep.subr.bf16.mxu0 %v3329_v55 }
  0x5b   :  { %2949 = vmatpush3.bf16.msra.mxu1 %v3328_v54  ;;  %v3393_v54 = vld [vmem:[%s3949_s1 + $0x180] sm:$0xff]  }
  0x5c   :  { %3109 = vmatpush3.bf16.msra.mxu0 %v3329_v55  ;;  %2950 = vmatprep.subr.bf16.mxu1 %v3330_v56  ;;  %v3395_v55 = vld [vmem:[%s3949_s1 + $0x380] sm:$0xff]  }
  0x5d   :  { %3110 = vmatprep.subr.bf16.mxu0 %v3331_v57 }
  0x5f   :  { %2951 = vmatpush3.bf16.msra.mxu1 %v3330_v56  ;;  %v3396_v56 = vld [vmem:[%s3950_s0 + $0x58] sm:$0xff]  }
  0x60   :  { %3111 = vmatpush3.bf16.msra.mxu0 %v3331_v57  ;;  %2956 = vmatprep.subr.bf16.mxu1 %v3333_v58  ;;  %v3397_v57 = vld [vmem:[%s3950_s0 + $0xd8] sm:$0xff]  }
  0x61   :  { %3116 = vmatprep.subr.bf16.mxu0 %v3335_v59 }
  0x62   :  { %2953 = vmatmul.mubr.bf16.vlgmr.msra.gmra.mrb[0].mxu1 %v3336_v60  ;;  %v3412_v60 = vld [vmem:[%s3950_s0 + $0x60] sm:$0xff]  }
  0x63   :  { %2957 = vmatpush3.bf16.msra.mxu1 %v3333_v58  ;;  %3113 = vmatmul.mubr.bf16.vlgmr.msra.gmra.mrb[0].mxu0 %v3337_v61  ;;  %v3398_v58 = vld [vmem:[%s3949_s1 + $0x188] sm:$0xff]   ;;  %v3414_v61 = vld [vmem:[%s3950_s0 + $0xe0] sm:$0xff]  }
  0x64   :  { %3117 = vmatpush3.bf16.msra.mxu0 %v3335_v59  ;;  %2958 = vmatprep.subr.bf16.mxu1 %v3338_v62  ;;  %v3399_v59 = vld [vmem:[%s3949_s1 + $0x388] sm:$0xff]  }
  0x65   :  { %3118 = vmatprep.subr.bf16.mxu0 %v3339_v63  ;;  %2972 = vmatprep.mubr.bf16.mxu1 %v3352_v0  ;;  %v3402_v0 = vld [vmem:[%s3949_s1 + $0x198] sm:$0xff]  }
  0x66   :  { %3132 = vmatprep.mubr.bf16.mxu0 %v3354_v1  ;;  %v3403_v1 = vld [vmem:[%s3949_s1 + $0x398] sm:$0xff]  }
  0x67   :  { %2959 = vmatpush3.bf16.msra.mxu1 %v3338_v62  ;;  %v3400_v62 = vld [vmem:[%s3949_s1 + $0x190] sm:$0xff]  }
  0x68   :  { %3119 = vmatpush3.bf16.msra.mxu0 %v3339_v63  ;;  %2960 = vmatprep.subr.bf16.mxu1 %v3340_v2  ;;  %v3401_v63 = vld [vmem:[%s3949_s1 + $0x390] sm:$0xff]  }
  0x69   :  { %3120 = vmatprep.subr.bf16.mxu0 %v3341_v3 }
  0x6b   :  { %2961 = vmatpush3.bf16.msra.mxu1 %v3340_v2  ;;  %v3404_v2 = vld [vmem:[%s3949_s1 + $0x1a0] sm:$0xff]  }
  0x6c   :  { %3121 = vmatpush3.bf16.msra.mxu0 %v3341_v3  ;;  %2962 = vmatprep.subr.bf16.mxu1 %v3342_v4  ;;  %v3405_v3 = vld [vmem:[%s3949_s1 + $0x3a0] sm:$0xff]  }
  0x6d   :  { %3122 = vmatprep.subr.bf16.mxu0 %v3343_v5 }
  0x6f   :  { %2963 = vmatpush3.bf16.msra.mxu1 %v3342_v4  ;;  %v3406_v4 = vld [vmem:[%s3949_s1 + $0x1a8] sm:$0xff]  }
  0x70   :  { %3123 = vmatpush3.bf16.msra.mxu0 %v3343_v5  ;;  %2964 = vmatprep.subr.bf16.mxu1 %v3344_v6  ;;  %v3407_v5 = vld [vmem:[%s3949_s1 + $0x3a8] sm:$0xff]  }
  0x71   :  { %3124 = vmatprep.subr.bf16.mxu0 %v3345_v7 }
  0x73   :  { %2965 = vmatpush3.bf16.msra.mxu1 %v3344_v6  ;;  %v3408_v6 = vld [vmem:[%s3949_s1 + $0x1b0] sm:$0xff]  }
  0x74   :  { %3125 = vmatpush3.bf16.msra.mxu0 %v3345_v7  ;;  %2966 = vmatprep.subr.bf16.mxu1 %v3346_v8  ;;  %v3409_v7 = vld [vmem:[%s3949_s1 + $0x3b0] sm:$0xff]  }
  0x75   :  { %3126 = vmatprep.subr.bf16.mxu0 %v3347_v9 }
  0x77   :  { %2967 = vmatpush3.bf16.msra.mxu1 %v3346_v8  ;;  %v3410_v8 = vld [vmem:[%s3949_s1 + $0x1b8] sm:$0xff]  }
  0x78   :  { %3127 = vmatpush3.bf16.msra.mxu0 %v3347_v9  ;;  %2968 = vmatprep.subr.bf16.mxu1 %v3348_v10  ;;  %v3411_v9 = vld [vmem:[%s3949_s1 + $0x3b8] sm:$0xff]  }
  0x79   :  { %3128 = vmatprep.subr.bf16.mxu0 %v3349_v11 }
  0x7b   :  { %2969 = vmatpush3.bf16.msra.mxu1 %v3348_v10  ;;  %v3413_v10 = vld [vmem:[%s3949_s1 + $0x1c0] sm:$0xff]  }
  0x7c   :  { %3129 = vmatpush3.bf16.msra.mxu0 %v3349_v11  ;;  %2970 = vmatprep.subr.bf16.mxu1 %v3350_v12  ;;  %v3415_v11 = vld [vmem:[%s3949_s1 + $0x3c0] sm:$0xff]  }
  0x7d   :  { %3130 = vmatprep.subr.bf16.mxu0 %v3351_v13 }
  0x7f   :  { %2971 = vmatpush3.bf16.msra.mxu1 %v3350_v12  ;;  %v3416_v12 = vld [vmem:[%s3950_s0 + $0x68] sm:$0xff]  }
  0x80   :  { %3131 = vmatpush3.bf16.msra.mxu0 %v3351_v13  ;;  %2976 = vmatprep.subr.bf16.mxu1 %v3353_v14  ;;  %v3417_v13 = vld [vmem:[%s3950_s0 + $0xe8] sm:$0xff]  }
  0x81   :  { %3136 = vmatprep.subr.bf16.mxu0 %v3355_v15 }
  0x82   :  { %2973 = vmatmul.mubr.bf16.vlgmr.msra.gmra.mrb[0].mxu1 %v3356_v16  ;;  %v3432_v16 = vld [vmem:[%s3950_s0 + $0x70] sm:$0xff]  }
  0x83   :  { %2977 = vmatpush3.bf16.msra.mxu1 %v3353_v14  ;;  %3133 = vmatmul.mubr.bf16.vlgmr.msra.gmra.mrb[0].mxu0 %v3357_v17  ;;  %v3418_v14 = vld [vmem:[%s3949_s1 + $0x1c8] sm:$0xff]   ;;  %v3433_v17 = vld [vmem:[%s3950_s0 + $0xf0] sm:$0xff]  }
  0x84   :  { %3137 = vmatpush3.bf16.msra.mxu0 %v3355_v15  ;;  %2978 = vmatprep.subr.bf16.mxu1 %v3358_v18  ;;  %v3419_v15 = vld [vmem:[%s3949_s1 + $0x3c8] sm:$0xff]  }
  0x85   :  { %3138 = vmatprep.subr.bf16.mxu0 %v3359_v19  ;;  %2992 = vmatprep.mubr.bf16.mxu1 %v3372_v20  ;;  %v3422_v20 = vld [vmem:[%s3949_s1 + $0x1d8] sm:$0xff]  }
  0x86   :  { %3152 = vmatprep.mubr.bf16.mxu0 %v3374_v21  ;;  %v3423_v21 = vld [vmem:[%s3949_s1 + $0x3d8] sm:$0xff]  }
  0x87   :  { %2979 = vmatpush3.bf16.msra.mxu1 %v3358_v18  ;;  %v3420_v18 = vld [vmem:[%s3949_s1 + $0x1d0] sm:$0xff]  }
  0x88   :  { %3139 = vmatpush3.bf16.msra.mxu0 %v3359_v19  ;;  %2980 = vmatprep.subr.bf16.mxu1 %v3360_v22  ;;  %v3421_v19 = vld [vmem:[%s3949_s1 + $0x3d0] sm:$0xff]  }
  0x89   :  { %3140 = vmatprep.subr.bf16.mxu0 %v3361_v23 }
  0x8b   :  { %2981 = vmatpush3.bf16.msra.mxu1 %v3360_v22  ;;  %v3424_v22 = vld [vmem:[%s3949_s1 + $0x1e0] sm:$0xff]  }
  0x8c   :  { %3141 = vmatpush3.bf16.msra.mxu0 %v3361_v23  ;;  %2982 = vmatprep.subr.bf16.mxu1 %v3362_v24  ;;  %v3425_v23 = vld [vmem:[%s3949_s1 + $0x3e0] sm:$0xff]  }
  0x8d   :  { %3142 = vmatprep.subr.bf16.mxu0 %v3363_v25 }
  0x8f   :  { %2983 = vmatpush3.bf16.msra.mxu1 %v3362_v24  ;;  %v3426_v24 = vld [vmem:[%s3949_s1 + $0x1e8] sm:$0xff]  }
  0x90   :  { %3143 = vmatpush3.bf16.msra.mxu0 %v3363_v25  ;;  %2984 = vmatprep.subr.bf16.mxu1 %v3364_v26  ;;  %v3427_v25 = vld [vmem:[%s3949_s1 + $0x3e8] sm:$0xff]  }
  0x91   :  { %3144 = vmatprep.subr.bf16.mxu0 %v3365_v27 }
  0x93   :  { %2985 = vmatpush3.bf16.msra.mxu1 %v3364_v26  ;;  %v3428_v26 = vld [vmem:[%s3949_s1 + $0x1f0] sm:$0xff]  }
  0x94   :  { %3145 = vmatpush3.bf16.msra.mxu0 %v3365_v27  ;;  %2986 = vmatprep.subr.bf16.mxu1 %v3366_v28  ;;  %v3429_v27 = vld [vmem:[%s3949_s1 + $0x3f0] sm:$0xff]  }
  0x95   :  { %3146 = vmatprep.subr.bf16.mxu0 %v3367_v29 }
  0x97   :  { %2987 = vmatpush3.bf16.msra.mxu1 %v3366_v28  ;;  %v3430_v28 = vld [vmem:[%s3949_s1 + $0x1f8] sm:$0xff]  }
  0x98   :  { %3147 = vmatpush3.bf16.msra.mxu0 %v3367_v29  ;;  %2988 = vmatprep.subr.bf16.mxu1 %v3368_v30  ;;  %v3431_v29 = vld [vmem:[%s3949_s1 + $0x3f8] sm:$0xff]  }
  0x99   :  { %3148 = vmatprep.subr.bf16.mxu0 %v3369_v31 }
  0x9b   :  { %2989 = vmatpush3.bf16.msra.mxu1 %v3368_v30  ;;  %v3434_v30 = vld [vmem:[%s3950_s0 + $0x78] sm:$0xff]  }
  0x9c   :  { %3149 = vmatpush3.bf16.msra.mxu0 %v3369_v31  ;;  %2990 = vmatprep.subr.bf16.mxu1 %v3370_v32  ;;  %v3435_v31 = vld [vmem:[%s3950_s0 + $0xf8] sm:$0xff]  }
  0x9d   :  { %3150 = vmatprep.subr.bf16.mxu0 %v3371_v33 }
  0x9f   :  { %2991 = vmatpush3.bf16.msra.mxu1 %v3370_v32 }
  0xa0   :  { %3151 = vmatpush3.bf16.msra.mxu0 %v3371_v33  ;;  %2996 = vmatprep.subr.bf16.mxu1 %v3373_v34 }
  0xa1   :  { %3156 = vmatprep.subr.bf16.mxu0 %v3375_v35 }
  0xa2   :  { %2993 = vmatmul.mubr.bf16.vlgmr.msra.gmra.mrb[0].mxu1 %v3376_v36 }
  0xa3   :  { %2997 = vmatpush3.bf16.msra.mxu1 %v3373_v34  ;;  %3153 = vmatmul.mubr.bf16.vlgmr.msra.gmra.mrb[0].mxu0 %v3377_v37  ;;  %v2716_v34 = vld [vmem:[%s3951_s2] ss:$0 sm:$0xff] }
  0xa4   :  { %3157 = vmatpush3.bf16.msra.mxu0 %v3375_v35  ;;  %2998 = vmatprep.subr.bf16.mxu1 %v3378_v38 }
  0xa5   :  { %3158 = vmatprep.subr.bf16.mxu0 %v3379_v39  ;;  %3012 = vmatprep.mubr.bf16.mxu1 %v3392_v40 }
  0xa6   :  { %3172 = vmatprep.mubr.bf16.mxu0 %v3394_v41 }
  0xa7   :  { %2999 = vmatpush3.bf16.msra.mxu1 %v3378_v38 }
  0xa8   :  { %3159 = vmatpush3.bf16.msra.mxu0 %v3379_v39  ;;  %3000 = vmatprep.subr.bf16.mxu1 %v3380_v42 }
  0xa9   :  { %3160 = vmatprep.subr.bf16.mxu0 %v3381_v43 }
  0xab   :  { %3001 = vmatpush3.bf16.msra.mxu1 %v3380_v42 }
  0xac   :  { %3161 = vmatpush3.bf16.msra.mxu0 %v3381_v43  ;;  %3002 = vmatprep.subr.bf16.mxu1 %v3382_v44 }
  0xad   :  { %3162 = vmatprep.subr.bf16.mxu0 %v3383_v45 }
  0xaf   :  { %3003 = vmatpush3.bf16.msra.mxu1 %v3382_v44 }
  0xb0   :  { %3163 = vmatpush3.bf16.msra.mxu0 %v3383_v45  ;;  %3004 = vmatprep.subr.bf16.mxu1 %v3384_v46 }
  0xb1   :  { %3164 = vmatprep.subr.bf16.mxu0 %v3385_v47 }
  0xb3   :  { %3005 = vmatpush3.bf16.msra.mxu1 %v3384_v46 }
  0xb4   :  { %3165 = vmatpush3.bf16.msra.mxu0 %v3385_v47  ;;  %3006 = vmatprep.subr.bf16.mxu1 %v3386_v48 }
  0xb5   :  { %3166 = vmatprep.subr.bf16.mxu0 %v3387_v49 }
  0xb7   :  { %3007 = vmatpush3.bf16.msra.mxu1 %v3386_v48 }
  0xb8   :  { %3167 = vmatpush3.bf16.msra.mxu0 %v3387_v49  ;;  %3008 = vmatprep.subr.bf16.mxu1 %v3388_v50 }
  0xb9   :  { %3168 = vmatprep.subr.bf16.mxu0 %v3389_v51 }
  0xbb   :  { %3009 = vmatpush3.bf16.msra.mxu1 %v3388_v50 }
  0xbc   :  { %3169 = vmatpush3.bf16.msra.mxu0 %v3389_v51  ;;  %3010 = vmatprep.subr.bf16.mxu1 %v3390_v52 }
  0xbd   :  { %3170 = vmatprep.subr.bf16.mxu0 %v3391_v53 }
  0xbf   :  { %3011 = vmatpush3.bf16.msra.mxu1 %v3390_v52 }
  0xc0   :  { %3171 = vmatpush3.bf16.msra.mxu0 %v3391_v53  ;;  %3016 = vmatprep.subr.bf16.mxu1 %v3393_v54 }
  0xc1   :  { %3176 = vmatprep.subr.bf16.mxu0 %v3395_v55 }
  0xc2   :  { %3013 = vmatmul.mubr.bf16.vlgmr.msra.gmra.mrb[0].mxu1 %v3396_v56 }
  0xc3   :  { %3017 = vmatpush3.bf16.msra.mxu1 %v3393_v54  ;;  %3173 = vmatmul.mubr.bf16.vlgmr.msra.gmra.mrb[0].mxu0 %v3397_v57 }
  0xc4   :  { %3177 = vmatpush3.bf16.msra.mxu0 %v3395_v55  ;;  %3018 = vmatprep.subr.bf16.mxu1 %v3398_v58 }
  0xc5   :  { %3178 = vmatprep.subr.bf16.mxu0 %v3399_v59  ;;  %3032 = vmatprep.mubr.bf16.mxu1 %v3412_v60 }
  0xc6   :  { %3192 = vmatprep.mubr.bf16.mxu0 %v3414_v61 }
  0xc7   :  { %3019 = vmatpush3.bf16.msra.mxu1 %v3398_v58 }
  0xc8   :  { %3179 = vmatpush3.bf16.msra.mxu0 %v3399_v59  ;;  %3020 = vmatprep.subr.bf16.mxu1 %v3400_v62 }
  0xc9   :  { %3180 = vmatprep.subr.bf16.mxu0 %v3401_v63 }
  0xcb   :  { %3021 = vmatpush3.bf16.msra.mxu1 %v3400_v62 }
  0xcc   :  { %3181 = vmatpush3.bf16.msra.mxu0 %v3401_v63  ;;  %3022 = vmatprep.subr.bf16.mxu1 %v3402_v0 }
  0xcd   :  { %3182 = vmatprep.subr.bf16.mxu0 %v3403_v1 }
  0xcf   :  { %3023 = vmatpush3.bf16.msra.mxu1 %v3402_v0 }
  0xd0   :  { %3183 = vmatpush3.bf16.msra.mxu0 %v3403_v1  ;;  %3024 = vmatprep.subr.bf16.mxu1 %v3404_v2 }
  0xd1   :  { %3184 = vmatprep.subr.bf16.mxu0 %v3405_v3 }
  0xd3   :  { %3025 = vmatpush3.bf16.msra.mxu1 %v3404_v2 }
  0xd4   :  { %3185 = vmatpush3.bf16.msra.mxu0 %v3405_v3  ;;  %3026 = vmatprep.subr.bf16.mxu1 %v3406_v4 }
  0xd5   :  { %3186 = vmatprep.subr.bf16.mxu0 %v3407_v5 }
  0xd7   :  { %3027 = vmatpush3.bf16.msra.mxu1 %v3406_v4 }
  0xd8   :  { %3187 = vmatpush3.bf16.msra.mxu0 %v3407_v5  ;;  %3028 = vmatprep.subr.bf16.mxu1 %v3408_v6 }
  0xd9   :  { %3188 = vmatprep.subr.bf16.mxu0 %v3409_v7 }
  0xdb   :  { %3029 = vmatpush3.bf16.msra.mxu1 %v3408_v6 }
  0xdc   :  { %3189 = vmatpush3.bf16.msra.mxu0 %v3409_v7  ;;  %3030 = vmatprep.subr.bf16.mxu1 %v3410_v8 }
  0xdd   :  { %3190 = vmatprep.subr.bf16.mxu0 %v3411_v9 }
  0xdf   :  { %3031 = vmatpush3.bf16.msra.mxu1 %v3410_v8 }
  0xe0   :  { %3191 = vmatpush3.bf16.msra.mxu0 %v3411_v9  ;;  %3036 = vmatprep.subr.bf16.mxu1 %v3413_v10 }
  0xe1   :  { %3196 = vmatprep.subr.bf16.mxu0 %v3415_v11 }
  0xe2   :  { %3033 = vmatmul.mubr.bf16.vlgmr.msra.gmra.mrb[0].mxu1 %v3416_v12 }
  0xe3   :  { %3037 = vmatpush3.bf16.msra.mxu1 %v3413_v10  ;;  %3193 = vmatmul.mubr.bf16.vlgmr.msra.gmra.mrb[0].mxu0 %v3417_v13 }
  0xe4   :  { %3197 = vmatpush3.bf16.msra.mxu0 %v3415_v11  ;;  %3038 = vmatprep.subr.bf16.mxu1 %v3418_v14 }
  0xe5   :  { %3198 = vmatprep.subr.bf16.mxu0 %v3419_v15  ;;  %3052 = vmatprep.mubr.bf16.mxu1 %v3432_v16 }
  0xe6   :  { %3212 = vmatprep.mubr.bf16.mxu0 %v3433_v17 }
  0xe7   :  { %3039 = vmatpush3.bf16.msra.mxu1 %v3418_v14 }
  0xe8   :  { %3199 = vmatpush3.bf16.msra.mxu0 %v3419_v15  ;;  %3040 = vmatprep.subr.bf16.mxu1 %v3420_v18 }
  0xe9   :  { %3200 = vmatprep.subr.bf16.mxu0 %v3421_v19 }
  0xeb   :  { %3041 = vmatpush3.bf16.msra.mxu1 %v3420_v18 }
  0xec   :  { %3201 = vmatpush3.bf16.msra.mxu0 %v3421_v19  ;;  %3042 = vmatprep.subr.bf16.mxu1 %v3422_v20 }
  0xed   :  { %3202 = vmatprep.subr.bf16.mxu0 %v3423_v21 }
  0xef   :  { %3043 = vmatpush3.bf16.msra.mxu1 %v3422_v20 }
  0xf0   :  { %3203 = vmatpush3.bf16.msra.mxu0 %v3423_v21  ;;  %3044 = vmatprep.subr.bf16.mxu1 %v3424_v22 }
  0xf1   :  { %3204 = vmatprep.subr.bf16.mxu0 %v3425_v23 }
  0xf3   :  { %3045 = vmatpush3.bf16.msra.mxu1 %v3424_v22 }
  0xf4   :  { %3205 = vmatpush3.bf16.msra.mxu0 %v3425_v23  ;;  %3046 = vmatprep.subr.bf16.mxu1 %v3426_v24 }
  0xf5   :  { %3206 = vmatprep.subr.bf16.mxu0 %v3427_v25 }
  0xf7   :  { %3047 = vmatpush3.bf16.msra.mxu1 %v3426_v24 }
  0xf8   :  { %3207 = vmatpush3.bf16.msra.mxu0 %v3427_v25  ;;  %3048 = vmatprep.subr.bf16.mxu1 %v3428_v26 }
  0xf9   :  { %3208 = vmatprep.subr.bf16.mxu0 %v3429_v27 }
  0xfb   :  { %3049 = vmatpush3.bf16.msra.mxu1 %v3428_v26 }
  0xfc   :  { %3209 = vmatpush3.bf16.msra.mxu0 %v3429_v27  ;;  %3050 = vmatprep.subr.bf16.mxu1 %v3430_v28 }
  0xfd   :  { %3210 = vmatprep.subr.bf16.mxu0 %v3431_v29 }
  0xff   :  { %3051 = vmatpush3.bf16.msra.mxu1 %v3430_v28 }
 0x100   :  { %3211 = vmatpush3.bf16.msra.mxu0 %v3431_v29 }
 0x102   :  { %3053 = vmatmul.mubr.bf16.vlgmr.msra.gmra.mrb[0].mxu1 %v3434_v30 }
 0x103   :  { %3213 = vmatmul.mubr.bf16.vlgmr.msra.gmra.mrb[0].mxu0 %v3435_v31 }
 0x1d5   :  { %v3054_v32 = vpop.f32.mrb[0].mxu1 }
 0x1d6   :  { %v3214_v33 = vpop.f32.mrb[0].mxu0  ;;  %v1066_v35 = vpop.f32.mrb[1].mxu1 }
 0x1d7   :  { %v3216_v36 = vadd.f32 %v3214_v33, %v3054_v32  ;;  %v2146_v37 = vpop.f32.mrb[1].mxu0  ;;  %v3055_v38 = vpop.f32.mrb[2].mxu1 }
 0x1d8   :  { %v3217_v39 = vadd.f32 %v2146_v37, %v1066_v35  ;;  %v3215_v40 = vpop.f32.mrb[2].mxu0  ;;  %v1069_v41 = vpop.f32.mrb[3].mxu1 }
 0x1d9   :  { %v2174_v42 = vadd.f32 %v3216_v36, %v2716_v34  ;;  %v3218_v43 = vadd.f32 %v3215_v40, %v3055_v38  ;;  %v2149_v44 = vpop.f32.mrb[3].mxu0 }
 0x1da   :  { %v2172_v45 = vadd.f32 %v3217_v39, %v2716_v34  ;;  %v3219_v46 = vadd.f32 %v2149_v44, %v1069_v41 }
 0x1db   :  { %v2175_v47 = vadd.f32 %v3218_v43, %v2716_v34  ;;  %v2194_v49 = vmul.f32 %v2174_v42, %v2174_v42 }
 0x1dc   :  { %v2173_v48 = vadd.f32 %v3219_v46, %v2716_v34  ;;  %v2192_v52 = vmul.f32 %v2172_v45, %v2172_v45 }
 0x1dd   :  { %v2183_v50 = vadd.f32 %v2175_v47, %v2174_v42  ;;  %v2195_v51 = vmul.f32 %v2175_v47, %v2175_v47 }
 0x1de   :  { %v2176_v53 = vadd.f32 %v2173_v48, %v2172_v45  ;;  %v2193_v54 = vmul.f32 %v2173_v48, %v2173_v48 }
 0x1df   :  { %v2184_v55 = vrot.slane %v2183_v50, 4  ;;  %v2203_v56 = vadd.f32 %v2195_v51, %v2194_v49 }
 0x1e0   :  { %v2177_v57 = vrot.slane %v2176_v53, 4  ;;  %v2196_v58 = vadd.f32 %v2193_v54, %v2192_v52 }
 0x1e1   :  { %v2185_v59 = vadd.f32 %v2184_v55, %v2183_v50  ;;  %v2204_v60 = vrot.slane %v2203_v56, 4 }
 0x1e2   :  { %v2178_v61 = vadd.f32 %v2177_v57, %v2176_v53  ;;  %v2197_v62 = vrot.slane %v2196_v58, 4 }
 0x1e3   :  { %v2186_v63 = vrot.slane %v2185_v59, 2  ;;  %v2205_v0 = vadd.f32 %v2204_v60, %v2203_v56 }
 0x1e4   :  { %v2179_v1 = vrot.slane %v2178_v61, 2  ;;  %v2198_v2 = vadd.f32 %v2197_v62, %v2196_v58 }
 0x1e5   :  { %v2187_v3 = vadd.f32 %v2186_v63, %v2185_v59  ;;  %v2206_v4 = vrot.slane %v2205_v0, 2 }
 0x1e6   :  { %v2180_v5 = vadd.f32 %v2179_v1, %v2178_v61  ;;  %v2199_v6 = vrot.slane %v2198_v2, 2 }
 0x1e7   :  { %v2188_v7 = vrot.slane %v2187_v3, 1  ;;  %v2207_v8 = vadd.f32 %v2206_v4, %v2205_v0 }
 0x1e8   :  { %v2181_v9 = vrot.slane %v2180_v5, 1  ;;  %v2200_v10 = vadd.f32 %v2199_v6, %v2198_v2 }
 0x1e9   :  { %v2189_v11 = vadd.f32 %v2188_v7, %v2187_v3  ;;  %v2208_v12 = vrot.slane %v2207_v8, 1 }
 0x1ea   :  { %v2182_v13 = vadd.f32 %v2181_v9, %v2180_v5  ;;  %v2201_v14 = vrot.slane %v2200_v10, 1 }
 0x1eb   :  { %v2191_v15 = vmul.f32 0.0625, %v2189_v11  ;;  %v2209_v16 = vadd.f32 %v2208_v12, %v2207_v8 }
 0x1ec   :  { %v2190_v17 = vmul.f32 0.0625, %v2182_v13  ;;  %v2202_v18 = vadd.f32 %v2201_v14, %v2200_v10 }
 0x1ed   :  { %v2211_v19 = vmul.f32 0.0625, %v2209_v16  ;;  %v2213_v20 = vmul.f32 %v2191_v15, %v2191_v15  ;;  %v2218_v21 = vsub.f32 %v2174_v42, %v2191_v15  ;;  %v2219_v22 = vsub.f32 %v2175_v47, %v2191_v15 }
 0x1ee   :  { %v2210_v23 = vmul.f32 0.0625, %v2202_v18  ;;  %v2212_v24 = vmul.f32 %v2190_v17, %v2190_v17  ;;  %v2216_v25 = vsub.f32 %v2172_v45, %v2190_v17  ;;  %v2217_v26 = vsub.f32 %v2173_v48, %v2190_v17 }
 0x1ef   :  { %v2215_v27 = vsub.f32 %v2211_v19, %v2213_v20 }
 0x1f0   :  { %v2214_v28 = vsub.f32 %v2210_v23, %v2212_v24 }
 0x1f1   :  { %v2221_v29 = vadd.f32 1e-05, %v2215_v27 }
 0x1f2   :  { %v2220_v30 = vadd.f32 1e-05, %v2214_v28 }
 0x1f3   :  { %3436 = vrsqrt.f32 %v2221_v29 }
 0x1f4   :  { %3438 = vrsqrt.f32 %v2220_v30 }
 0x1fd   :  { %v3437_v31 = vpop.eup %3436 }
 0x1fe   :  { %v3439_v32 = vpop.eup %3438  ;;  %v2226_v33 = vmul.f32 %v3437_v31, %v2218_v21  ;;  %v2227_v34 = vmul.f32 %v3437_v31, %v2219_v22 }
 0x1ff   :  { %v2224_v35 = vmul.f32 %v3439_v32, %v2216_v25  ;;  %v2225_v36 = vmul.f32 %v3439_v32, %v2217_v26 }
 0x200   :  { %v2230_v37 = vmax.f32 %v2226_v33, 0.0  ;;  %v2231_v38 = vmax.f32 %v2227_v34, 0.0 }
 0x201   :  { %v2228_v39 = vmax.f32 %v2224_v35, 0.0  ;;  %v2229_v40 = vmax.f32 %v2225_v36, 0.0 }
 0x202   :  { %v2733_v41 = vpack.c.bf16 %v2231_v38, %v2230_v37 }
 0x203   :  { %v2728_v42 = vpack.c.bf16 %v2229_v40, %v2228_v39 }
 0x204   :  { %2735 = vst [vmem:[%s3952_s3 + $0x8] sm:$0xff] %v2733_v41  }
 0x205   :  { %2729 = vst [vmem:[%s3952_s3] sm:$0xff] %v2728_v42  }

</bundles_post_ra>
